<compile_context>
chip_gen: v7x
topology: tpu7x:2x2x1
jax: 0.10.0
libtpu: 0.0.40
codegen_flags: <defaults>
</compile_context>

<pallas_src>
import functools

import jax
import jax.numpy as jnp
from jax import lax
from jax.experimental import pallas as pl
from jax.experimental.pallas import tpu as pltpu


# ---------------------------------------------------------------------------
# In-kernel helpers
# ---------------------------------------------------------------------------

def _gn_rows(x, n_valid, eps):
    # GroupNorm with group_size == 1 (num_groups == num_channels): per-channel stats over the
    # first n_valid rows.  Rows >= n_valid (padding) must be exactly zero; the E[x^2]-mean^2
    # form makes them drop out of both sums.  x: (N, C) f32, biased variance (matches torch).
    inv_n = 1.0 / float(n_valid)
    mean = jnp.sum(x, axis=0, keepdims=True) * inv_n
    ex2 = jnp.sum(x * x, axis=0, keepdims=True) * inv_n
    var = jnp.maximum(ex2 - mean * mean, 0.0)
    return (x - mean) * lax.rsqrt(var + eps)


def _im2col_rows(x_tok, w_map):
    # 3x3-conv im2col on row-major tokens (token = y*w_map + x) via XLU sublane rotations:
    # tap (dy,dx) block t = dy*3+dx of the result is x_tok[(i + (dy-1)*w_map + (dx-1)) % N].
    # Boundary (zero-pad) taps are zeroed by the caller's precomputed (N, 9*Cin) mask; for all
    # valid taps the cyclic wrap never crosses the real token range, so padding rows are inert.
    n = x_tok.shape[0]
    taps = []
    for dy in range(3):
        for dx in range(3):
            off = (dy - 1) * w_map + (dx - 1)
            if off == 0:
                taps.append(x_tok)
            else:
                taps.append(pltpu.roll(x_tok, (-off) % n, 0))
    return jnp.concatenate(taps, axis=-1)                       # (N, 9*Cin)


# ---------------------------------------------------------------------------
# Fused per-batch kernel
# ---------------------------------------------------------------------------

def _fused_kernel(gx_ref, roiw_ref, ctx_ref, qb_ref, qkw_ref, po_w_ref, sp_w_ref,
                  cb_ref, vmask_ref, smask_ref, sel_ref,
                  outg_ref, attn_ref, *, NR, NRp, Wc, R, C, eps_norm, eps_spade):
    f32 = jnp.float32
    bf16 = jnp.bfloat16

    gx = gx_ref[0]                                   # (HW, C)  f32 global features (NHWC tokens)
    ctx = ctx_ref[0]                                 # (Nc, D)  f32 context tokens
    Nc = ctx.shape[0]

    # ---- roi_align as one bilinear-weight matmul (bf16 MXU, f32 acc); padded rows are zero ----
    roi_tok = jnp.dot(roiw_ref[0], gx.astype(bf16), preferred_element_type=f32)   # (NRp, C)

    # ---- local_norm / context_norm (GroupNorm, group_size == 1); affine folded into qk_w ----
    gn_roi = _gn_rows(roi_tok, NR, eps_norm)
    gn_ctx = _gn_rows(ctx, Nc, eps_norm)

    # ---- fused q & k 1x1 projections: one (NRp+Nc, C) x (C, 2C) matmul ----
    lhs = jnp.concatenate([gn_roi, gn_ctx], axis=0).astype(bf16)
    qk = jnp.dot(lhs, qkw_ref[...], preferred_element_type=f32)                    # (NRp+Nc, 2C)
    q = qk[:NRp, :C] + qb_ref[0]                     # indicator channels folded into per-batch bias
    k = qk[NRp:, C:] + cb_ref[0:1, :C]

    # ---- v = local_proj_out(context_map): single K=9*D matmul over in-kernel im2col taps ----
    v_taps = _im2col_rows(ctx, Wc) * vmask_ref[...]                                # (Nc, 9D)
    v_tok = jnp.dot(v_taps.astype(bf16), po_w_ref[...],
                    preferred_element_type=f32) + cb_ref[1:2, :C]                  # (Nc, C)

    # ---- attention (no 1/sqrt(d) scale, matching the reference module) ----
    sim = lax.dot_general(q.astype(bf16), k.astype(bf16), (((1,), (1,)), ((), ())),
                          preferred_element_type=f32)                              # (NRp, Nc)
    sim = sim - jnp.max(sim, axis=-1, keepdims=True)
    p = jnp.exp(sim)
    denom = jnp.sum(p, axis=-1, keepdims=True)
    r = pl.reciprocal(denom, approx=True)
    r = r * (2.0 - denom * r)                        # one Newton step -> ~f32-exact softmax
    attn = p * r
    attn_ref[0] = attn[:NR].astype(attn_ref.dtype)

    # ---- attn @ [v | context] in one matmul ----
    vc = jnp.concatenate([v_tok, ctx], axis=-1).astype(bf16)                       # (Nc, C+D)
    ovc = jnp.dot(attn.astype(bf16), vc, preferred_element_type=f32)               # (NRp, C+D)
    row_valid = (lax.broadcasted_iota(jnp.int32, (NRp, 1), 0) < NR).astype(f32)
    x_attn = ovc[:, :C] * row_valid                  # zero padded rows so GN stats stay exact
    align_ctx = ovc[:, C:]

    # ---- SPADE / FDN: GN(affine=False) * conv_gamma + conv_beta (both 3x3 convs fused) ----
    s_taps = _im2col_rows(align_ctx, R) * smask_ref[...]                           # (NRp, 9D)
    gb = jnp.dot(s_taps.astype(bf16), sp_w_ref[...],
                 preferred_element_type=f32) + cb_ref[2:3, :]                      # (NRp, 2C)
    x_loc = _gn_rows(x_attn, NR, eps_spade) * gb[:, :C] + gb[:, C:]                # (NRp, C)

    # ---- fused nearest-resize paste-back: global_x += interp(local) inside the bbox ----
    paste = jnp.dot(sel_ref[0], x_loc.astype(bf16), preferred_element_type=f32)    # (HW, C)
    outg_ref[0] = (gx + paste).astype(outg_ref.dtype)


# ---------------------------------------------------------------------------
# Plain-JAX glue (all device-side, static shapes, jittable)
# ---------------------------------------------------------------------------

def _tap_mask_full(h_map, w_map, n_rows, cin):
    # (n_rows, 9*cin) f32 validity mask for the 9 taps of a 3x3 same-padding conv on a
    # row-major (h_map, w_map) token map; rows >= h_map*w_map (padding) are all-zero.
    idx = jnp.arange(n_rows)
    ys, xs = idx // w_map, idx % w_map
    cols = []
    for dy in range(3):
        for dx in range(3):
            ok = ((ys + dy - 1 >= 0) & (ys + dy - 1 < h_map) &
                  (xs + dx - 1 >= 0) & (xs + dx - 1 < w_map) & (ys < h_map))
            cols.append(jnp.broadcast_to(ok[:, None], (n_rows, cin)))
    return jnp.concatenate(cols, axis=-1).astype(jnp.float32)


def _roi_bilinear_weights(box, h, w, r):
    # torchvision roi_align(aligned=False, spatial_scale=1) as a (r*r, h*w) bilinear weight
    # matrix for one box, one sample per bin.
    # TODO(synk): sampling_ratio=-1 averages ceil(roi/r)^2 samples per bin; the single-sample
    # form is exact only while roi_h, roi_w <= r (true for normalized bboxes).
    dt = jnp.float32
    x1, y1, x2, y2 = box[0], box[1], box[2], box[3]
    roi_w = jnp.maximum(x2 - x1, 1.0)
    roi_h = jnp.maximum(y2 - y1, 1.0)
    idx = jnp.arange(r, dtype=dt)
    ys = y1 + (idx + 0.5) * (roi_h / r)
    xs = x1 + (idx + 0.5) * (roi_w / r)
    yy = jnp.broadcast_to(ys[:, None], (r, r)).reshape(-1)
    xx = jnp.broadcast_to(xs[None, :], (r, r)).reshape(-1)
    valid = ~((yy < -1.0) | (yy > h) | (xx < -1.0) | (xx > w))
    yyc = jnp.maximum(yy, 0.0)
    xxc = jnp.maximum(xx, 0.0)
    y_lo0 = jnp.floor(yyc).astype(jnp.int32)
    x_lo0 = jnp.floor(xxc).astype(jnp.int32)
    y_top = y_lo0 >= h - 1
    x_top = x_lo0 >= w - 1
    y_lo = jnp.where(y_top, h - 1, y_lo0)
    y_hi = jnp.where(y_top, h - 1, y_lo0 + 1)
    x_lo = jnp.where(x_top, w - 1, x_lo0)
    x_hi = jnp.where(x_top, w - 1, x_lo0 + 1)
    yv = jnp.where(y_top, y_lo.astype(dt), yyc)
    xv = jnp.where(x_top, x_lo.astype(dt), xxc)
    ly = yv - y_lo.astype(dt)
    lx = xv - x_lo.astype(dt)
    hy = 1.0 - ly
    hx = 1.0 - lx
    vf = valid.astype(dt)
    oh_y_lo = jax.nn.one_hot(y_lo, h, dtype=dt)
    oh_y_hi = jax.nn.one_hot(y_hi, h, dtype=dt)
    oh_x_lo = jax.nn.one_hot(x_lo, w, dtype=dt)
    oh_x_hi = jax.nn.one_hot(x_hi, w, dtype=dt)
    wmat = ((hy * hx * vf)[:, None, None] * oh_y_lo[:, :, None] * oh_x_lo[:, None, :] +
            (hy * lx * vf)[:, None, None] * oh_y_lo[:, :, None] * oh_x_hi[:, None, :] +
            (ly * hx * vf)[:, None, None] * oh_y_hi[:, :, None] * oh_x_lo[:, None, :] +
            (ly * lx * vf)[:, None, None] * oh_y_hi[:, :, None] * oh_x_hi[:, None, :])
    return wmat.reshape(r * r, h * w)


def _nearest_select(lo, hi, size, r):
    # One-hot select implementing torch F.interpolate(mode='nearest') into [lo, hi) along one
    # axis; rows outside the bbox are all-zero.  lo, hi: (B,) -> (B, size, r).
    pos = jnp.arange(size, dtype=jnp.int32)[None, :]
    lo = lo[:, None]
    hi = hi[:, None]
    inside = (pos >= lo) & (pos < hi)
    scale = r / (hi - lo).astype(jnp.float32)
    src = jnp.floor((pos - lo).astype(jnp.float32) * scale).astype(jnp.int32)
    src = jnp.clip(src, 0, r - 1)
    oh = jax.nn.one_hot(src, r, dtype=jnp.float32)
    return oh * inside[..., None].astype(jnp.float32)


# ---------------------------------------------------------------------------
# Full forward pass
# ---------------------------------------------------------------------------

def local_refine_forward(global_x, context, indicator, bbox, cond_flag, params, roi_size=9):
    B, C, H, W = global_x.shape
    Nc, D = context.shape[1], context.shape[2]
    Hc = 16                       # module: rearrange(context, 'b (h w) c -> b c h w', h=16)
    Wc = Nc // Hc
    R = roi_size
    NR = R * R
    NRp = ((NR + 7) // 8) * 8     # pad roi tokens to a sublane multiple (81 -> 88)
    HW = H * W
    f32 = jnp.float32
    bf16 = jnp.bfloat16

    # GroupNorm(32, ch) == per-channel stats only because group size is 1 (ch == 32) here.
    # TODO(synk): channels > 32 would need per-group pooling of the channel statistics.
    assert C == 32 and D == 32 and Nc % Hc == 0

    # cond_flag gating: uncond batch entries see the per-batch token-mean context.
    ctx_mean = jnp.mean(context, axis=1, keepdims=True)
    ctx_eff = jnp.where(cond_flag[:, None, None], context, ctx_mean).astype(f32)   # (B, Nc, D)

    gx_flat = jnp.transpose(global_x, (0, 2, 3, 1)).reshape(B, HW, C)              # NHWC tokens

    # roi_align as per-batch bilinear-weight matrices (bf16; rows padded NR -> NRp with zeros).
    roi_w = jax.vmap(lambda bx: _roi_bilinear_weights(bx, H, W, R))(bbox)           # (B, NR, HW)
    roi_w = jnp.pad(roi_w, ((0, 0), (0, NRp - NR), (0, 0))).astype(bf16)

    # local_norm / context_norm affine folded into the fused q/k projection (exact: all linear);
    # indicator channels folded into the per-batch q bias.
    pi_w, pi_b = params["pi_w"], params["pi_b"]
    qk_w = jnp.concatenate([pi_w[:C] * params["ln_g"].reshape(C, 1),
                            params["cc_w"] * params["cn_g"].reshape(D, 1)],
                           axis=1).astype(bf16)                                      # (C, 2C)
    q_bias = (params["ln_b"] @ pi_w[:C] + indicator.astype(f32) @ pi_w[C:]
              + pi_b).reshape(B, 1, C)
    k_bias = params["cn_b"] @ params["cc_w"] + params["cc_b"]                        # (1, C)

    # 3x3 convs flattened to (9*Cin, Cout) bf16; conv_gamma|conv_beta fused into one matmul.
    po_w = params["po_w"].reshape(9 * D, C).astype(bf16)
    sp_w = jnp.concatenate([params["sg_w"], params["sb_w"]],
                           axis=-1).reshape(9 * D, 2 * C).astype(bf16)
    sp_b = jnp.concatenate([params["sg_b"], params["sb_b"]], axis=-1)                # (1, 2C)

    # batch-invariant bias rows packed into ONE small operand: row0=k_bias, row1=po_b, row2=sp_b.
    const_b = jnp.zeros((8, 2 * C), f32)
    const_b = (const_b.at[0, :C].set(k_bias[0])
                       .at[1, :C].set(params["po_b"][0])
                       .at[2, :].set(sp_b[0]))

    # full-width (N, 9*Cin) tap-validity masks (one in-kernel multiply; no lane extracts).
    vmask = _tap_mask_full(Hc, Wc, Nc, D)                                            # (Nc, 9D)
    smask = _tap_mask_full(R, R, NRp, D)                                             # (NRp, 9D)

    # nearest-resize paste-back select matrix: sel[b, h*W+w, r*R+s] = 1 iff pixel (h,w) inside
    # the bbox copies roi cell (r,s).  Module semantics: bbox_int = (bbox * h).int(),
    # x2,y2 = max(x2,y2, x1,y1 + 1); nearest interpolation into the bbox, added to global_x.
    bbox_px = (bbox * H).astype(jnp.int32)       # module scales all four coords by h (H == W here)
    xy1 = bbox_px[:, :2]
    xy2 = jnp.maximum(bbox_px[:, 2:], xy1 + 1)
    s_y = _nearest_select(xy1[:, 1], xy2[:, 1], H, R)                                # (B, H, R)
    s_x = _nearest_select(xy1[:, 0], xy2[:, 0], W, R)                                # (B, W, R)
    sel = jnp.einsum("bhr,bws->bhwrs", s_y, s_x).reshape(B, HW, NR)
    sel = jnp.pad(sel, ((0, 0), (0, 0), (0, NRp - NR))).astype(bf16)

    # TODO(synk): if B grows, process several batch items per grid step (v6e/v7x MXU occupancy).
    kern = functools.partial(_fused_kernel, NR=NR, NRp=NRp, Wc=Wc, R=R, C=C,
                             eps_norm=1e-6, eps_spade=1e-5)
    out_flat, attn = pl.pallas_call(
        kern,
        out_shape=(jax.ShapeDtypeStruct((B, HW, C), f32),
                   jax.ShapeDtypeStruct((B, NR, Nc), f32)),
        grid=(B,),
        in_specs=[
            pl.BlockSpec((1, HW, C), lambda i: (i, 0, 0)),          # gx_flat (aliased to output 0)
            pl.BlockSpec((1, NRp, HW), lambda i: (i, 0, 0)),        # roi_w (bf16)
            pl.BlockSpec((1, Nc, D), lambda i: (i, 0, 0)),          # ctx_eff
            pl.BlockSpec((1, 1, C), lambda i: (i, 0, 0)),           # q_bias
            pl.BlockSpec((C, 2 * C), lambda i: (0, 0)),             # qk_w (bf16)
            pl.BlockSpec((9 * D, C), lambda i: (0, 0)),             # po_w (bf16)
            pl.BlockSpec((9 * D, 2 * C), lambda i: (0, 0)),         # sp_w (bf16)
            pl.BlockSpec((8, 2 * C), lambda i: (0, 0)),             # const_b
            pl.BlockSpec((Nc, 9 * D), lambda i: (0, 0)),            # vmask
            pl.BlockSpec((NRp, 9 * D), lambda i: (0, 0)),           # smask
            pl.BlockSpec((1, HW, NRp), lambda i: (i, 0, 0)),        # sel (bf16)
        ],
        out_specs=(pl.BlockSpec((1, HW, C), lambda i: (i, 0, 0)),
                   pl.BlockSpec((1, NR, Nc), lambda i: (i, 0, 0))),
        input_output_aliases={0: 0},
        compiler_params=pltpu.CompilerParams(dimension_semantics=("parallel",)),
    )(gx_flat, roi_w, ctx_eff, q_bias, qk_w, po_w, sp_w, const_b, vmask, smask, sel)

    out_global = jnp.transpose(out_flat.reshape(B, H, W, C), (0, 3, 1, 2))
    return out_global, attn

    # TODO(synk): mask / mask_method='argmax' branch and add_positional_embedding are not
    # implemented (mask=None, no-positional-embedding path only).


# ---------------------------------------------------------------------------
# Deterministic parameter init (shapes follow the module's __init__; synthetic values)
# ---------------------------------------------------------------------------

def init_params(key, C, D):
    ks = jax.random.split(key, 16)
    n = lambda k, s, sc: jax.random.normal(k, s, jnp.float32) * sc
    return {
        # local_norm / context_norm GroupNorm affine params
        "ln_g": 1.0 + 0.1 * n(ks[0], (1, C), 1.0), "ln_b": 0.1 * n(ks[1], (1, C), 1.0),
        "cn_g": 1.0 + 0.1 * n(ks[2], (1, D), 1.0), "cn_b": 0.1 * n(ks[3], (1, D), 1.0),
        # local_proj_in: Conv2d(C+2, C, 1)  -> stored as (C+2, C)
        "pi_w": n(ks[4], (C + 2, C), (C + 2) ** -0.5), "pi_b": 0.02 * n(ks[5], (1, C), 1.0),
        # context_conv: Conv2d(D, C, 1)     -> stored as (D, C)
        "cc_w": n(ks[6], (D, C), D ** -0.5), "cc_b": 0.02 * n(ks[7], (1, C), 1.0),
        # local_proj_out: Conv2d(D, C, 3)   -> stored as (9, D, C), tap t = dy*3 + dx
        "po_w": n(ks[8], (9, D, C), (9 * D) ** -0.5), "po_b": 0.02 * n(ks[9], (1, C), 1.0),
        # SPADE conv_gamma / conv_beta: Conv2d(D, C, 3)
        "sg_w": n(ks[10], (9, D, C), (9 * D) ** -0.5), "sg_b": 0.02 * n(ks[11], (1, C), 1.0),
        "sb_w": n(ks[12], (9, D, C), (9 * D) ** -0.5), "sb_b": 0.02 * n(ks[13], (1, C), 1.0),
    }


if __name__ == "__main__":
    # small shapes: in_channels=32 (GroupNorm(32,.)), context_dim=32,
    # context seq = 16*16 = 256 tokens (rearranged to a 16x16 map), roi_size=9
    B, C, D, H, W, R = 2, 32, 32, 16, 16, 9
    N_CTX = 16 * 16

    key = jax.random.PRNGKey(0)
    k_gx, k_ctx, k_par = jax.random.split(key, 3)

    global_x = jax.random.normal(k_gx, (B, C, H, W), jnp.float32)
    context = jax.random.normal(k_ctx, (B, N_CTX, D), jnp.float32)
    indicator = jnp.array([[1.0, 0.0], [0.0, 1.0]], jnp.float32)                 # (B, 2)
    bbox = jnp.array([[0.10, 0.20, 0.60, 0.70],
                      [0.30, 0.10, 0.90, 0.80]], jnp.float32)                    # normalized (x1,y1,x2,y2)
    cond_flag = jnp.array([True, False])

    params = init_params(k_par, C, D)

    fwd = jax.jit(local_refine_forward, static_argnames=("roi_size",))
    out_global, attn = fwd(global_x, context, indicator, bbox, cond_flag, params, roi_size=R)
    jax.block_until_ready((out_global, attn))
    assert out_global.shape == (B, C, H, W) and attn.shape == (B, R * R, N_CTX)
    assert bool(jnp.all(jnp.isfinite(out_global))) and bool(jnp.all(jnp.isfinite(attn)))
    print("KERNEL_OK")
</pallas_src>

<mosaic_0001>
module attributes {stable_mosaic.version = 11 : i64} {
  func.func @_fused_kernel(%arg0: i32, %arg1: memref<1x256x32xf32, #tpu.memory_space<vmem>>, %arg2: memref<1x88x256xbf16, #tpu.memory_space<vmem>>, %arg3: memref<1x256x32xf32, #tpu.memory_space<vmem>>, %arg4: memref<1x1x32xf32, #tpu.memory_space<vmem>>, %arg5: memref<32x64xbf16, #tpu.memory_space<vmem>>, %arg6: memref<288x32xbf16, #tpu.memory_space<vmem>>, %arg7: memref<288x64xbf16, #tpu.memory_space<vmem>>, %arg8: memref<8x64xf32, #tpu.memory_space<vmem>>, %arg9: memref<256x288xf32, #tpu.memory_space<vmem>>, %arg10: memref<88x288xf32, #tpu.memory_space<vmem>>, %arg11: memref<1x256x88xbf16, #tpu.memory_space<vmem>>, %arg12: memref<1x256x32xf32, #tpu.memory_space<vmem>>, %arg13: memref<1x81x256xf32, #tpu.memory_space<vmem>>) attributes {dimension_semantics = [#tpu.dimension_semantics<parallel>], iteration_bounds = array<i64: 2>, scalar_prefetch = 0 : i64, scratch_operands = 0 : i64, tpu.core_type = #tpu.core_type<tc>, window_params = [{transform_indices = @transform_0, window_bounds = array<i64: 1, 256, 32>}, {transform_indices = @transform_1, window_bounds = array<i64: 1, 88, 256>}, {transform_indices = @transform_2, window_bounds = array<i64: 1, 256, 32>}, {transform_indices = @transform_3, window_bounds = array<i64: 1, 1, 32>}, {pipeline_mode = #tpu.pipeline_mode<synchronous>, transform_indices = @transform_4, window_bounds = array<i64: 32, 64>}, {pipeline_mode = #tpu.pipeline_mode<synchronous>, transform_indices = @transform_5, window_bounds = array<i64: 288, 32>}, {pipeline_mode = #tpu.pipeline_mode<synchronous>, transform_indices = @transform_6, window_bounds = array<i64: 288, 64>}, {pipeline_mode = #tpu.pipeline_mode<synchronous>, transform_indices = @transform_7, window_bounds = array<i64: 8, 64>}, {pipeline_mode = #tpu.pipeline_mode<synchronous>, transform_indices = @transform_8, window_bounds = array<i64: 256, 288>}, {pipeline_mode = #tpu.pipeline_mode<synchronous>, transform_indices = @transform_9, window_bounds = array<i64: 88, 288>}, {transform_indices = @transform_10, window_bounds = array<i64: 1, 256, 88>}, {transform_indices = @transform_11, window_bounds = array<i64: 1, 256, 32>}, {transform_indices = @transform_12, window_bounds = array<i64: 1, 81, 256>}]} {
    %c0 = arith.constant 0 : index
    %c0_0 = arith.constant 0 : index
    %c0_1 = arith.constant 0 : index
    %0 = vector.load %arg1[%c0, %c0_0, %c0_1] : memref<1x256x32xf32, #tpu.memory_space<vmem>>, vector<1x256x32xf32>
    %1 = vector.shape_cast %0 : vector<1x256x32xf32> to vector<256x32xf32>
    %c0_2 = arith.constant 0 : index
    %c0_3 = arith.constant 0 : index
    %c0_4 = arith.constant 0 : index
    %2 = vector.load %arg3[%c0_2, %c0_3, %c0_4] : memref<1x256x32xf32, #tpu.memory_space<vmem>>, vector<1x256x32xf32>
    %3 = vector.shape_cast %2 : vector<1x256x32xf32> to vector<256x32xf32>
    %c0_5 = arith.constant 0 : index
    %c0_6 = arith.constant 0 : index
    %c0_7 = arith.constant 0 : index
    %4 = vector.load %arg2[%c0_5, %c0_6, %c0_7] : memref<1x88x256xbf16, #tpu.memory_space<vmem>>, vector<1x88x256xbf16>
    %5 = vector.shape_cast %4 : vector<1x88x256xbf16> to vector<88x256xbf16>
    %6 = arith.truncf %1 : vector<256x32xf32> to vector<256x32xbf16>
    %cst = arith.constant dense<0.000000e+00> : vector<88x32xf32>
    %7 = tpu.matmul %5, %6, %cst {dimension_numbers = #tpu.dot_dimension_numbers<[1], [0], [0], [1], [0, 0, 1, 1], [], []>} : vector<88x256xbf16>, vector<256x32xbf16>, vector<88x32xf32> -> vector<88x32xf32>
    %cst_8 = arith.constant dense<0.000000e+00> : vector<32xf32>
    %8 = vector.multi_reduction <add>, %7, %cst_8 [0] : vector<88x32xf32> to vector<32xf32>
    %9 = vector.shape_cast %8 : vector<32xf32> to vector<1x32xf32>
    %cst_9 = arith.constant 0.0123456791 : f32
    %10 = vector.broadcast %cst_9 : f32 to vector<1x32xf32>
    %11 = arith.mulf %9, %10 : vector<1x32xf32>
    %12 = arith.mulf %7, %7 : vector<88x32xf32>
    %cst_10 = arith.constant dense<0.000000e+00> : vector<32xf32>
    %13 = vector.multi_reduction <add>, %12, %cst_10 [0] : vector<88x32xf32> to vector<32xf32>
    %14 = vector.shape_cast %13 : vector<32xf32> to vector<1x32xf32>
    %cst_11 = arith.constant 0.0123456791 : f32
    %15 = vector.broadcast %cst_11 : f32 to vector<1x32xf32>
    %16 = arith.mulf %14, %15 : vector<1x32xf32>
    %17 = arith.mulf %11, %11 : vector<1x32xf32>
    %18 = arith.subf %16, %17 : vector<1x32xf32>
    %cst_12 = arith.constant 0.000000e+00 : f32
    %19 = vector.broadcast %cst_12 : f32 to vector<1x32xf32>
    %20 = arith.maximumf %18, %19 : vector<1x32xf32>
    %21 = vector.broadcast %11 : vector<1x32xf32> to vector<88x32xf32>
    %22 = arith.subf %7, %21 : vector<88x32xf32>
    %cst_13 = arith.constant 9.99999997E-7 : f32
    %23 = vector.broadcast %cst_13 : f32 to vector<1x32xf32>
    %24 = arith.addf %20, %23 : vector<1x32xf32>
    %25 = math.rsqrt %24 : vector<1x32xf32>
    %26 = vector.broadcast %25 : vector<1x32xf32> to vector<88x32xf32>
    %27 = arith.mulf %22, %26 : vector<88x32xf32>
    %cst_14 = arith.constant dense<0.000000e+00> : vector<32xf32>
    %28 = vector.multi_reduction <add>, %3, %cst_14 [0] : vector<256x32xf32> to vector<32xf32>
    %29 = vector.shape_cast %28 : vector<32xf32> to vector<1x32xf32>
    %cst_15 = arith.constant 3.906250e-03 : f32
    %30 = vector.broadcast %cst_15 : f32 to vector<1x32xf32>
    %31 = arith.mulf %29, %30 : vector<1x32xf32>
    %32 = arith.mulf %3, %3 : vector<256x32xf32>
    %cst_16 = arith.constant dense<0.000000e+00> : vector<32xf32>
    %33 = vector.multi_reduction <add>, %32, %cst_16 [0] : vector<256x32xf32> to vector<32xf32>
    %34 = vector.shape_cast %33 : vector<32xf32> to vector<1x32xf32>
    %cst_17 = arith.constant 3.906250e-03 : f32
    %35 = vector.broadcast %cst_17 : f32 to vector<1x32xf32>
    %36 = arith.mulf %34, %35 : vector<1x32xf32>
    %37 = arith.mulf %31, %31 : vector<1x32xf32>
    %38 = arith.subf %36, %37 : vector<1x32xf32>
    %cst_18 = arith.constant 0.000000e+00 : f32
    %39 = vector.broadcast %cst_18 : f32 to vector<1x32xf32>
    %40 = arith.maximumf %38, %39 : vector<1x32xf32>
    %41 = vector.broadcast %31 : vector<1x32xf32> to vector<256x32xf32>
    %42 = arith.subf %3, %41 : vector<256x32xf32>
    %cst_19 = arith.constant 9.99999997E-7 : f32
    %43 = vector.broadcast %cst_19 : f32 to vector<1x32xf32>
    %44 = arith.addf %40, %43 : vector<1x32xf32>
    %45 = math.rsqrt %44 : vector<1x32xf32>
    %46 = vector.broadcast %45 : vector<1x32xf32> to vector<256x32xf32>
    %47 = arith.mulf %42, %46 : vector<256x32xf32>
    %48 = tpu.concatenate %27, %47 in 0 : vector<88x32xf32>, vector<256x32xf32> -> vector<344x32xf32>
    %49 = arith.truncf %48 : vector<344x32xf32> to vector<344x32xbf16>
    %c0_20 = arith.constant 0 : index
    %c0_21 = arith.constant 0 : index
    %50 = vector.load %arg5[%c0_20, %c0_21] : memref<32x64xbf16, #tpu.memory_space<vmem>>, vector<32x64xbf16>
    %cst_22 = arith.constant dense<0.000000e+00> : vector<344x64xf32>
    %51 = tpu.matmul %49, %50, %cst_22 {dimension_numbers = #tpu.dot_dimension_numbers<[1], [0], [0], [1], [0, 0, 1, 1], [], []>} : vector<344x32xbf16>, vector<32x64xbf16>, vector<344x64xf32> -> vector<344x64xf32>
    %52 = vector.extract_strided_slice %51 {offsets = [0, 0], sizes = [88, 32], strides = [1, 1]} : vector<344x64xf32> to vector<88x32xf32>
    %c0_23 = arith.constant 0 : index
    %c0_24 = arith.constant 0 : index
    %c0_25 = arith.constant 0 : index
    %53 = vector.load %arg4[%c0_23, %c0_24, %c0_25] : memref<1x1x32xf32, #tpu.memory_space<vmem>>, vector<1x1x32xf32>
    %54 = vector.shape_cast %53 : vector<1x1x32xf32> to vector<1x32xf32>
    %55 = vector.broadcast %54 : vector<1x32xf32> to vector<88x32xf32>
    %56 = arith.addf %52, %55 : vector<88x32xf32>
    %57 = vector.extract_strided_slice %51 {offsets = [88, 32], sizes = [256, 32], strides = [1, 1]} : vector<344x64xf32> to vector<256x32xf32>
    %c0_26 = arith.constant 0 : index
    %c0_27 = arith.constant 0 : index
    %58 = vector.load %arg8[%c0_26, %c0_27] : memref<8x64xf32, #tpu.memory_space<vmem>>, vector<1x32xf32>
    %59 = vector.broadcast %58 : vector<1x32xf32> to vector<256x32xf32>
    %60 = arith.addf %57, %59 : vector<256x32xf32>
    %c17_i32 = arith.constant 17 : i32
    %61 = tpu.dynamic_rotate %3 by %c17_i32 dim 0 : vector<256x32xf32>, i32 -> vector<256x32xf32>
    %c16_i32 = arith.constant 16 : i32
    %62 = tpu.dynamic_rotate %3 by %c16_i32 dim 0 : vector<256x32xf32>, i32 -> vector<256x32xf32>
    %c15_i32 = arith.constant 15 : i32
    %63 = tpu.dynamic_rotate %3 by %c15_i32 dim 0 : vector<256x32xf32>, i32 -> vector<256x32xf32>
    %c1_i32 = arith.constant 1 : i32
    %64 = tpu.dynamic_rotate %3 by %c1_i32 dim 0 : vector<256x32xf32>, i32 -> vector<256x32xf32>
    %c255_i32 = arith.constant 255 : i32
    %65 = tpu.dynamic_rotate %3 by %c255_i32 dim 0 : vector<256x32xf32>, i32 -> vector<256x32xf32>
    %c241_i32 = arith.constant 241 : i32
    %66 = tpu.dynamic_rotate %3 by %c241_i32 dim 0 : vector<256x32xf32>, i32 -> vector<256x32xf32>
    %c240_i32 = arith.constant 240 : i32
    %67 = tpu.dynamic_rotate %3 by %c240_i32 dim 0 : vector<256x32xf32>, i32 -> vector<256x32xf32>
    %c239_i32 = arith.constant 239 : i32
    %68 = tpu.dynamic_rotate %3 by %c239_i32 dim 0 : vector<256x32xf32>, i32 -> vector<256x32xf32>
    %69 = tpu.concatenate %61, %62, %63, %64, %3, %65, %66, %67, %68 in 1 : vector<256x32xf32>, vector<256x32xf32>, vector<256x32xf32>, vector<256x32xf32>, vector<256x32xf32>, vector<256x32xf32>, vector<256x32xf32>, vector<256x32xf32>, vector<256x32xf32> -> vector<256x288xf32>
    %c0_28 = arith.constant 0 : index
    %c0_29 = arith.constant 0 : index
    %70 = vector.load %arg9[%c0_28, %c0_29] : memref<256x288xf32, #tpu.memory_space<vmem>>, vector<256x288xf32>
    %71 = arith.mulf %69, %70 : vector<256x288xf32>
    %72 = arith.truncf %71 : vector<256x288xf32> to vector<256x288xbf16>
    %c0_30 = arith.constant 0 : index
    %c0_31 = arith.constant 0 : index
    %73 = vector.load %arg6[%c0_30, %c0_31] : memref<288x32xbf16, #tpu.memory_space<vmem>>, vector<288x32xbf16>
    %cst_32 = arith.constant dense<0.000000e+00> : vector<256x32xf32>
    %74 = tpu.matmul %72, %73, %cst_32 {dimension_numbers = #tpu.dot_dimension_numbers<[1], [0], [0], [1], [0, 0, 1, 1], [], []>} : vector<256x288xbf16>, vector<288x32xbf16>, vector<256x32xf32> -> vector<256x32xf32>
    %c1 = arith.constant 1 : index
    %c0_33 = arith.constant 0 : index
    %75 = vector.load %arg8[%c1, %c0_33] : memref<8x64xf32, #tpu.memory_space<vmem>>, vector<1x32xf32>
    %76 = vector.broadcast %75 : vector<1x32xf32> to vector<256x32xf32>
    %77 = arith.addf %74, %76 : vector<256x32xf32>
    %78 = arith.truncf %56 : vector<88x32xf32> to vector<88x32xbf16>
    %79 = arith.truncf %60 : vector<256x32xf32> to vector<256x32xbf16>
    %cst_34 = arith.constant dense<0.000000e+00> : vector<88x256xf32>
    %80 = tpu.matmul %78, %79, %cst_34 {dimension_numbers = #tpu.dot_dimension_numbers<[1], [1], [0], [0], [0, 0, 1, 0], [], []>} : vector<88x32xbf16>, vector<256x32xbf16>, vector<88x256xf32> -> vector<88x256xf32>
    %cst_35 = arith.constant dense<0xFF800000> : vector<88xf32>
    %81 = vector.multi_reduction <maximumf>, %80, %cst_35 [1] : vector<88x256xf32> to vector<88xf32>
    %82 = vector.shape_cast %81 : vector<88xf32> to vector<88x1xf32>
    %83 = vector.broadcast %82 : vector<88x1xf32> to vector<88x256xf32>
    %84 = arith.subf %80, %83 : vector<88x256xf32>
    %85 = math.exp %84 : vector<88x256xf32>
    %cst_36 = arith.constant dense<0.000000e+00> : vector<88xf32>
    %86 = vector.multi_reduction <add>, %85, %cst_36 [1] : vector<88x256xf32> to vector<88xf32>
    %87 = vector.shape_cast %86 : vector<88xf32> to vector<88x1xf32>
    %88 = tpu.reciprocal %87 {approx = true} : vector<88x1xf32> -> vector<88x1xf32>
    %89 = arith.mulf %87, %88 : vector<88x1xf32>
    %cst_37 = arith.constant 2.000000e+00 : f32
    %90 = vector.broadcast %cst_37 : f32 to vector<88x1xf32>
    %91 = arith.subf %90, %89 : vector<88x1xf32>
    %92 = arith.mulf %88, %91 : vector<88x1xf32>
    %93 = vector.broadcast %92 : vector<88x1xf32> to vector<88x256xf32>
    %94 = arith.mulf %85, %93 : vector<88x256xf32>
    %95 = vector.extract_strided_slice %94 {offsets = [0, 0], sizes = [81, 256], strides = [1, 1]} : vector<88x256xf32> to vector<81x256xf32>
    %c0_38 = arith.constant 0 : index
    %c0_39 = arith.constant 0 : index
    %c0_40 = arith.constant 0 : index
    %96 = vector.load %arg13[%c0_38, %c0_39, %c0_40] : memref<1x81x256xf32, #tpu.memory_space<vmem>>, vector<1x81x256xf32>
    %97 = vector.shape_cast %96 : vector<1x81x256xf32> to vector<81x256xf32>
    %98 = vector.shape_cast %95 : vector<81x256xf32> to vector<1x81x256xf32>
    tpu.vector_store %arg13[%c0_38, %c0_39, %c0_40], %98 {strides = array<i32>} : memref<1x81x256xf32, #tpu.memory_space<vmem>>, vector<1x81x256xf32>,
    %99 = tpu.concatenate %77, %3 in 1 : vector<256x32xf32>, vector<256x32xf32> -> vector<256x64xf32>
    %100 = arith.truncf %99 : vector<256x64xf32> to vector<256x64xbf16>
    %101 = arith.truncf %94 : vector<88x256xf32> to vector<88x256xbf16>
    %cst_41 = arith.constant dense<0.000000e+00> : vector<88x64xf32>
    %102 = tpu.matmul %101, %100, %cst_41 {dimension_numbers = #tpu.dot_dimension_numbers<[1], [0], [0], [1], [0, 0, 1, 1], [], []>} : vector<88x256xbf16>, vector<256x64xbf16>, vector<88x64xf32> -> vector<88x64xf32>
    %103 = tpu.iota {dimensions = array<i32: 0>} : vector<88x1xi32>
    %c81_i32 = arith.constant 81 : i32
    %104 = vector.broadcast %c81_i32 : i32 to vector<88x1xi32>
    %105 = arith.cmpi slt, %103, %104 : vector<88x1xi32>
    %106 = arith.extui %105 : vector<88x1xi1> to vector<88x1xi32>
    %107 = arith.sitofp %106 : vector<88x1xi32> to vector<88x1xf32>
    %108 = vector.extract_strided_slice %102 {offsets = [0, 0], sizes = [88, 32], strides = [1, 1]} : vector<88x64xf32> to vector<88x32xf32>
    %109 = vector.broadcast %107 : vector<88x1xf32> to vector<88x32xf32>
    %110 = arith.mulf %108, %109 : vector<88x32xf32>
    %111 = vector.extract_strided_slice %102 {offsets = [0, 32], sizes = [88, 32], strides = [1, 1]} : vector<88x64xf32> to vector<88x32xf32>
    %c10_i32 = arith.constant 10 : i32
    %112 = tpu.dynamic_rotate %111 by %c10_i32 dim 0 : vector<88x32xf32>, i32 -> vector<88x32xf32>
    %c9_i32 = arith.constant 9 : i32
    %113 = tpu.dynamic_rotate %111 by %c9_i32 dim 0 : vector<88x32xf32>, i32 -> vector<88x32xf32>
    %c8_i32 = arith.constant 8 : i32
    %114 = tpu.dynamic_rotate %111 by %c8_i32 dim 0 : vector<88x32xf32>, i32 -> vector<88x32xf32>
    %c1_i32_42 = arith.constant 1 : i32
    %115 = tpu.dynamic_rotate %111 by %c1_i32_42 dim 0 : vector<88x32xf32>, i32 -> vector<88x32xf32>
    %c87_i32 = arith.constant 87 : i32
    %116 = tpu.dynamic_rotate %111 by %c87_i32 dim 0 : vector<88x32xf32>, i32 -> vector<88x32xf32>
    %c80_i32 = arith.constant 80 : i32
    %117 = tpu.dynamic_rotate %111 by %c80_i32 dim 0 : vector<88x32xf32>, i32 -> vector<88x32xf32>
    %c79_i32 = arith.constant 79 : i32
    %118 = tpu.dynamic_rotate %111 by %c79_i32 dim 0 : vector<88x32xf32>, i32 -> vector<88x32xf32>
    %c78_i32 = arith.constant 78 : i32
    %119 = tpu.dynamic_rotate %111 by %c78_i32 dim 0 : vector<88x32xf32>, i32 -> vector<88x32xf32>
    %120 = tpu.concatenate %112, %113, %114, %115, %111, %116, %117, %118, %119 in 1 : vector<88x32xf32>, vector<88x32xf32>, vector<88x32xf32>, vector<88x32xf32>, vector<88x32xf32>, vector<88x32xf32>, vector<88x32xf32>, vector<88x32xf32>, vector<88x32xf32> -> vector<88x288xf32>
    %c0_43 = arith.constant 0 : index
    %c0_44 = arith.constant 0 : index
    %121 = vector.load %arg10[%c0_43, %c0_44] : memref<88x288xf32, #tpu.memory_space<vmem>>, vector<88x288xf32>
    %122 = arith.mulf %120, %121 : vector<88x288xf32>
    %123 = arith.truncf %122 : vector<88x288xf32> to vector<88x288xbf16>
    %c0_45 = arith.constant 0 : index
    %c0_46 = arith.constant 0 : index
    %124 = vector.load %arg7[%c0_45, %c0_46] : memref<288x64xbf16, #tpu.memory_space<vmem>>, vector<288x64xbf16>
    %cst_47 = arith.constant dense<0.000000e+00> : vector<88x64xf32>
    %125 = tpu.matmul %123, %124, %cst_47 {dimension_numbers = #tpu.dot_dimension_numbers<[1], [0], [0], [1], [0, 0, 1, 1], [], []>} : vector<88x288xbf16>, vector<288x64xbf16>, vector<88x64xf32> -> vector<88x64xf32>
    %c2 = arith.constant 2 : index
    %c0_48 = arith.constant 0 : index
    %126 = vector.load %arg8[%c2, %c0_48] : memref<8x64xf32, #tpu.memory_space<vmem>>, vector<1x64xf32>
    %127 = vector.broadcast %126 : vector<1x64xf32> to vector<88x64xf32>
    %128 = arith.addf %125, %127 : vector<88x64xf32>
    %cst_49 = arith.constant dense<0.000000e+00> : vector<32xf32>
    %129 = vector.multi_reduction <add>, %110, %cst_49 [0] : vector<88x32xf32> to vector<32xf32>
    %130 = vector.shape_cast %129 : vector<32xf32> to vector<1x32xf32>
    %cst_50 = arith.constant 0.0123456791 : f32
    %131 = vector.broadcast %cst_50 : f32 to vector<1x32xf32>
    %132 = arith.mulf %130, %131 : vector<1x32xf32>
    %133 = arith.mulf %110, %110 : vector<88x32xf32>
    %cst_51 = arith.constant dense<0.000000e+00> : vector<32xf32>
    %134 = vector.multi_reduction <add>, %133, %cst_51 [0] : vector<88x32xf32> to vector<32xf32>
    %135 = vector.shape_cast %134 : vector<32xf32> to vector<1x32xf32>
    %cst_52 = arith.constant 0.0123456791 : f32
    %136 = vector.broadcast %cst_52 : f32 to vector<1x32xf32>
    %137 = arith.mulf %135, %136 : vector<1x32xf32>
    %138 = arith.mulf %132, %132 : vector<1x32xf32>
    %139 = arith.subf %137, %138 : vector<1x32xf32>
    %cst_53 = arith.constant 0.000000e+00 : f32
    %140 = vector.broadcast %cst_53 : f32 to vector<1x32xf32>
    %141 = arith.maximumf %139, %140 : vector<1x32xf32>
    %142 = vector.broadcast %132 : vector<1x32xf32> to vector<88x32xf32>
    %143 = arith.subf %110, %142 : vector<88x32xf32>
    %cst_54 = arith.constant 9.99999974E-6 : f32
    %144 = vector.broadcast %cst_54 : f32 to vector<1x32xf32>
    %145 = arith.addf %141, %144 : vector<1x32xf32>
    %146 = math.rsqrt %145 : vector<1x32xf32>
    %147 = vector.broadcast %146 : vector<1x32xf32> to vector<88x32xf32>
    %148 = arith.mulf %143, %147 : vector<88x32xf32>
    %149 = vector.extract_strided_slice %128 {offsets = [0, 0], sizes = [88, 32], strides = [1, 1]} : vector<88x64xf32> to vector<88x32xf32>
    %150 = arith.mulf %148, %149 : vector<88x32xf32>
    %151 = vector.extract_strided_slice %128 {offsets = [0, 32], sizes = [88, 32], strides = [1, 1]} : vector<88x64xf32> to vector<88x32xf32>
    %152 = arith.addf %150, %151 : vector<88x32xf32>
    %c0_55 = arith.constant 0 : index
    %c0_56 = arith.constant 0 : index
    %c0_57 = arith.constant 0 : index
    %153 = vector.load %arg11[%c0_55, %c0_56, %c0_57] : memref<1x256x88xbf16, #tpu.memory_space<vmem>>, vector<1x256x88xbf16>
    %154 = vector.shape_cast %153 : vector<1x256x88xbf16> to vector<256x88xbf16>
    %155 = arith.truncf %152 : vector<88x32xf32> to vector<88x32xbf16>
    %cst_58 = arith.constant dense<0.000000e+00> : vector<256x32xf32>
    %156 = tpu.matmul %154, %155, %cst_58 {dimension_numbers = #tpu.dot_dimension_numbers<[1], [0], [0], [1], [0, 0, 1, 1], [], []>} : vector<256x88xbf16>, vector<88x32xbf16>, vector<256x32xf32> -> vector<256x32xf32>
    %157 = arith.addf %1, %156 : vector<256x32xf32>
    %c0_59 = arith.constant 0 : index
    %c0_60 = arith.constant 0 : index
    %c0_61 = arith.constant 0 : index
    %158 = vector.load %arg12[%c0_59, %c0_60, %c0_61] : memref<1x256x32xf32, #tpu.memory_space<vmem>>, vector<1x256x32xf32>
    %159 = vector.shape_cast %158 : vector<1x256x32xf32> to vector<256x32xf32>
    %160 = vector.shape_cast %157 : vector<256x32xf32> to vector<1x256x32xf32>
    tpu.vector_store %arg12[%c0_59, %c0_60, %c0_61], %160 {strides = array<i32>} : memref<1x256x32xf32, #tpu.memory_space<vmem>>, vector<1x256x32xf32>,
    return
  }
  func.func @transform_0(%arg0: i32) -> (i32, i32, i32) {
    %c0_i32 = arith.constant 0 : i32
    %c0_i32_0 = arith.constant 0 : i32
    %c0_i32_1 = arith.constant 0 : i32
    return %arg0, %c0_i32, %c0_i32_0 : i32, i32, i32
  }
  func.func @transform_1(%arg0: i32) -> (i32, i32, i32) {
    %c0_i32 = arith.constant 0 : i32
    %c0_i32_0 = arith.constant 0 : i32
    %c0_i32_1 = arith.constant 0 : i32
    return %arg0, %c0_i32, %c0_i32_0 : i32, i32, i32
  }
  func.func @transform_2(%arg0: i32) -> (i32, i32, i32) {
    %c0_i32 = arith.constant 0 : i32
    %c0_i32_0 = arith.constant 0 : i32
    %c0_i32_1 = arith.constant 0 : i32
    return %arg0, %c0_i32, %c0_i32_0 : i32, i32, i32
  }
  func.func @transform_3(%arg0: i32) -> (i32, i32, i32) {
    %c0_i32 = arith.constant 0 : i32
    %c0_i32_0 = arith.constant 0 : i32
    %c0_i32_1 = arith.constant 0 : i32
    return %arg0, %c0_i32, %c0_i32_0 : i32, i32, i32
  }
  func.func @transform_4(%arg0: i32) -> (i32, i32) {
    %c0_i32 = arith.constant 0 : i32
    %c0_i32_0 = arith.constant 0 : i32
    %c0_i32_1 = arith.constant 0 : i32
    return %c0_i32, %c0_i32_0 : i32, i32
  }
  func.func @transform_5(%arg0: i32) -> (i32, i32) {
    %c0_i32 = arith.constant 0 : i32
    %c0_i32_0 = arith.constant 0 : i32
    %c0_i32_1 = arith.constant 0 : i32
    return %c0_i32, %c0_i32_0 : i32, i32
  }
  func.func @transform_6(%arg0: i32) -> (i32, i32) {
    %c0_i32 = arith.constant 0 : i32
    %c0_i32_0 = arith.constant 0 : i32
    %c0_i32_1 = arith.constant 0 : i32
    return %c0_i32, %c0_i32_0 : i32, i32
  }
  func.func @transform_7(%arg0: i32) -> (i32, i32) {
    %c0_i32 = arith.constant 0 : i32
    %c0_i32_0 = arith.constant 0 : i32
    %c0_i32_1 = arith.constant 0 : i32
    return %c0_i32, %c0_i32_0 : i32, i32
  }
  func.func @transform_8(%arg0: i32) -> (i32, i32) {
    %c0_i32 = arith.constant 0 : i32
    %c0_i32_0 = arith.constant 0 : i32
    %c0_i32_1 = arith.constant 0 : i32
    return %c0_i32, %c0_i32_0 : i32, i32
  }
  func.func @transform_9(%arg0: i32) -> (i32, i32) {
    %c0_i32 = arith.constant 0 : i32
    %c0_i32_0 = arith.constant 0 : i32
    %c0_i32_1 = arith.constant 0 : i32
    return %c0_i32, %c0_i32_0 : i32, i32
  }
  func.func @transform_10(%arg0: i32) -> (i32, i32, i32) {
    %c0_i32 = arith.constant 0 : i32
    %c0_i32_0 = arith.constant 0 : i32
    %c0_i32_1 = arith.constant 0 : i32
    return %arg0, %c0_i32, %c0_i32_0 : i32, i32, i32
  }
  func.func @transform_11(%arg0: i32) -> (i32, i32, i32) {
    %c0_i32 = arith.constant 0 : i32
    %c0_i32_0 = arith.constant 0 : i32
    %c0_i32_1 = arith.constant 0 : i32
    return %arg0, %c0_i32, %c0_i32_0 : i32, i32, i32
  }
  func.func @transform_12(%arg0: i32) -> (i32, i32, i32) {
    %c0_i32 = arith.constant 0 : i32
    %c0_i32_0 = arith.constant 0 : i32
    %c0_i32_1 = arith.constant 0 : i32
    return %arg0, %c0_i32, %c0_i32_0 : i32, i32, i32
  }
}

</mosaic_0001>

<bundles_post_ra>
// kernel: local_refine_forward.1
= control target key start
LH: loop header
LB: loop body
LE: loop exit
PB: predicated region body
PF: predicated region fallthrough
CT: control target
= control target key end

     0   :  { %s6306_s21 = smov 0   ;;  %s10184_s0 = inlined_call_operand.vmem [shape: f32[2,256,32], index: 0, kind: input, shape index: {}, may-alias: {0,11}]   ;;  %s10185_s1 = inlined_call_operand.vmem [shape: bf16[2,88,256], index: 1, kind: input, shape index: {}]   ;;  %s10186_s2 = inlined_call_operand.vmem [shape: f32[2,256,32], index: 2, kind: input, shape index: {}]   ;;  %s10187_s3 = inlined_call_operand.vmem [shape: f32[2,1,32], index: 3, kind: input, shape index: {}]   ;;  %s10188_s4 = inlined_call_operand.vmem [shape: bf16[32,64], index: 4, kind: input, shape index: {}]   ;;  %s10189_s5 = inlined_call_operand.vmem [shape: bf16[288,32], index: 5, kind: input, shape index: {}]   ;;  %s10190_s6 = inlined_call_operand.vmem [shape: bf16[288,64], index: 6, kind: input, shape index: {}]   ;;  %s10191_s7 = inlined_call_operand.vmem [shape: f32[8,64], index: 7, kind: input, shape index: {}]   ;;  %s10192_s8 = inlined_call_operand.vmem [shape: f32[256,288], index: 8, kind: input, shape index: {}]   ;;  %s10193_s9 = inlined_call_operand.vmem [shape: f32[88,288], index: 9, kind: input, shape index: {}]   ;;  %s10194_s10 = inlined_call_operand.vmem [shape: bf16[2,256,88], index: 10, kind: input, shape index: {}]   ;;  %s10195_s11 = inlined_call_operand.vmem [shape: f32[2,256,32], index: 11, kind: output, shape index: {0}, may-alias: {0,11}]   ;;  %s10196_s12 = inlined_call_operand.vmem [shape: f32[2,81,256], index: 12, kind: output, shape index: {1}]  }
   0x1 LB: > { %s5322_s22 = sadd.s32 4294967295, %s6235_s21   ;;  %p5326_p0 = scmp.ge.s32.totalorder %s6235_s21, 1  ;;  %s6235_s21 = sphi %s6306_s21, %s23_s21  }
   0x2   : > { %p403_p1 = scmp.lt.s32.totalorder %s6235_s21, 3 }
   0x4   : > { %p404_p2 = pnand %p5326_p0, %p403_p1 }
   0x6   : > { %407 = sbr.rel (%p404_p2) target bundleno = 2520 (0x9d8), region = 64 }
   0xd   : > { %p468_p3 = scmp.lt.s32.totalorder %s5322_s22, 1  ;;  %v5374_v0 = vld [vmem:[%s10191_s7] ss:$0 sm:$0xff]  ;;  %s6237_s25 = smov 32   ;;  %v1469_v27 = vlaneseq  ;;  %v2530_v45 = vld [vmem:[%s10192_s8 + $0x2f8] sm:$0xff]  ;;  %vm730_vm2 = vcmask 261120  }
   0xe   : > { %1402 = vrot.lane.b32.xlu0 %v5374_v0, %s6237_s25  ;;  %v2527_v52 = vld [vmem:[%s10192_s8 + $0x2e0] sm:$0xff]  ;;  %s6238_s27 = smov 64   ;;  %s6239_s28 = smov 96   ;;  %vm2273_vm3 = vcmask 523264   ;;  %vm2306_vm4 = vcmask 785408   ;;  %vm4911_vm8 = vcmask 719872  }
   0xf   : > { %s10568_s22 = smov (!%p468_p3, %s5322_s22), 1  ;;  %v6423_v35 = vshrl.u32 %v1469_v27, 7  ;;  %vm4960_vm9 = vcmask 1043456  }
  0x10   : > { %s6321_s26 = sshll.u32 %s10568_s22, 8  ;;  %s6017_s30 = smul.u32 88, %s10568_s22 }
  0x11   : > { %s6327_s29 = scalar_lea.vmem %s10184_s0, %s6321_s26  ;;  %s6418_s18 = scalar_lea.vmem %s10186_s2, %s6321_s26  ;;  %10352 = vst [vmem:[#allocation23_spill] sm:$0xff] %v6423_v35  ;;  %vm1536_vm0 = vcmp.lt.s32.totalorder %v6423_v35, 7  ;;  %vm1471_vm1 = vcmp.lt.s32.totalorder %v6423_v35, 1 }
  0x12   : > { %v6330_v1 = vld [vmem:[%s6327_s29 + $0x80] sm:$0xff]  ;;  %v6333_v2 = vld [vmem:[%s6327_s29 + $0x88] sm:$0xff]  ;;  %v6342_v6 = vld [vmem:[%s6327_s29 + $0x90] sm:$0xff]  ;;  %s6381_s15 = scalar_lea.vmem %s10185_s1, %s6017_s30  ;;  %s485_s30 = scalar_lea.vmem %s10187_s3, %s10568_s22 }
  0x13   : > { %10331 = vst [vmem:[#allocation2_spill] sm:$0xff] %v6330_v1  ;;  %10332 = vst [vmem:[#allocation3_spill] sm:$0xff] %v6333_v2  ;;  %v502_v3 = vld [vmem:[%s6327_s29] sm:$0xff]  ;;  %v585_v4 = vpack.c.bf16 %v6333_v2, %v6330_v1  ;;  %v6339_v5 = vld [vmem:[%s6327_s29 + $0x8] sm:$0xff]  ;;  %s6018_s13 = smul.u32 176, %s10568_s22  ;;  %s5478_s23 = sshll.u32 %s10568_s22, 7 }
  0x14   : > { %10333 = vst [vmem:[#allocation4_spill] sm:$0xff] %v6339_v5  ;;  %10334 = vst [vmem:[#allocation5_spill] sm:$0xff] %v6342_v6  ;;  %v6345_v7 = vld [vmem:[%s6327_s29 + $0x98] sm:$0xff]  ;;  %v577_v8 = vpack.c.bf16 %v6339_v5, %v502_v3  ;;  %v504_v10 = vld [vmem:[%s6327_s29 + $0x10] sm:$0xff]  ;;  %s10083_s14 = scalar_lea.vmem %s10195_s11, %s6321_s26 }
  0x15   : > { %10335 = vst [vmem:[#allocation6_spill] sm:$0xff] %v6345_v7  ;;  %v586_v9 = vpack.c.bf16 %v6345_v7, %v6342_v6  ;;  %v6352_v11 = vld [vmem:[%s6327_s29 + $0x18] sm:$0xff]  ;;  %v6355_v12 = vld [vmem:[%s6327_s29 + $0xa0] sm:$0xff]  ;;  %5480 = vmatprep.subr.bf16.mxu0 %v585_v4  ;;  %v6358_v13 = vld [vmem:[%s6327_s29 + $0xa8] sm:$0xff] }
  0x16   : > { %10336 = vst [vmem:[#allocation7_spill] sm:$0xff] %v6352_v11  ;;  %10337 = vst [vmem:[#allocation8_spill] sm:$0xff] %v6355_v12  ;;  %5481 = vmatpush3.bf16.msra.mxu0 %v577_v8  ;;  %v578_v14 = vpack.c.bf16 %v6352_v11, %v504_v10  ;;  %v587_v15 = vpack.c.bf16 %v6358_v13, %v6355_v12  ;;  %v6365_v16 = vld [vmem:[%s6327_s29 + $0x20] sm:$0xff]  ;;  %v6368_v17 = vld [vmem:[%s6327_s29 + $0x28] sm:$0xff] }
  0x17   : > { %10338 = vst [vmem:[#allocation9_spill] sm:$0xff] %v6358_v13  ;;  %5482 = vmatprep.subr.bf16.mxu0 %v586_v9  ;;  %10339 = vst [vmem:[#allocation10_spill] sm:$0xff] %v6365_v16  ;;  %v6371_v18 = vld [vmem:[%s6327_s29 + $0xb0] sm:$0xff]  ;;  %v6374_v19 = vld [vmem:[%s6327_s29 + $0xb8] sm:$0xff]  ;;  %v579_v20 = vpack.c.bf16 %v6368_v17, %v6365_v16 }
  0x18   : > { %10340 = vst [vmem:[#allocation11_spill] sm:$0xff] %v6368_v17  ;;  %10341 = vst [vmem:[#allocation12_spill] sm:$0xff] %v6371_v18  ;;  %v588_v21 = vpack.c.bf16 %v6374_v19, %v6371_v18  ;;  %v6386_v22 = vld [vmem:[%s6327_s29 + $0x30] sm:$0xff]  ;;  %v6389_v23 = vld [vmem:[%s6327_s29 + $0x38] sm:$0xff] }
  0x19   : > { %10342 = vst [vmem:[#allocation13_spill] sm:$0xff] %v6374_v19  ;;  %10343 = vst [vmem:[#allocation14_spill] sm:$0xff] %v6386_v22  ;;  %v6392_v24 = vld [vmem:[%s6327_s29 + $0xc0] sm:$0xff]  ;;  %v6395_v25 = vld [vmem:[%s6327_s29 + $0xc8] sm:$0xff]  ;;  %v580_v28 = vpack.c.bf16 %v6389_v23, %v6386_v22 }
  0x1a   : > { %5483 = vmatpush3.bf16.msra.mxu0 %v578_v14  ;;  %10344 = vst [vmem:[#allocation15_spill] sm:$0xff] %v6389_v23  ;;  %10345 = vst [vmem:[#allocation16_spill] sm:$0xff] %v6392_v24  ;;  %v6033_v26 = vld [vmem:[%s6381_s15 + $0x4] ss:$8 sps:$4 sm:$0xff]   ;;  %v589_v30 = vpack.c.bf16 %v6395_v25, %v6392_v24  ;;  %v6409_v32 = vld [vmem:[%s6327_s29 + $0xd0] sm:$0xff] }
  0x1b   : > { %5484 = vmatprep.subr.bf16.mxu0 %v587_v15  ;;  %10346 = vst [vmem:[#allocation17_spill] sm:$0xff] %v6395_v25  ;;  %v6401_v29 = vld [vmem:[%s6327_s29 + $0x40] sm:$0xff]  ;;  %v6406_v31 = vld [vmem:[%s6327_s29 + $0x48] sm:$0xff]  ;;  %682 = vmatprep.mubr.bf16.mxu0 %v6033_v26  ;;  %10349 = vst [vmem:[#allocation20_spill] sm:$0xff] %v6409_v32 }
  0x1c   : > { %10347 = vst [vmem:[#allocation18_spill] sm:$0xff] %v6401_v29  ;;  %10348 = vst [vmem:[#allocation19_spill] sm:$0xff] %v6406_v31  ;;  %v6412_v33 = vld [vmem:[%s6327_s29 + $0xd8] sm:$0xff]  ;;  %v6421_v34 = vld [vmem:[%s6327_s29 + $0x50] sm:$0xff]  ;;  %v581_v36 = vpack.c.bf16 %v6406_v31, %v6401_v29 }
  0x1d   : > { %10350 = vst [vmem:[#allocation21_spill] sm:$0xff] %v6412_v33  ;;  %10351 = vst [vmem:[#allocation22_spill] sm:$0xff] %v6421_v34  ;;  %v6428_v37 = vld [vmem:[%s6327_s29 + $0x58] sm:$0xff]  ;;  %v590_v38 = vpack.c.bf16 %v6412_v33, %v6409_v32  ;;  %v6433_v39 = vld [vmem:[%s6327_s29 + $0xe0] sm:$0xff] }
  0x1e   : > { %5485 = vmatpush3.bf16.msra.mxu0 %v579_v20  ;;  %10353 = vst [vmem:[#allocation24_spill] sm:$0xff] %v6428_v37  ;;  %10354 = vst [vmem:[#allocation25_spill] sm:$0xff] %v6433_v39  ;;  %v6436_v40 = vld [vmem:[%s6327_s29 + $0xe8] sm:$0xff]  ;;  %v6439_v41 = vld [vmem:[%s6418_s18 + $0xf8] sm:$0xff]  ;;  %v582_v47 = vpack.c.bf16 %v6428_v37, %v6421_v34 }
  0x1f   : > { %5486 = vmatprep.subr.bf16.mxu0 %v588_v21  ;;  %10355 = vst [vmem:[#allocation26_spill] sm:$0xff] %v6436_v40  ;;  %1603 = vrot.lane.b32.xlu0 %v6439_v41, %s6237_s25  ;;  %v6444_v42 = vld [vmem:[%s6418_s18 + $0xf0] sm:$0xff]  ;;  %v6447_v43 = vld [vmem:[%s6418_s18 + $0x8] sm:$0xff]  ;;  %v6459_v46 = vld [vmem:[%s6418_s18] sm:$0xff]  ;;  %v591_v53 = vpack.c.bf16 %v6436_v40, %v6433_v39  ;;  %v1535_v14 = vrot.slane %v6439_v41, 1 }
  0x20   : > { %10356 = vst [vmem:[#allocation27_spill] sm:$0xff] %v6444_v42  ;;  %v6450_v44 = vld [vmem:[%s6418_s18 + $0x10] sm:$0xff]  ;;  %1601 = vrot.lane.b32.xlu1 %v6444_v42, %s6237_s25  ;;  %v6464_v48 = vld [vmem:[%s6327_s29 + $0x60] sm:$0xff]  ;;  %v6467_v49 = vld [vmem:[%s6327_s29 + $0x68] sm:$0xff]  ;;  %v1505_v50 = vrot.slane %v6447_v43, 1  ;;  %v1504_v56 = vrot.slane %v6459_v46, 1 }
  0x21   : > { %10357 = vst [vmem:[#allocation28_spill] sm:$0xff] %v6464_v48  ;;  %10358 = vst [vmem:[#allocation29_spill] sm:$0xff] %v6467_v49  ;;  %v1506_v51 = vrot.slane %v6450_v44, 1  ;;  %v6477_v54 = vld [vmem:[%s6327_s29 + $0xf0] sm:$0xff]  ;;  %v6480_v55 = vld [vmem:[%s6327_s29 + $0xf8] sm:$0xff]  ;;  %v583_v62 = vpack.c.bf16 %v6467_v49, %v6464_v48  ;;  %v1439_v3 = vrot.slane %v6450_v44, 7 }
  0x22   : > { %5487 = vmatpush3.bf16.msra.mxu0 %v580_v28  ;;  %10359 = vst [vmem:[#allocation30_spill] sm:$0xff] %v6477_v54  ;;  %10360 = vst [vmem:[#allocation31_spill] sm:$0xff] %v6480_v55  ;;  %v6490_v58 = vld [vmem:[%s6418_s18 + $0x18] sm:$0xff]  ;;  %v6493_v59 = vld [vmem:[%s6327_s29 + $0x70] sm:$0xff]  ;;  %v6502_v61 = vsel %vm1536_vm0, %v1504_v56, %v1505_v50  ;;  %v592_v4 = vpack.c.bf16 %v6480_v55, %v6477_v54  ;;  %v1438_v9 = vrot.slane %v6447_v43, 7  ;;  %v10197_v26 = vrot.slane %v6444_v42, 1 }
  0x23   : > { %5488 = vmatprep.subr.bf16.mxu0 %v589_v30  ;;  %v6487_v57 = vsel %vm1536_vm0, %v1505_v50, %v1506_v51  ;;  %10361 = vst [vmem:[#allocation32_spill] sm:$0xff] %v6493_v59  ;;  %v6508_v63 = vld [vmem:[%s6327_s29 + $0x78] sm:$0xff]  ;;  %v6513_v0 = vmul.f32 %v2527_v52, %v6502_v61  ;;  %v1440_v8 = vrot.slane %v6490_v58, 7  ;;  %v6031_v27 = vld [vmem:[%s6381_s15] ss:$8 sps:$4 sm:$0xff]   ;;  %v6541_v28 = vsel %vm1536_vm0, %v1535_v14, %v1504_v56 }
  0x24   : > { %1955 = vrot.lane.b32.xlu0 %v6487_v57, %s6237_s25  ;;  %v6498_v60 = vmul.f32 %v2530_v45, %v6487_v57  ;;  %10363 = vst [vmem:[#allocation34_spill] sm:$0xff] %v6508_v63  ;;  %1953 = vrot.lane.b32.xlu1 %v6502_v61, %s6237_s25  ;;  %v6529_v20 = vsel %vm1471_vm1, %v1438_v9, %v1439_v3  ;;  %10365 = vst [vmem:[#allocation36_spill] sm:$0xff] %v6541_v28  ;;  %v6034_v30 = vld [vmem:[%s6381_s15 + $0x14] ss:$8 sps:$4 sm:$0xff]   ;;  %v6556_v45 = vld [vmem:[%s6418_s18 + $0x28] sm:$0xff]  ;;  %v10198_v50 = vrot.slane %v6439_v41, 7 }
  0x25   : > { %10364 = vst [vmem:[#allocation35_spill] sm:$0xff] %v6513_v0  ;;  %v6525_v15 = vsel %vm1471_vm1, %v1439_v3, %v1440_v8  ;;  %v584_v21 = vpack.c.bf16 %v6508_v63, %v6493_v59  ;;  %v1507_v52 = vrot.slane %v6490_v58, 1  ;;  %v6036_v3 = vld [vmem:[%s6381_s15 + $0x10] ss:$8 sps:$4 sm:$0xff]   ;;  %v828_v39 = vsel %vm730_vm2, %v6450_v44, 0.0  ;;  %v6829_v2 = vld [vmem:[%s6418_s18 + $0x60] sm:$0xff] }
  0x26   : > { %5489 = vmatpush3.bf16.msra.mxu0 %v581_v36  ;;  %10362 = vst [vmem:[#allocation33_spill] sm:$0xff] %v6498_v60  ;;  %v6548_v36 = vsel %vm1536_vm0, %v10197_v26, %v1535_v14  ;;  %v6037_v14 = vld [vmem:[%s6381_s15 + $0x24] ss:$8 sps:$4 sm:$0xff]   ;;  %v826_v26 = vsel %vm730_vm2, %v6447_v43, 0.0  ;;  %v896_v54 = vmul.f32 %v6447_v43, %v6447_v43  ;;  %v907_v49 = vmul.f32 %v6829_v2, %v6829_v2 }
  0x27   : > { %5490 = vmatprep.subr.bf16.mxu0 %v590_v38  ;;  %10366 = vst [vmem:[#allocation37_spill] sm:$0xff] %v6548_v36  ;;  %v6551_v38 = vld [vmem:[%s6418_s18 + $0x20] sm:$0xff]  ;;  %v6853_v6 = vld [vmem:[%s6418_s18 + $0x68] sm:$0xff] }
  0x28   : > { %2051 = vrot.lane.b32.xlu0 %v6525_v15, %s6238_s27  ;;  %2049 = vrot.lane.b32.xlu1 %v6529_v20, %s6238_s27  ;;  %v1441_v56 = vrot.slane %v6551_v38, 7  ;;  %10380 = vst [vmem:[#allocation50_spill] sm:$0xff] %v6853_v6  ;;  %v950_v48 = vsel %vm730_vm2, %v907_v49, 0.0 }
  0x2a   : > { %5491 = vmatpush3.bf16.msra.mxu0 %v582_v47  ;;  %v1437_v47 = vrot.slane %v6459_v46, 7 }
  0x2b   : > { %5492 = vmatprep.subr.bf16.mxu0 %v591_v53  ;;  %v1508_v53 = vrot.slane %v6551_v38, 1 }
  0x2c   : > { %1731 = vrot.lane.b32.xlu0 %v6541_v28, %s6238_s27  ;;  %1729 = vrot.lane.b32.xlu1 %v6548_v36, %s6238_s27  ;;  %v558_v36 = vld [vmem:[%s6418_s18 + $0xc0] sm:$0xff] }
  0x2e   : > { %5493 = vmatpush3.bf16.msra.mxu0 %v583_v62  ;;  %v1442_v62 = vrot.slane %v6556_v45, 7 }
  0x2f   : > { %5494 = vmatprep.subr.bf16.mxu0 %v592_v4  ;;  %v6573_v4 = vsel %vm1471_vm1, %v1437_v47, %v1438_v9  ;;  %v6594_v9 = vsel %vm1536_vm0, %v1506_v51, %v1507_v52 }
  0x30   : > { %2147 = vrot.lane.b32.xlu0 %v6490_v58, %s6239_s28  ;;  %2145 = vrot.lane.b32.xlu1 %v6450_v44, %s6239_s28  ;;  %10367 = vst [vmem:[#allocation38_spill] sm:$0xff] %v6573_v4  ;;  %10370 = vst [vmem:[#allocation41_spill] sm:$0xff] %v6594_v9  ;;  %v6608_v51 = vsel %vm1471_vm1, %v1441_v56, %v1442_v62 }
  0x32   : > { %5495 = vmatpush3.bf16.msra.mxu0 %v584_v21  ;;  %v6580_v21 = vsel %vm1471_vm1, %v10198_v50, %v1437_v47  ;;  %v6040_v47 = vld [vmem:[%s6381_s15 + $0x34] ss:$8 sps:$4 sm:$0xff]  }
  0x33   : > { %10368 = vst [vmem:[#allocation39_spill] sm:$0xff] %v6580_v21 }
  0x34   : > { %1859 = vrot.lane.b32.xlu0 %v6573_v4, %s6239_s28  ;;  %1857 = vrot.lane.b32.xlu1 %v6580_v21, %s6239_s28 }
  0x35   : > { %683 = vmatmul.mubr.bf16.vlgmr.msra.gmra.mrb[0].mxu0 %v6031_v27  ;;  %v6588_v27 = vsel %vm1536_vm0, %v1507_v52, %v1508_v53  ;;  %v6612_v52 = vsel %vm1471_vm1, %v1440_v8, %v1441_v56  ;;  %v576_v8 = vld [vmem:[%s6381_s15 + $0x50] sm:$0xff]  ;;  %v6045_v56 = vld [vmem:[%s6381_s15 + $0x40] ss:$8 sps:$4 sm:$0xff]  }
  0x36   : > { %690 = vmatprep.mubr.bf16.mxu0 %v6034_v30  ;;  %10369 = vst [vmem:[#allocation40_spill] sm:$0xff] %v6588_v27  ;;  %v6039_v30 = vld [vmem:[%s6381_s15 + $0x20] ss:$8 sps:$4 sm:$0xff]  }
  0x38   : > { %1959 = vrot.lane.b32.xlu0 %v6588_v27, %s6237_s25  ;;  %1957 = vrot.lane.b32.xlu1 %v6594_v9, %s6237_s25 }
  0x3c   : > { %1607 = vrot.lane.b32.xlu0 %v6447_v43, %s6237_s25  ;;  %1605 = vrot.lane.b32.xlu1 %v6459_v46, %s6237_s25 }
  0x3d   : > { %691 = vmatmul.mubr.bf16.gmra.mrb[4].mxu0 %v6036_v3  ;;  %v6042_v3 = vld [vmem:[%s6381_s15 + $0x30] ss:$8 sps:$4 sm:$0xff]  }
  0x3e   : > { %698 = vmatprep.mubr.bf16.mxu0 %v6037_v14  ;;  %v6043_v14 = vld [vmem:[%s6381_s15 + $0x44] ss:$8 sps:$4 sm:$0xff]   ;;  %s9268_s15 = scalar_lea.vmem %s10196_s12, %s6018_s13  ;;  %s10038_s13 = scalar_lea.vmem %s10194_s10, %s5478_s23 }
  0x40   : > { %2055 = vrot.lane.b32.xlu0 %v6608_v51, %s6238_s27  ;;  %2053 = vrot.lane.b32.xlu1 %v6612_v52, %s6238_s27 }
  0x44   : > { %1735 = vrot.lane.b32.xlu0 %v6487_v57, %s6238_s27  ;;  %1733 = vrot.lane.b32.xlu1 %v6502_v61, %s6238_s27  ;;  %v5347_v57 = vcombine.low %v576_v8, %v576_v8  ;;  %v6635_v61 = vld [vmem:[%s6418_s18 + $0x30] sm:$0xff] }
  0x45   : > { %699 = vmatmul.mubr.bf16.gmra.mrb[8].mxu0 %v6039_v30  ;;  %v5348_v30 = vcombine.high %v576_v8, %v576_v8  ;;  %v2443_v8 = vld [vmem:[%s10192_s8 + $0x40] sm:$0xff] }
  0x46   : > { %706 = vmatprep.mubr.bf16.mxu0 %v6040_v47  ;;  %v1509_v47 = vrot.slane %v6556_v45, 1 }
  0x48   : > { %2151 = vrot.lane.b32.xlu0 %v6556_v45, %s6239_s28  ;;  %2149 = vrot.lane.b32.xlu1 %v6551_v38, %s6239_s28 }
  0x4c   : > { %1863 = vrot.lane.b32.xlu0 %v6525_v15, %s6239_s28  ;;  %1861 = vrot.lane.b32.xlu1 %v6529_v20, %s6239_s28 }
  0x4d   : > { %707 = vmatmul.mubr.bf16.gmra.mrb[12].mxu0 %v6042_v3  ;;  %v1510_v3 = vrot.slane %v6635_v61, 1 }
  0x4e   : > { %714 = vmatprep.mubr.bf16.mxu0 %v6043_v14  ;;  %v6641_v14 = vsel %vm1536_vm0, %v1508_v53, %v1509_v47 }
  0x4f   : > { %v6645_v10 = vsel %vm1536_vm0, %v1509_v47, %v1510_v3  ;;  %v6658_v53 = vmul.f32 %v2443_v8, %v6641_v14  ;;  %v6670_v47 = vld [vmem:[%s6418_s18 + $0x38] sm:$0xff]  ;;  %v825_v8 = vsel %vm730_vm2, %v6459_v46, 0.0 }
  0x50   : > { %1961 = vrot.lane.b32.xlu1 %v6641_v14, %s6237_s25  ;;  %1963 = vrot.lane.b32.xlu0 %v6645_v10, %s6237_s25  ;;  %v1444_v50 = vrot.slane %v6670_v47, 7  ;;  %v827_v55 = vadd.f32 %v826_v26, %v825_v8  ;;  %v830_v26 = vsel %vm730_vm2, %v6490_v58, 0.0  ;;  %v897_v8 = vmul.f32 %v6450_v44, %v6450_v44 }
  0x51   : > { %10371 = vst [vmem:[#allocation42_spill] sm:$0xff] %v6658_v53  ;;  %v7096_v53 = vld [vmem:[%s6418_s18 + $0xe8] sm:$0xff] }
  0x52   : > { %v829_v25 = vadd.f32 %v828_v39, %v827_v55  ;;  %v832_v55 = vsel %vm730_vm2, %v6551_v38, 0.0  ;;  %v930_v32 = vsel %vm730_vm2, %v897_v8, 0.0  ;;  %10399 = vst [vmem:[#allocation66_spill] sm:$0xff] %v7096_v53 }
  0x54   : > { %1609 = vrot.lane.b32.xlu1 %v6450_v44, %s6237_s25  ;;  %1611 = vrot.lane.b32.xlu0 %v6490_v58, %s6237_s25  ;;  %v831_v24 = vadd.f32 %v830_v26, %v829_v25  ;;  %v898_v44 = vmul.f32 %v6490_v58, %v6490_v58  ;;  %v6720_v25 = vld [vmem:[%s6418_s18 + $0x40] sm:$0xff] }
  0x55   : > { %715 = vmatmul.mubr.bf16.gmra.mrb[16].mxu0 %v6045_v56  ;;  %v2446_v56 = vld [vmem:[%s10192_s8 + $0x58] sm:$0xff]  ;;  %v10208_v26 = vrot.slane %v6720_v25, 1  ;;  %v1445_v12 = vrot.slane %v6720_v25, 7  ;;  %v10379_v7 = vrot.slane %v6720_v25, 1 }
  0x56   : > { %722 = vmatprep.mubr.bf16.mxu0 %v5348_v30  ;;  %v6661_v30 = vmul.f32 %v2446_v56, %v6645_v10  ;;  %v1443_v56 = vrot.slane %v6635_v61, 7  ;;  %v833_v13 = vadd.f32 %v832_v55, %v831_v24  ;;  %v932_v8 = vsel %vm730_vm2, %v898_v44, 0.0  ;;  %v2452_v44 = vld [vmem:[%s10192_s8 + $0x88] sm:$0xff] }
  0x57   : > { %v899_v24 = vmul.f32 %v6551_v38, %v6551_v38  ;;  %v836_v55 = vsel %vm730_vm2, %v6635_v61, 0.0 }
  0x58   : > { %10372 = vst [vmem:[#allocation43_spill] sm:$0xff] %v6661_v30  ;;  %v6684_v40 = vsel %vm1471_vm1, %v1443_v56, %v1444_v50  ;;  %v1467_v30 = vrot.slane %v6444_v42, 7 }
  0x59   : > { %10374 = vst [vmem:[#allocation45_spill] sm:$0xff] %v6684_v40  ;;  %2059 = vrot.lane.b32.xlu0 %v6684_v40, %s6238_s27 }
  0x5d   : > { %723 = vmatmul.mubr.bf16.gmra.mrb[20].mxu0 %v5347_v57  ;;  %v6680_v57 = vsel %vm1471_vm1, %v1442_v62, %v1443_v56  ;;  %v895_v62 = vmul.f32 %v6459_v46, %v6459_v46  ;;  %1739 = vrot.lane.b32.xlu0 %v6588_v27, %s6238_s27  ;;  %v928_v56 = vsel %vm730_vm2, %v896_v54, 0.0  ;;  %v10400_v27 = vrot.slane %v6439_v41, 7 }
  0x5e   : > { %10373 = vst [vmem:[#allocation44_spill] sm:$0xff] %v6680_v57  ;;  %2057 = vrot.lane.b32.xlu1 %v6680_v57, %s6238_s27 }
  0x5f   : > { %v927_v33 = vsel %vm730_vm2, %v895_v62, 0.0  ;;  %v1511_v62 = vrot.slane %v6670_v47, 1 }
  0x60   : > { %v929_v39 = vadd.f32 %v928_v56, %v927_v33  ;;  %v834_v33 = vsel %vm730_vm2, %v6556_v45, 0.0 }
  0x61   : > { %2155 = vrot.lane.b32.xlu0 %v6670_v47, %s6239_s28  ;;  %v6731_v58 = vsel %vm1536_vm0, %v1510_v3, %v1511_v62  ;;  %v835_v56 = vadd.f32 %v834_v33, %v833_v13  ;;  %v2449_v3 = vld [vmem:[%s10192_s8 + $0x70] sm:$0xff]  ;;  %v934_v13 = vsel %vm730_vm2, %v899_v24, 0.0  ;;  %v900_v33 = vmul.f32 %v6556_v45, %v6556_v45  ;;  %v6767_v24 = vld [vmem:[%s6418_s18 + $0x48] sm:$0xff] }
  0x62   : > { %1737 = vrot.lane.b32.xlu1 %v6594_v9, %s6238_s27  ;;  %v931_v54 = vadd.f32 %v930_v32, %v929_v39  ;;  %v6737_v32 = vsel %vm1536_vm0, %v1511_v62, %v10208_v26  ;;  %v6755_v62 = vmul.f32 %v2449_v3, %v6731_v58  ;;  %v838_v3 = vsel %vm730_vm2, %v6670_v47, 0.0 }
  0x63   : > { %v10402_v9 = vrot.slane %v7096_v53, 7 }
  0x64   : > { %v933_v39 = vadd.f32 %v932_v8, %v931_v54  ;;  %10375 = vst [vmem:[#allocation46_spill] sm:$0xff] %v6755_v62  ;;  %v6758_v54 = vmul.f32 %v2452_v44, %v6737_v32  ;;  %v837_v8 = vadd.f32 %v836_v55, %v835_v56  ;;  %v1446_v44 = vrot.slane %v6767_v24, 7  ;;  %v6050_v62 = vld [vmem:[%s10189_s5 + $0x40] sm:$0xff]  }
  0x65   : > { %1867 = vrot.lane.b32.xlu0 %v6608_v51, %s6239_s28  ;;  %v936_v56 = vsel %vm730_vm2, %v900_v33, 0.0  ;;  %v901_v55 = vmul.f32 %v6635_v61, %v6635_v61  ;;  %v840_v33 = vsel %vm730_vm2, %v6720_v25, 0.0  ;;  %5556 = vmatprep.subr.bf16.mxu0 %v6050_v62 }
  0x66   : > { %2153 = vrot.lane.b32.xlu1 %v6635_v61, %s6239_s28  ;;  %10376 = vst [vmem:[#allocation47_spill] sm:$0xff] %v6758_v54  ;;  %v935_v19 = vadd.f32 %v934_v13, %v933_v39  ;;  %v839_v39 = vadd.f32 %v838_v3, %v837_v8  ;;  %v903_v3 = vmul.f32 %v6720_v25, %v6720_v25 }
  0x67   : > { %v938_v26 = vsel %vm730_vm2, %v901_v55, 0.0 }
  0x68   : > { %v937_v13 = vadd.f32 %v936_v56, %v935_v19  ;;  %v841_v18 = vadd.f32 %v840_v33, %v839_v39  ;;  %v842_v19 = vsel %vm730_vm2, %v6767_v24, 0.0  ;;  %v6803_v56 = vld [vmem:[%s6418_s18 + $0x50] sm:$0xff]  ;;  %v904_v39 = vmul.f32 %v6767_v24, %v6767_v24 }
  0x69   : > { %1967 = vrot.lane.b32.xlu0 %v6737_v32, %s6237_s25  ;;  %v10386_v17 = vrot.slane %v6803_v56, 1 }
  0x6a   : > { %1865 = vrot.lane.b32.xlu1 %v6612_v52, %s6239_s28  ;;  %v843_v55 = vadd.f32 %v842_v19, %v841_v18 }
  0x6d   : > { %1615 = vrot.lane.b32.xlu0 %v6556_v45, %s6237_s25  ;;  %v6782_v45 = vsel %vm1471_vm1, %v1445_v12, %v1446_v44 }
  0x6e   : > { %1965 = vrot.lane.b32.xlu1 %v6731_v58, %s6237_s25  ;;  %10378 = vst [vmem:[#allocation49_spill] sm:$0xff] %v6782_v45 }
  0x71   : > { %2063 = vrot.lane.b32.xlu0 %v6782_v45, %s6238_s27 }
  0x72   : > { %1613 = vrot.lane.b32.xlu1 %v6551_v38, %s6237_s25  ;;  %v6778_v38 = vsel %vm1471_vm1, %v1444_v50, %v1445_v12  ;;  %v902_v50 = vmul.f32 %v6670_v47, %v6670_v47  ;;  %v939_v12 = vadd.f32 %v938_v26, %v937_v13  ;;  %v942_v26 = vsel %vm730_vm2, %v903_v3, 0.0  ;;  %v6815_v13 = vld [vmem:[%s6418_s18 + $0x58] sm:$0xff] }
  0x73   : > { %10377 = vst [vmem:[#allocation48_spill] sm:$0xff] %v6778_v38  ;;  %v846_v19 = vsel %vm730_vm2, %v6815_v13, 0.0  ;;  %v905_v3 = vmul.f32 %v6803_v56, %v6803_v56  ;;  %v906_v1 = vmul.f32 %v6815_v13, %v6815_v13 }
  0x74   : > { %v940_v8 = vsel %vm730_vm2, %v902_v50, 0.0  ;;  %v1513_v50 = vrot.slane %v6767_v24, 1 }
  0x75   : > { %1743 = vrot.lane.b32.xlu0 %v6645_v10, %s6238_s27  ;;  %v941_v10 = vadd.f32 %v940_v8, %v939_v12  ;;  %v10216_v12 = vrot.slane %v6803_v56, 1  ;;  %v944_v8 = vsel %vm730_vm2, %v904_v39, 0.0  ;;  %v848_v39 = vsel %vm730_vm2, %v6829_v2, 0.0 }
  0x76   : > { %2061 = vrot.lane.b32.xlu1 %v6778_v38, %s6238_s27 }
  0x77   : > { %v943_v33 = vadd.f32 %v942_v26, %v941_v10  ;;  %v6841_v10 = vsel %vm1536_vm0, %v1513_v50, %v10216_v12  ;;  %v6865_v12 = vld [vmem:[%s6418_s18 + $0x70] sm:$0xff] }
  0x79   : > { %2159 = vrot.lane.b32.xlu0 %v6767_v24, %s6239_s28  ;;  %v945_v26 = vadd.f32 %v944_v8, %v943_v33  ;;  %v1447_v33 = vrot.slane %v6803_v56, 7  ;;  %v850_v8 = vsel %vm730_vm2, %v6853_v6, 0.0 }
  0x7a   : > { %1741 = vrot.lane.b32.xlu1 %v6641_v14, %s6238_s27  ;;  %v844_v14 = vsel %vm730_vm2, %v6803_v56, 0.0 }
  0x7b   : > { %v845_v18 = vadd.f32 %v844_v14, %v843_v55  ;;  %v6835_v55 = vsel %vm1536_vm0, %v10379_v7, %v1513_v50  ;;  %v946_v7 = vsel %vm730_vm2, %v905_v3, 0.0  ;;  %v948_v3 = vsel %vm730_vm2, %v906_v1, 0.0 }
  0x7c   : > { %v6871_v63 = vsel %vm1471_vm1, %v1446_v44, %v1447_v33  ;;  %v549_v44 = vld [vmem:[%s6418_s18 + $0x78] sm:$0xff] }
  0x7d   : > { %1871 = vrot.lane.b32.xlu0 %v6684_v40, %s6239_s28  ;;  %v847_v14 = vadd.f32 %v846_v19, %v845_v18  ;;  %v947_v18 = vadd.f32 %v946_v7, %v945_v26  ;;  %v10220_v19 = vrot.slane %v6815_v13, 7  ;;  %10381 = vst [vmem:[#allocation51_spill] sm:$0xff] %v6871_v63  ;;  %v908_v7 = vmul.f32 %v6853_v6, %v6853_v6 }
  0x7e   : > { %2157 = vrot.lane.b32.xlu1 %v6720_v25, %s6239_s28 }
  0x7f   : > { %v849_v50 = vadd.f32 %v848_v39, %v847_v14  ;;  %v6877_v14 = vsel %vm1471_vm1, %v1447_v33, %v10220_v19  ;;  %v949_v26 = vadd.f32 %v948_v3, %v947_v18  ;;  %v852_v39 = vsel %vm730_vm2, %v6865_v12, 0.0  ;;  %v550_v3 = vld [vmem:[%s6418_s18 + $0x80] sm:$0xff] }
  0x80   : > { %10382 = vst [vmem:[#allocation52_spill] sm:$0xff] %v6877_v14  ;;  %v909_v19 = vmul.f32 %v6865_v12, %v6865_v12  ;;  %v952_v59 = vsel %vm730_vm2, %v908_v7, 0.0  ;;  %v6048_v7 = vld [vmem:[%s10188_s4] sm:$0xff]   ;;  %v911_v29 = vmul.f32 %v550_v3, %v550_v3 }
  0x81   : > { %1971 = vrot.lane.b32.xlu0 %v6841_v10, %s6237_s25  ;;  %v851_v1 = vadd.f32 %v850_v8, %v849_v50  ;;  %v854_v50 = vsel %vm730_vm2, %v549_v44, 0.0  ;;  %v951_v18 = vadd.f32 %v950_v48, %v949_v26  ;;  %v6894_v8 = vpop.permute.xlu0 %1402  ;;  %v551_v26 = vld [vmem:[%s6418_s18 + $0x88] sm:$0xff]  ;;  %5848 = vmatprep.subr.bf16.mxu1 %v6048_v7 }
  0x82   : > { %1869 = vrot.lane.b32.xlu1 %v6680_v57, %s6239_s28  ;;  %10383 = vst [vmem:[#allocation53_spill] sm:$0xff] %v6894_v8  ;;  %v954_v31 = vsel %vm730_vm2, %v909_v19, 0.0  ;;  %5849 = vmatpush3.bf16.msra.mxu1 %v6048_v7  ;;  %v912_v16 = vmul.f32 %v551_v26, %v551_v26  ;;  %v958_v22 = vsel %vm730_vm2, %v911_v29, 0.0  ;;  %v10235_v8 = vrot.slane %v6853_v6, 7 }
  0x83   : > { %v853_v33 = vadd.f32 %v852_v39, %v851_v1  ;;  %v910_v39 = vmul.f32 %v549_v44, %v549_v44  ;;  %v10227_v44 = vrot.slane %v6829_v2, 1 }
  0x85   : > { %1619 = vrot.lane.b32.xlu0 %v6670_v47, %s6237_s25  ;;  %v855_v49 = vadd.f32 %v854_v50, %v853_v33  ;;  %v1515_v33 = vrot.slane %v6815_v13, 1  ;;  %v858_v50 = vsel %vm730_vm2, %v551_v26, 0.0  ;;  %v956_v34 = vsel %vm730_vm2, %v910_v39, 0.0 }
  0x86   : > { %1969 = vrot.lane.b32.xlu1 %v6835_v55, %s6237_s25  ;;  %v960_v26 = vsel %vm730_vm2, %v912_v16, 0.0 }
  0x89   : > { %2067 = vrot.lane.b32.xlu0 %v6877_v14, %s6238_s27 }
  0x8a   : > { %1617 = vrot.lane.b32.xlu1 %v6635_v61, %s6237_s25 }
  0x8d   : > { %1747 = vrot.lane.b32.xlu0 %v6737_v32, %s6238_s27  ;;  %v953_v32 = vadd.f32 %v952_v59, %v951_v18 }
  0x8e   : > { %2065 = vrot.lane.b32.xlu1 %v6871_v63, %s6238_s27 }
  0x8f   : > { %v955_v19 = vadd.f32 %v954_v31, %v953_v32  ;;  %v6937_v31 = vsel %vm1536_vm0, %v1515_v33, %v10227_v44  ;;  %v6049_v32 = vld [vmem:[%s10188_s4 + $0x8] sm:$0xff]  }
  0x90   : > { %10388 = vst [vmem:[#allocation57_spill] sm:$0xff] %v6937_v31  ;;  %5850 = vmatprep.subr.bf16.mxu1 %v6049_v32 }
  0x91   : > { %2163 = vrot.lane.b32.xlu0 %v6815_v13, %s6239_s28  ;;  %v6905_v1 = vpop.permute.xlu0 %1603  ;;  %v957_v44 = vadd.f32 %v956_v34, %v955_v19  ;;  %5851 = vmatpush3.bf16.msra.mxu1 %v6049_v32 }
  0x92   : > { %1745 = vrot.lane.b32.xlu1 %v6731_v58, %s6238_s27  ;;  %v856_v58 = vsel %vm730_vm2, %v550_v3, 0.0  ;;  %10384 = vst [vmem:[#allocation54_spill] sm:$0xff] %v6905_v1  ;;  %v6907_v48 = vpop.permute.xlu1 %1601  ;;  %v2455_v3 = vld [vmem:[%s10192_s8 + $0xa0] sm:$0xff] }
  0x93   : > { %10385 = vst [vmem:[#allocation55_spill] sm:$0xff] %v6907_v48  ;;  %v857_v59 = vadd.f32 %v856_v58, %v855_v49  ;;  %v6930_v49 = vsel %vm1536_vm0, %v10386_v17, %v1515_v33  ;;  %v552_v58 = vld [vmem:[%s6418_s18 + $0x90] sm:$0xff]  ;;  %v2458_v17 = vld [vmem:[%s10192_s8 + $0xb8] sm:$0xff]  ;;  %v6951_v7 = vmul.f32 %v2455_v3, %v6835_v55 }
  0x94   : > { %10387 = vst [vmem:[#allocation56_spill] sm:$0xff] %v6930_v49  ;;  %v6954_v33 = vmul.f32 %v2458_v17, %v6841_v10  ;;  %v860_v23 = vsel %vm730_vm2, %v552_v58, 0.0  ;;  %v553_v3 = vld [vmem:[%s6418_s18 + $0x98] sm:$0xff]  ;;  %v913_v34 = vmul.f32 %v552_v58, %v552_v58  ;;  %v959_v17 = vadd.f32 %v958_v22, %v957_v44 }
  0x95   : > { %1875 = vrot.lane.b32.xlu0 %v6782_v45, %s6239_s28  ;;  %v859_v39 = vadd.f32 %v858_v50, %v857_v59  ;;  %10389 = vst [vmem:[#allocation58_spill] sm:$0xff] %v6951_v7  ;;  %v862_v29 = vsel %vm730_vm2, %v553_v3, 0.0  ;;  %v1449_v50 = vrot.slane %v6829_v2, 7  ;;  %v914_v58 = vmul.f32 %v553_v3, %v553_v3 }
  0x96   : > { %2161 = vrot.lane.b32.xlu1 %v6803_v56, %s6239_s28  ;;  %v6921_v18 = vpop.permute.xlu0 %1955  ;;  %v6923_v37 = vpop.permute.xlu1 %1953  ;;  %10390 = vst [vmem:[#allocation59_spill] sm:$0xff] %v6954_v33  ;;  %v961_v44 = vadd.f32 %v960_v26, %v959_v17 }
  0x97   : > { %v861_v19 = vadd.f32 %v860_v23, %v859_v39  ;;  %v10391_v23 = vrot.slane %v6815_v13, 7  ;;  %v6990_v16 = vsel %vm1471_vm1, %v1449_v50, %v10235_v8  ;;  %v962_v39 = vsel %vm730_vm2, %v913_v34, 0.0 }
  0x98   : > { %10393 = vst [vmem:[#allocation61_spill] sm:$0xff] %v6990_v16  ;;  %v964_v3 = vsel %vm730_vm2, %v914_v58, 0.0  ;;  %v557_v58 = vld [vmem:[%s6418_s18 + $0xb8] sm:$0xff] }
  0x99   : > { %1975 = vrot.lane.b32.xlu0 %v6937_v31, %s6237_s25  ;;  %v6984_v22 = vsel %vm1471_vm1, %v10391_v23, %v1449_v50  ;;  %v555_v50 = vld [vmem:[%s6418_s18 + $0xa8] sm:$0xff] }
  0x9a   : > { %1873 = vrot.lane.b32.xlu1 %v6778_v38, %s6239_s28  ;;  %v6960_v5 = vpop.permute.xlu0 %2051  ;;  %v6962_v59 = vpop.permute.xlu1 %2049  ;;  %10392 = vst [vmem:[#allocation60_spill] sm:$0xff] %v6984_v22  ;;  %v866_v17 = vsel %vm730_vm2, %v555_v50, 0.0 }
  0x9d   : > { %1623 = vrot.lane.b32.xlu0 %v6767_v24, %s6237_s25  ;;  %v863_v24 = vadd.f32 %v862_v29, %v861_v19  ;;  %v963_v19 = vadd.f32 %v962_v39, %v961_v44 }
  0x9e   : > { %1973 = vrot.lane.b32.xlu1 %v6930_v49, %s6237_s25  ;;  %v6973_v32 = vpop.permute.xlu0 %1731  ;;  %v6975_v11 = vpop.permute.xlu1 %1729 }
  0xa1   : > { %2071 = vrot.lane.b32.xlu0 %v6990_v16, %s6238_s27 }
  0xa2   : > { %1621 = vrot.lane.b32.xlu1 %v6720_v25, %s6237_s25  ;;  %v554_v25 = vld [vmem:[%s6418_s18 + $0xa0] sm:$0xff]  ;;  %v6998_v23 = vpop.permute.xlu0 %2147  ;;  %v7000_v0 = vpop.permute.xlu1 %2145 }
  0xa3   : > { %v864_v13 = vsel %vm730_vm2, %v554_v25, 0.0  ;;  %v915_v29 = vmul.f32 %v554_v25, %v554_v25 }
  0xa4   : > { %v865_v8 = vadd.f32 %v864_v13, %v863_v24  ;;  %v965_v24 = vadd.f32 %v964_v3, %v963_v19 }
  0xa5   : > { %1751 = vrot.lane.b32.xlu0 %v6841_v10, %s6238_s27  ;;  %v916_v10 = vmul.f32 %v555_v50, %v555_v50  ;;  %v966_v25 = vsel %vm730_vm2, %v915_v29, 0.0  ;;  %v870_v50 = vsel %vm730_vm2, %v557_v58, 0.0 }
  0xa6   : > { %2069 = vrot.lane.b32.xlu1 %v6984_v22, %s6238_s27  ;;  %v7009_v34 = vpop.permute.xlu1 %1857  ;;  %v7011_v26 = vpop.permute.xlu0 %1859  ;;  %v556_v22 = vld [vmem:[%s6418_s18 + $0xb0] sm:$0xff]  ;;  %v867_v16 = vadd.f32 %v866_v17, %v865_v8  ;;  %v10248_v8 = vrot.slane %v6853_v6, 1  ;;  %v967_v19 = vadd.f32 %v966_v25, %v965_v24 }
  0xa7   : > { %v917_v17 = vmul.f32 %v556_v22, %v556_v22  ;;  %v968_v29 = vsel %vm730_vm2, %v916_v10, 0.0  ;;  %v918_v10 = vmul.f32 %v557_v58, %v557_v58 }
  0xa8   : > { %v969_v25 = vadd.f32 %v968_v29, %v967_v19  ;;  %v919_v19 = vmul.f32 %v558_v36, %v558_v36 }
  0xa9   : > { %2167 = vrot.lane.b32.xlu0 %v6853_v6, %s6239_s28 }
  0xaa   : > { %1749 = vrot.lane.b32.xlu1 %v6835_v55, %s6238_s27  ;;  %v868_v55 = vsel %vm730_vm2, %v556_v22, 0.0  ;;  %v7020_v44 = vpop.permute.xlu1 %1957  ;;  %v7022_v13 = vpop.permute.xlu0 %1959  ;;  %v872_v22 = vsel %vm730_vm2, %v558_v36, 0.0  ;;  %v561_v36 = vld [vmem:[%s6418_s18 + $0xd8] sm:$0xff] }
  0xab   : > { %v869_v39 = vadd.f32 %v868_v55, %v867_v16  ;;  %v10396_v16 = vrot.slane %v6829_v2, 1 }
  0xad   : > { %1879 = vrot.lane.b32.xlu0 %v6877_v14, %s6239_s28  ;;  %v7043_v24 = vsel %vm1536_vm0, %v10396_v16, %v10248_v8  ;;  %v871_v55 = vadd.f32 %v870_v50, %v869_v39  ;;  %v972_v50 = vsel %vm730_vm2, %v918_v10, 0.0 }
  0xae   : > { %2165 = vrot.lane.b32.xlu1 %v6829_v2, %s6239_s28  ;;  %v7032_v3 = vpop.permute.xlu1 %1605  ;;  %v7034_v60 = vpop.permute.xlu0 %1607  ;;  %10397 = vst [vmem:[#allocation64_spill] sm:$0xff] %v7043_v24  ;;  %v559_v2 = vld [vmem:[%s6418_s18 + $0xc8] sm:$0xff] }
  0xaf   : > { %10394 = vst [vmem:[#allocation62_spill] sm:$0xff] %v7032_v3  ;;  %10395 = vst [vmem:[#allocation63_spill] sm:$0xff] %v7034_v60  ;;  %v873_v7 = vadd.f32 %v872_v22, %v871_v55  ;;  %v874_v39 = vsel %vm730_vm2, %v559_v2, 0.0  ;;  %v920_v55 = vmul.f32 %v559_v2, %v559_v2 }
  0xb1   : > { %v875_v8 = vadd.f32 %v874_v39, %v873_v7  ;;  %v878_v7 = vsel %vm730_vm2, %v561_v36, 0.0  ;;  %v976_v39 = vsel %vm730_vm2, %v920_v55, 0.0 }
  0xb2   : > { %1877 = vrot.lane.b32.xlu1 %v6871_v63, %s6239_s28  ;;  %v970_v63 = vsel %vm730_vm2, %v917_v17, 0.0  ;;  %v7049_v14 = vpop.permute.xlu1 %2053  ;;  %v7051_v28 = vpop.permute.xlu0 %2055  ;;  %v560_v17 = vld [vmem:[%s6418_s18 + $0xd0] sm:$0xff] }
  0xb3   : > { %v971_v16 = vadd.f32 %v970_v63, %v969_v25  ;;  %v876_v33 = vsel %vm730_vm2, %v560_v17, 0.0  ;;  %v974_v63 = vsel %vm730_vm2, %v919_v19, 0.0 }
  0xb4   : > { %v877_v22 = vadd.f32 %v876_v33, %v875_v8  ;;  %v6052_v33 = vld [vmem:[%s10189_s5 + $0x48] sm:$0xff]   ;;  %v7086_v8 = vld [vmem:[%s6418_s18 + $0xe0] sm:$0xff] }
  0xb5   : > { %10398 = vst [vmem:[#allocation65_spill] sm:$0xff] %v7086_v8  ;;  %v880_v55 = vsel %vm730_vm2, %v7086_v8, 0.0 }
  0xb6   : > { %1977 = vrot.lane.b32.xlu1 %v7043_v24, %s6237_s25  ;;  %v7058_v29 = vpop.permute.xlu1 %1733  ;;  %v7060_v58 = vpop.permute.xlu0 %1735  ;;  %v973_v24 = vadd.f32 %v972_v50, %v971_v16  ;;  %v921_v16 = vmul.f32 %v560_v17, %v560_v17  ;;  %v6051_v50 = vld [vmem:[%s10189_s5] sm:$0xff]  }
  0xb7   : > { %5557 = vmatpush3.bf16.msra.mxu0 %v6051_v50 }
  0xb8   : > { %v975_v10 = vadd.f32 %v974_v63, %v973_v24  ;;  %v879_v24 = vadd.f32 %v878_v7, %v877_v22  ;;  %5558 = vmatprep.subr.bf16.mxu0 %v6052_v33  ;;  %v922_v63 = vmul.f32 %v561_v36, %v561_v36  ;;  %v978_v54 = vsel %vm730_vm2, %v921_v16, 0.0  ;;  %v6054_v36 = vld [vmem:[%s10189_s5 + $0x50] sm:$0xff]  }
  0xb9   : > { %v882_v7 = vsel %vm730_vm2, %v7096_v53, 0.0  ;;  %v923_v16 = vmul.f32 %v7086_v8, %v7086_v8 }
  0xba   : > { %1625 = vrot.lane.b32.xlu1 %v6803_v56, %s6237_s25  ;;  %v7065_v25 = vpop.permute.xlu1 %2149  ;;  %v7067_v56 = vpop.permute.xlu0 %2151  ;;  %v977_v17 = vadd.f32 %v976_v39, %v975_v10  ;;  %v881_v50 = vadd.f32 %v880_v55, %v879_v24  ;;  %v6053_v10 = vld [vmem:[%s10189_s5 + $0x8] sm:$0xff]   ;;  %v980_v39 = vsel %vm730_vm2, %v922_v63, 0.0  ;;  %v6056_v55 = vld [vmem:[%s10189_s5 + $0x58] sm:$0xff]   ;;  %v7125_v63 = vsel %vm1471_vm1, %v1467_v30, %v10400_v27 }
  0xbb   : > { %5559 = vmatpush3.bf16.msra.mxu0 %v6053_v10  ;;  %10401 = vst [vmem:[#allocation67_spill] sm:$0xff] %v7125_v63  ;;  %v7131_v10 = vsel %vm1471_vm1, %v10402_v9, %v1467_v30  ;;  %v982_v41 = vsel %vm730_vm2, %v923_v16, 0.0  ;;  %v924_v27 = vmul.f32 %v7096_v53, %v7096_v53 }
  0xbc   : > { %v979_v22 = vadd.f32 %v978_v54, %v977_v17  ;;  %v6055_v54 = vld [vmem:[%s10189_s5 + $0x10] sm:$0xff]   ;;  %5560 = vmatprep.subr.bf16.mxu0 %v6054_v36  ;;  %10403 = vst [vmem:[#allocation68_spill] sm:$0xff] %v7131_v10  ;;  %v883_v8 = vadd.f32 %v882_v7, %v881_v50  ;;  %v884_v36 = vsel %vm730_vm2, %v6444_v42, 0.0  ;;  %v2340_v7 = vsel %vm730_vm2, %v6447_v43, %v6921_v18 }
  0xbe   : > { %v7075_v2 = vpop.permute.xlu1 %1861  ;;  %v7077_v19 = vpop.permute.xlu0 %1863  ;;  %v981_v45 = vadd.f32 %v980_v39, %v979_v22  ;;  %v2241_v22 = vsel %vm730_vm2, %v7131_v10, %v6907_v48  ;;  %v885_v16 = vadd.f32 %v884_v36, %v883_v8  ;;  %v7184_v48 = vld [vmem:[%s6418_s18 + $0xf8] sm:$0xff] }
  0xbf   : > { %5561 = vmatpush3.bf16.msra.mxu0 %v6055_v54  ;;  %v2274_v36 = vsel %vm2273_vm3, %v2241_v22, %v6975_v11  ;;  %v6060_v22 = vld [vmem:[%s10189_s5 + $0x68] sm:$0xff]  }
  0xc0   : > { %5562 = vmatprep.subr.bf16.mxu0 %v6056_v55  ;;  %v983_v39 = vadd.f32 %v982_v41, %v981_v45  ;;  %v2339_v45 = vsel %vm730_vm2, %v6459_v46, %v6923_v37  ;;  %v886_v37 = vsel %vm730_vm2, %v7184_v48, 0.0  ;;  %v984_v46 = vsel %vm730_vm2, %v924_v27, 0.0 }
  0xc1   : > { %v2371_v27 = vsel %vm2273_vm3, %v2339_v45, %v6962_v59 }
  0xc2   : > { %v7091_v31 = vpop.permute.xlu1 %1961  ;;  %v7093_v49 = vpop.permute.xlu0 %1963 }
  0xc6   : > { %v7111_v33 = vpop.permute.xlu1 %1609  ;;  %v7113_v24 = vpop.permute.xlu0 %1611 }
  0xcb   : > { %v7142_v9 = vpop.permute.xlu0 %2059 }
  0xcf   : > { %v7178_v41 = vpop.permute.xlu0 %1739 }
  0xd0   : > { %v7138_v6 = vpop.permute.xlu1 %2057 }
  0xd4   : > { %v7172_v18 = vpop.permute.xlu1 %1737 }
 0x108   : > { %v5496_v17 = vpop.f32.mrb[0].mxu0 }
 0x109   : > { %v5497_v62 = vpop.f32.mrb[1].mxu0 }
 0x10a   : > { %v7135_v38 = vadd.f32 %v5497_v62, %v5496_v17  ;;  %v5499_v40 = vpop.f32.mrb[2].mxu0  ;;  %v2242_v62 = vsel %vm730_vm2, %v7125_v63, %v6905_v1  ;;  %v6059_v1 = vld [vmem:[%s10189_s5 + $0x20] sm:$0xff]  }
 0x10b   : > { %v5500_v57 = vpop.f32.mrb[3].mxu0  ;;  %v2275_v55 = vsel %vm2273_vm3, %v2242_v62, %v6973_v32 }
 0x10c   : > { %v759_v30 = vmul.f32 %v7135_v38, %v7135_v38  ;;  %v7146_v50 = vadd.f32 %v5500_v57, %v5499_v40  ;;  %v6057_v40 = vld [vmem:[%s10189_s5 + $0x18] sm:$0xff]   ;;  %v6058_v57 = vld [vmem:[%s10189_s5 + $0x60] sm:$0xff]   ;;  %v731_v54 = vsel %vm730_vm2, %v7135_v38, 0.0 }
 0x10d   : > { %5563 = vmatpush3.bf16.msra.mxu0 %v6057_v40 }
 0x10e   : > { %v732_v17 = vsel %vm730_vm2, %v7146_v50, 0.0  ;;  %v760_v43 = vmul.f32 %v7146_v50, %v7146_v50  ;;  %v770_v32 = vsel %vm730_vm2, %v759_v30, 0.0  ;;  %5564 = vmatprep.subr.bf16.mxu0 %v6058_v57  ;;  %v2435_v30 = vld [vmem:[%s10192_s8] sm:$0xff]  ;;  %v2307_v57 = vsel %vm2306_vm4, %v2274_v36, %v7009_v34  ;;  %v7219_v34 = vpop.permute.xlu0 %2155 }
 0x10f   : > { %v733_v8 = vadd.f32 %v732_v17, %v731_v54  ;;  %v2372_v17 = vsel %vm2273_vm3, %v2340_v7, %v6960_v5  ;;  %v2308_v5 = vsel %vm2306_vm4, %v2275_v55, %v7011_v26  ;;  %v7210_v7 = vpop.permute.xlu1 %2153 }
 0x110   : > { %v771_v11 = vsel %vm730_vm2, %v760_v43, 0.0  ;;  %v5502_v62 = vpop.f32.mrb[4].mxu0  ;;  %v2438_v43 = vld [vmem:[%s10192_s8 + $0x18] sm:$0xff] }
 0x111   : > { %v772_v40 = vadd.f32 %v771_v11, %v770_v32  ;;  %v5503_v54 = vpop.f32.mrb[5].mxu0  ;;  %v7213_v32 = vld [vmem:[%s6418_s18 + $0xf0] sm:$0xff]  ;;  %v7217_v11 = vadd.f32 %v886_v37, %v885_v16  ;;  %5565 = vmatpush3.bf16.msra.mxu0 %v6059_v1  ;;  %v2403_v1 = vsel %vm2306_vm4, %v2371_v27, %v7000_v0  ;;  %v7231_v16 = vmul.f32 %v2435_v30, %v2307_v57  ;;  %v6061_v37 = vld [vmem:[%s10189_s5 + $0x28] sm:$0xff]   ;;  %v2439_v0 = vld [vmem:[%s10192_s8 + $0x20] sm:$0xff] }
 0x112   : > { %v7196_v10 = vadd.f32 %v5503_v54, %v5502_v62  ;;  %v5505_v63 = vpop.f32.mrb[6].mxu0  ;;  %10404 = vst [vmem:[#allocation69_spill] sm:$0xff] %v7213_v32  ;;  %v925_v59 = vmul.f32 %v7213_v32, %v7213_v32  ;;  %v985_v62 = vadd.f32 %v984_v46, %v983_v39  ;;  %v2404_v54 = vsel %vm2306_vm4, %v2372_v17, %v6998_v23  ;;  %v6062_v30 = vld [vmem:[%s10189_s5 + $0x70] sm:$0xff]  }
 0x113   : > { %v5506_v45 = vpop.f32.mrb[7].mxu0  ;;  %5566 = vmatprep.subr.bf16.mxu0 %v6060_v22  ;;  %v7233_v39 = vmul.f32 %v2438_v43, %v2308_v5  ;;  %v7250_v22 = vld [vmem:[%s6418_s18 + $0x10] sm:$0xff]  ;;  %v7255_v27 = vpop.permute.xlu1 %1865  ;;  %v7261_v5 = vld [vmem:[%s6418_s18 + $0x18] sm:$0xff] }
 0x114   : > { %v734_v36 = vsel %vm730_vm2, %v7196_v10, 0.0  ;;  %v761_v26 = vmul.f32 %v7196_v10, %v7196_v10  ;;  %v7225_v55 = vadd.f32 %v5506_v45, %v5505_v63  ;;  %v2341_v17 = vsel %vm730_vm2, %v7250_v22, %v7020_v44  ;;  %10405 = vst [vmem:[#allocation70_spill] sm:$0xff] %v7261_v5  ;;  %v7269_v44 = vpop.permute.xlu0 %1867 }
 0x115   : > { %v735_v42 = vadd.f32 %v734_v36, %v733_v8  ;;  %v2436_v8 = vld [vmem:[%s10192_s8 + $0x8] sm:$0xff]  ;;  %v2342_v45 = vsel %vm730_vm2, %v7261_v5, %v7022_v13  ;;  %v2243_v36 = vsel %vm730_vm2, %v6580_v21, %v7032_v3  ;;  %5567 = vmatpush3.bf16.msra.mxu0 %v6061_v37  ;;  %v2244_v13 = vsel %vm730_vm2, %v6573_v4, %v7034_v60  ;;  %v6064_v37 = vld [vmem:[%s10189_s5 + $0x78] sm:$0xff]  }
 0x116   : > { %v773_v63 = vsel %vm730_vm2, %v761_v26, 0.0  ;;  %v736_v46 = vsel %vm730_vm2, %v7225_v55, 0.0  ;;  %v762_v23 = vmul.f32 %v7225_v55, %v7225_v55  ;;  %v6063_v26 = vld [vmem:[%s10189_s5 + $0x30] sm:$0xff]   ;;  %5568 = vmatprep.subr.bf16.mxu0 %v6062_v30  ;;  %v2535_v3 = vmul.f32 %v2439_v0, %v2404_v54 }
 0x117   : > { %v774_v57 = vadd.f32 %v773_v63, %v772_v40  ;;  %v737_v43 = vadd.f32 %v736_v46, %v735_v42  ;;  %v986_v40 = vsel %vm730_vm2, %v925_v59, 0.0  ;;  %v2532_v32 = vmul.f32 %v2436_v8, %v2403_v1  ;;  %v7292_v60 = vpop.permute.xlu1 %1965 }
 0x118   : > { %v775_v42 = vsel %vm730_vm2, %v762_v23, 0.0  ;;  %v5508_v63 = vpop.f32.mrb[8].mxu0  ;;  %v2373_v53 = vsel %vm2273_vm3, %v2341_v17, %v7049_v14  ;;  %v926_v59 = vmul.f32 %v7184_v48, %v7184_v48  ;;  %v2374_v30 = vsel %vm2273_vm3, %v2342_v45, %v7051_v28  ;;  %v7299_v0 = vpop.permute.xlu0 %1967 }
 0x119   : > { %v776_v46 = vadd.f32 %v775_v42, %v774_v57  ;;  %v5509_v21 = vpop.f32.mrb[9].mxu0  ;;  %v2276_v4 = vsel %vm2273_vm3, %v2243_v36, %v7058_v29  ;;  %v888_v54 = vrot.slane %v7217_v11, 4  ;;  %v987_v1 = vadd.f32 %v986_v40, %v985_v62  ;;  %5569 = vmatpush3.bf16.msra.mxu0 %v6063_v26  ;;  %v2444_v26 = vld [vmem:[%s10192_s8 + $0x48] sm:$0xff]  ;;  %v7338_v40 = vld [vmem:[%s6418_s18 + $0x20] sm:$0xff] }
 0x11a   : > { %v7286_v23 = vadd.f32 %v5509_v21, %v5508_v63  ;;  %v5511_v5 = vpop.f32.mrb[10].mxu0  ;;  %v2627_v14 = vpack.c.bf16 %v7233_v39, %v7231_v16  ;;  %v2277_v21 = vsel %vm2273_vm3, %v2244_v13, %v7060_v58  ;;  %v2405_v62 = vsel %vm2306_vm4, %v2373_v53, %v7065_v25  ;;  %5570 = vmatprep.subr.bf16.mxu0 %v6064_v37  ;;  %v2442_v58 = vld [vmem:[%s10192_s8 + $0x38] sm:$0xff]  ;;  %v7344_v63 = vld [vmem:[%s6418_s18 + $0x28] sm:$0xff] }
 0x11b   : > { %v5512_v57 = vpop.f32.mrb[11].mxu0  ;;  %v2406_v16 = vsel %vm2306_vm4, %v2374_v30, %v7067_v56  ;;  %v2309_v39 = vsel %vm2306_vm4, %v2276_v4, %v7075_v2  ;;  %v2628_v45 = vpack.c.bf16 %v2535_v3, %v2532_v32  ;;  %v2445_v56 = vld [vmem:[%s10192_s8 + $0x50] sm:$0xff]  ;;  %v2310_v2 = vsel %vm2306_vm4, %v2277_v21, %v7077_v19  ;;  %v7332_v3 = vpop.permute.xlu1 %1613 }
 0x11c   : > { %v738_v28 = vsel %vm730_vm2, %v7286_v23, 0.0  ;;  %v763_v29 = vmul.f32 %v7286_v23, %v7286_v23  ;;  %v7305_v8 = vadd.f32 %v5512_v57, %v5511_v5  ;;  %v6065_v5 = vld [vmem:[%s10189_s5 + $0x38] sm:$0xff]   ;;  %v2441_v4 = vld [vmem:[%s10192_s8 + $0x30] sm:$0xff]  ;;  %v2343_v42 = vsel %vm730_vm2, %v7338_v40, %v7091_v31  ;;  %v7349_v13 = vpop.permute.xlu0 %1615 }
 0x11d   : > { %v739_v17 = vadd.f32 %v738_v28, %v737_v43  ;;  %v2344_v19 = vsel %vm730_vm2, %v7344_v63, %v7093_v49  ;;  %5571 = vmatpush3.bf16.msra.mxu0 %v6065_v5  ;;  %v988_v37 = vsel %vm730_vm2, %v926_v59, 0.0  ;;  %v2538_v57 = vmul.f32 %v2442_v58, %v2405_v62  ;;  %2904 = vmatprep.mubr.bf16.mxu0 %v2628_v45 }
 0x11e   : > { %v777_v53 = vsel %vm730_vm2, %v763_v29, 0.0  ;;  %v740_v25 = vsel %vm730_vm2, %v7305_v8, 0.0  ;;  %v764_v43 = vmul.f32 %v7305_v8, %v7305_v8  ;;  %v2245_v21 = vsel %vm730_vm2, %v6529_v20, %v7111_v33 }
 0x11f   : > { %v778_v32 = vadd.f32 %v777_v53, %v776_v46  ;;  %v741_v36 = vadd.f32 %v740_v25, %v739_v17  ;;  %v2541_v29 = vmul.f32 %v2445_v56, %v2406_v16  ;;  %v2537_v17 = vmul.f32 %v2441_v4, %v2309_v39  ;;  %v2062_v20 = vpop.permute.xlu1 %2061 }
 0x120   : > { %v779_v46 = vsel %vm730_vm2, %v764_v43, 0.0  ;;  %v5514_v30 = vpop.f32.mrb[12].mxu0  ;;  %v2246_v49 = vsel %vm730_vm2, %v6525_v15, %v7113_v24  ;;  %v2540_v53 = vmul.f32 %v2444_v26, %v2310_v2  ;;  %v2375_v62 = vsel %vm2273_vm3, %v2343_v42, %v7138_v6  ;;  %2905 = vmatmul.mubr.bf16.vlgmr.msra.gmra.mrb[24].mxu0 %v2627_v14  ;;  %v2064_v25 = vpop.permute.xlu0 %2063 }
 0x121   : > { %v780_v31 = vadd.f32 %v779_v46, %v778_v32  ;;  %v5515_v28 = vpop.f32.mrb[13].mxu0  ;;  %v2376_v58 = vsel %vm2273_vm3, %v2344_v19, %v7142_v9  ;;  %v7366_v16 = vadd.f32 %v888_v54, %v7217_v11  ;;  %v989_v39 = vadd.f32 %v988_v37, %v987_v1 }
 0x122   : > { %v7359_v5 = vadd.f32 %v5515_v28, %v5514_v30  ;;  %v5517_v59 = vpop.f32.mrb[14].mxu0  ;;  %v2278_v15 = vsel %vm2273_vm3, %v2245_v21, %v7172_v18  ;;  %v2279_v9 = vsel %vm2273_vm3, %v2246_v49, %v7178_v41  ;;  %v2407_v11 = vsel %vm2306_vm4, %v2375_v62, %v7210_v7  ;;  %v2448_v41 = vld [vmem:[%s10192_s8 + $0x68] sm:$0xff]  ;;  %v2451_v7 = vld [vmem:[%s10192_s8 + $0x80] sm:$0xff] }
 0x123   : > { %v5518_v45 = vpop.f32.mrb[15].mxu0  ;;  %v2408_v54 = vsel %vm2306_vm4, %v2376_v58, %v7219_v34  ;;  %v2631_v18 = vpack.c.bf16 %v2541_v29, %v2538_v57  ;;  %v1742_v32 = vpop.permute.xlu1 %1741  ;;  %v990_v42 = vrot.slane %v989_v39, 4  ;;  %v2345_v19 = vsel %vm730_vm2, %v6635_v61, %v7292_v60  ;;  %v2447_v57 = vld [vmem:[%s10192_s8 + $0x60] sm:$0xff] }
 0x124   : > { %v742_v43 = vsel %vm730_vm2, %v7359_v5, 0.0  ;;  %v765_v6 = vmul.f32 %v7359_v5, %v7359_v5  ;;  %v7374_v56 = vadd.f32 %v5518_v45, %v5517_v59  ;;  %v1744_v37 = vpop.permute.xlu0 %1743  ;;  %v2311_v21 = vsel %vm2306_vm4, %v2278_v15, %v7255_v27 }
 0x125   : > { %v743_v14 = vadd.f32 %v742_v43, %v741_v36  ;;  %v2630_v36 = vpack.c.bf16 %v2540_v53, %v2537_v17  ;;  %2912 = vmatprep.mubr.bf16.mxu0 %v2631_v18  ;;  %v2312_v28 = vsel %vm2306_vm4, %v2279_v9, %v7269_v44  ;;  %v2346_v60 = vsel %vm730_vm2, %v6670_v47, %v7299_v0 }
 0x126   : > { %v781_v1 = vsel %vm730_vm2, %v765_v6, 0.0  ;;  %v744_v4 = vsel %vm730_vm2, %v7374_v56, 0.0  ;;  %v766_v2 = vmul.f32 %v7374_v56, %v7374_v56  ;;  %v2544_v17 = vmul.f32 %v2448_v41, %v2407_v11  ;;  %v2454_v41 = vld [vmem:[%s10192_s8 + $0x98] sm:$0xff] }
 0x127   : > { %v782_v34 = vadd.f32 %v781_v1, %v780_v31  ;;  %v745_v26 = vadd.f32 %v744_v4, %v743_v14  ;;  %v2450_v31 = vld [vmem:[%s10192_s8 + $0x78] sm:$0xff]  ;;  %v2547_v49 = vmul.f32 %v2451_v7, %v2408_v54  ;;  %v2247_v59 = vsel %vm730_vm2, %v6612_v52, %v7332_v3  ;;  %v2158_v47 = vpop.permute.xlu1 %2157  ;;  %v2457_v7 = vld [vmem:[%s10192_s8 + $0xb0] sm:$0xff] }
 0x128   : > { %v783_v46 = vsel %vm730_vm2, %v766_v2, 0.0  ;;  %v5520_v30 = vpop.f32.mrb[16].mxu0  ;;  %v890_v62 = vrot.slane %v7366_v16, 2  ;;  %v2248_v44 = vsel %vm730_vm2, %v6608_v51, %v7349_v13  ;;  %v2377_v58 = vsel %vm2273_vm3, %v2345_v19, %v2062_v20  ;;  %2913 = vmatmul.mubr.bf16.gmra.mrb[28].mxu0 %v2630_v36  ;;  %v2160_v52 = vpop.permute.xlu0 %2159 }
 0x129   : > { %v784_v61 = vadd.f32 %v783_v46, %v782_v34  ;;  %v5521_v29 = vpop.f32.mrb[17].mxu0  ;;  %v991_v45 = vadd.f32 %v990_v42, %v989_v39  ;;  %v2543_v15 = vmul.f32 %v2447_v57, %v2311_v21  ;;  %v2546_v43 = vmul.f32 %v2450_v31, %v2312_v28  ;;  %v2453_v42 = vld [vmem:[%s10192_s8 + $0x90] sm:$0xff] }
 0x12a   : > { %v7413_v27 = vadd.f32 %v5521_v29, %v5520_v30  ;;  %v5523_v53 = vpop.f32.mrb[18].mxu0  ;;  %v2378_v6 = vsel %vm2273_vm3, %v2346_v60, %v2064_v25  ;;  %v2280_v51 = vsel %vm2273_vm3, %v2247_v59, %v1742_v32  ;;  %v2281_v54 = vsel %vm2273_vm3, %v2248_v44, %v1744_v37  ;;  %v7433_v25 = vld [vmem:[%s10189_s5 + $0x80] sm:$0xff]   ;;  %v2456_v37 = vld [vmem:[%s10192_s8 + $0xa8] sm:$0xff] }
 0x12b   : > { %v5524_v0 = vpop.f32.mrb[19].mxu0  ;;  %v2409_v39 = vsel %vm2306_vm4, %v2377_v58, %v2158_v47  ;;  %v2634_v18 = vpack.c.bf16 %v2547_v49, %v2544_v17  ;;  %v2410_v32 = vsel %vm2306_vm4, %v2378_v6, %v2160_v52  ;;  %v1870_v36 = vpop.permute.xlu1 %1869  ;;  %5896 = vmatprep.subr.bf16.mxu1 %v7433_v25  ;;  %v2633_v31 = vpack.c.bf16 %v2546_v43, %v2543_v15 }
 0x12c   : > { %v746_v9 = vsel %vm730_vm2, %v7413_v27, 0.0  ;;  %v767_v14 = vmul.f32 %v7413_v27, %v7413_v27  ;;  %v7425_v11 = vadd.f32 %v5524_v0, %v5523_v53  ;;  %v2313_v19 = vsel %vm2306_vm4, %v2280_v51, %v1870_v36  ;;  %v1872_v46 = vpop.permute.xlu0 %1871 }
 0x12d   : > { %v747_v20 = vadd.f32 %v746_v9, %v745_v26  ;;  %2920 = vmatprep.mubr.bf16.mxu0 %v2634_v18  ;;  %v2314_v21 = vsel %vm2306_vm4, %v2281_v54, %v1872_v46  ;;  %v2553_v29 = vmul.f32 %v2457_v7, %v2410_v32  ;;  %v891_v59 = vadd.f32 %v890_v62, %v7366_v16  ;;  %v7477_v46 = vld [vmem:[%s6418_s18 + $0x48] sm:$0xff] }
 0x12e   : > { %v785_v1 = vsel %vm730_vm2, %v767_v14, 0.0  ;;  %v748_v4 = vsel %vm730_vm2, %v7425_v11, 0.0  ;;  %v768_v2 = vmul.f32 %v7425_v11, %v7425_v11  ;;  %v2549_v53 = vmul.f32 %v2453_v42, %v2313_v19  ;;  %v7470_v19 = vld [vmem:[%s6418_s18 + $0x40] sm:$0xff] }
 0x12f   : > { %v786_v34 = vadd.f32 %v785_v1, %v784_v61  ;;  %v749_v26 = vadd.f32 %v748_v4, %v747_v20  ;;  %v2550_v61 = vmul.f32 %v2454_v41, %v2409_v39  ;;  %v2552_v44 = vmul.f32 %v2456_v37, %v2314_v21  ;;  %v1970_v58 = vpop.permute.xlu1 %1969 }
 0x130   : > { %v787_v30 = vsel %vm730_vm2, %v768_v2, 0.0  ;;  %v5526_v57 = vpop.f32.mrb[20].mxu0  ;;  %2921 = vmatmul.mubr.bf16.gmra.mrb[32].mxu0 %v2633_v31  ;;  %v992_v0 = vrot.slane %v991_v45, 2  ;;  %v1972_v6 = vpop.permute.xlu0 %1971  ;;  %v892_v51 = vrot.slane %v891_v59, 1  ;;  %v1518_v21 = vrot.slane %v6865_v12, 1 }
 0x131   : > { %v788_v28 = vadd.f32 %v787_v30, %v786_v34  ;;  %v5527_v60 = vpop.f32.mrb[21].mxu0  ;;  %v2637_v9 = vpack.c.bf16 %v2553_v29, %v2550_v61  ;;  %v2636_v16 = vpack.c.bf16 %v2552_v44, %v2549_v53  ;;  %v2348_v30 = vsel %vm730_vm2, %v7477_v46, %v1972_v6  ;;  %v10406_v29 = vld [vmem:[#allocation44_spill] sm:$0xff]  ;;  %v10407_v53 = vld [vmem:[#allocation50_spill] sm:$0xff]  ;;  %v10409_v6 = vld [vmem:[#allocation45_spill] sm:$0xff] }
 0x132   : > { %v7457_v17 = vadd.f32 %v5527_v60, %v5526_v57  ;;  %v5529_v49 = vpop.f32.mrb[22].mxu0  ;;  %v993_v39 = vadd.f32 %v992_v0, %v991_v45  ;;  %v893_v2 = vadd.f32 %v892_v51, %v891_v59  ;;  %v2347_v45 = vsel %vm730_vm2, %v7470_v19, %v1970_v58 }
 0x133   : > { %v5530_v47 = vpop.f32.mrb[23].mxu0  ;;  %v7465_v20 = vpop.permute.xlu1 %1617  ;;  %2928 = vmatprep.mubr.bf16.mxu0 %v2637_v9  ;;  %v10408_v44 = vrot.slane %v10407_v53, 1 }
 0x134   : > { %v750_v52 = vsel %vm730_vm2, %v7457_v17, 0.0  ;;  %v769_v15 = vmul.f32 %v7457_v17, %v7457_v17  ;;  %v7467_v18 = vpop.permute.xlu0 %1619  ;;  %v994_v36 = vrot.slane %v993_v39, 1  ;;  %v7474_v37 = vmul.f32 0.00390625, %v893_v2 }
 0x135   : > { %v751_v43 = vadd.f32 %v750_v52, %v749_v26  ;;  %v2249_v49 = vsel %vm730_vm2, %v10406_v29, %v7465_v20  ;;  %v7492_v58 = vsel %vm1536_vm0, %v10408_v44, %v1518_v21  ;;  %v2250_v52 = vsel %vm730_vm2, %v10409_v6, %v7467_v18 }
 0x136   : > { %v789_v14 = vsel %vm730_vm2, %v769_v15, 0.0  ;;  %v995_v60 = vadd.f32 %v994_v36, %v993_v39  ;;  %1979 = vrot.lane.b32.xlu0 %v7492_v58, %s6237_s25  ;;  %v997_v9 = vmul.f32 %v7474_v37, %v7474_v37 }
 0x137   : > { %v752_v62 = vrot.slane %v751_v43, 4  ;;  %v790_v54 = vadd.f32 %v789_v14, %v788_v28  ;;  %v2066_v41 = vpop.permute.xlu1 %2065 }
 0x138   : > { %2929 = vmatmul.mubr.bf16.gmra.mrb[36].mxu0 %v2636_v16  ;;  %v2068_v34 = vpop.permute.xlu0 %2067  ;;  %v2379_v59 = vsel %vm2273_vm3, %v2347_v45, %v2066_v41 }
 0x139   : > { %v753_v1 = vadd.f32 %v752_v62, %v751_v43  ;;  %v791_v4 = vrot.slane %v790_v54, 4  ;;  %v2380_v15 = vsel %vm2273_vm3, %v2348_v30, %v2068_v34  ;;  %v2460_v43 = vld [vmem:[%s10192_s8 + $0xc8] sm:$0xff]  ;;  %v996_v62 = vmul.f32 0.00390625, %v995_v60 }
 0x13b   : > { %v754_v7 = vrot.slane %v753_v1, 2  ;;  %v792_v32 = vadd.f32 %v791_v4, %v790_v54  ;;  %v1746_v57 = vpop.permute.xlu1 %1745 }
 0x13c   : > { %v1748_v61 = vpop.permute.xlu0 %1747 }
 0x13d   : > { %v755_v26 = vadd.f32 %v754_v7, %v753_v1  ;;  %v793_v42 = vrot.slane %v792_v32, 2  ;;  %v2282_v1 = vsel %vm2273_vm3, %v2249_v49, %v1746_v57  ;;  %v2283_v4 = vsel %vm2273_vm3, %v2250_v52, %v1748_v61  ;;  %v2459_v57 = vld [vmem:[%s10192_s8 + $0xc0] sm:$0xff] }
 0x13f   : > { %v756_v31 = vrot.slane %v755_v26, 1  ;;  %v794_v28 = vadd.f32 %v793_v42, %v792_v32  ;;  %v2162_v14 = vpop.permute.xlu1 %2161  ;;  %v7521_v42 = vld [vmem:[%s6418_s18 + $0x58] sm:$0xff] }
 0x140   : > { %v2411_v54 = vsel %vm2306_vm4, %v2379_v59, %v2162_v14  ;;  %v2164_v39 = vpop.permute.xlu0 %2163  ;;  %1627 = vrot.lane.b32.xlu0 %v7521_v42, %s6237_s25 }
 0x141   : > { %v757_v47 = vadd.f32 %v756_v31, %v755_v26  ;;  %v795_v0 = vrot.slane %v794_v28, 1  ;;  %v2556_v2 = vmul.f32 %v2460_v43, %v2411_v54  ;;  %v2412_v41 = vsel %vm2306_vm4, %v2380_v15, %v2164_v39  ;;  %v2463_v26 = vld [vmem:[%s10192_s8 + $0xe0] sm:$0xff]  ;;  %v7556_v39 = vld [vmem:[%s6418_s18 + $0x50] sm:$0xff] }
 0x142   : > { %v2559_v49 = vmul.f32 %v2463_v26, %v2412_v41  ;;  %v10411_v41 = vld [vmem:[#allocation49_spill] sm:$0xff] }
 0x143   : > { %v7505_v51 = vmul.f32 0.012345679, %v757_v47  ;;  %v796_v16 = vadd.f32 %v795_v0, %v794_v28  ;;  %v1874_v31 = vpop.permute.xlu1 %1873  ;;  %v998_v47 = vsub.f32 %v996_v62, %v997_v9 }
 0x144   : > { %v2640_v6 = vpack.c.bf16 %v2559_v49, %v2556_v2 }
 0x145   : > { %v797_v7 = vmul.f32 0.012345679, %v796_v16  ;;  %v798_v32 = vmul.f32 %v7505_v51, %v7505_v51  ;;  %v811_v36 = vsub.f32 %v7457_v17, %v7505_v51  ;;  %v801_v34 = vsub.f32 %v7135_v38, %v7505_v51 }
 0x146   : > { %v802_v45 = vsub.f32 %v7146_v50, %v7505_v51  ;;  %v803_v30 = vsub.f32 %v7196_v10, %v7505_v51  ;;  %v804_v17 = vsub.f32 %v7225_v55, %v7505_v51  ;;  %v805_v38 = vsub.f32 %v7286_v23, %v7505_v51  ;;  %v2462_v55 = vld [vmem:[%s10192_s8 + $0xd8] sm:$0xff]  ;;  %v1876_v23 = vpop.permute.xlu0 %1875  ;;  %2936 = vmatprep.mubr.bf16.mxu0 %v2640_v6 }
 0x147   : > { %v799_v28 = vsub.f32 %v797_v7, %v798_v32  ;;  %v806_v60 = vsub.f32 %v7305_v8, %v7505_v51  ;;  %v807_v50 = vsub.f32 %v7359_v5, %v7505_v51  ;;  %v808_v10 = vsub.f32 %v7374_v56, %v7505_v51  ;;  %v1974_v0 = vpop.permute.xlu1 %1973 }
 0x148   : > { %v809_v61 = vsub.f32 %v7413_v27, %v7505_v51  ;;  %v810_v29 = vsub.f32 %v7425_v11, %v7505_v51  ;;  %v2315_v8 = vsel %vm2306_vm4, %v2282_v1, %v1874_v31  ;;  %v2316_v5 = vsel %vm2306_vm4, %v2283_v4, %v1876_v23  ;;  %v10410_v4 = vld [vmem:[#allocation48_spill] sm:$0xff] }
 0x149   : > { %v800_v59 = vmax.f32 %v799_v28, 0.0  ;;  %v2555_v44 = vmul.f32 %v2459_v57, %v2315_v8  ;;  %v2558_v56 = vmul.f32 %v2462_v55, %v2316_v5  ;;  %v999_v27 = vmax.f32 %v998_v47, 0.0 }
 0x14a   : > { %v1976_v15 = vpop.permute.xlu0 %1975  ;;  %v2349_v9 = vsel %vm730_vm2, %v7556_v39, %v1974_v0 }
 0x14b   : > { %v812_v52 = vadd.f32 1e-06, %v800_v59  ;;  %v2639_v43 = vpack.c.bf16 %v2558_v56, %v2555_v44  ;;  %v7551_v11 = vpop.permute.xlu1 %1621  ;;  %v1032_v51 = vadd.f32 1e-06, %v999_v27  ;;  %v2350_v62 = vsel %vm730_vm2, %v7521_v42, %v1976_v15 }
 0x14c   : > { %v2251_v2 = vsel %vm730_vm2, %v10410_v4, %v7551_v11 }
 0x14d   : > { %6102 = vrsqrt.f32 %v812_v52  ;;  %2937 = vmatmul.mubr.bf16.gmra.mrb[40].mxu0 %v2639_v43  ;;  %v2466_v52 = vld [vmem:[%s10192_s8 + $0xf8] sm:$0xff] }
 0x14e   : > { %v7553_v14 = vpop.permute.xlu0 %1623  ;;  %6104 = vrsqrt.f32 %v1032_v51  ;;  %v2465_v51 = vld [vmem:[%s10192_s8 + $0xf0] sm:$0xff] }
 0x14f   : > { %v2070_v16 = vpop.permute.xlu1 %2069  ;;  %v2252_v7 = vsel %vm730_vm2, %v10411_v41, %v7553_v14 }
 0x150   : > { %v2381_v32 = vsel %vm2273_vm3, %v2349_v9, %v2070_v16  ;;  %v2468_v16 = vld [vmem:[%s10192_s8 + $0x108] sm:$0xff] }
 0x152   : > { %v2072_v54 = vpop.permute.xlu0 %2071 }
 0x153   : > { %v2382_v26 = vsel %vm2273_vm3, %v2350_v62, %v2072_v54  ;;  %v1750_v57 = vpop.permute.xlu1 %1749 }
 0x156   : > { %v1752_v31 = vpop.permute.xlu0 %1751 }
 0x157   : > { %v6103_v1 = vpop.eup %6102 }
 0x158   : > { %v7570_v28 = vmul.f32 %v6103_v1, %v811_v36  ;;  %v814_v55 = vmul.f32 %v6103_v1, %v801_v34  ;;  %v815_v23 = vmul.f32 %v6103_v1, %v802_v45  ;;  %v816_v49 = vmul.f32 %v6103_v1, %v803_v30  ;;  %v6067_v36 = vld [vmem:[%s10189_s5 + $0x88] sm:$0xff]   ;;  %v2166_v34 = vpop.permute.xlu1 %2165  ;;  %v2469_v45 = vld [vmem:[%s10192_s8 + $0x110] sm:$0xff]  ;;  %v7595_v62 = vpop.eup %6104 }
 0x159   : > { %v817_v8 = vmul.f32 %v6103_v1, %v804_v17  ;;  %v818_v59 = vmul.f32 %v6103_v1, %v805_v38  ;;  %v819_v44 = vmul.f32 %v6103_v1, %v806_v60  ;;  %v820_v5 = vmul.f32 %v6103_v1, %v807_v50 }
 0x15a   : > { %v1066_v47 = vpack.c.bf16 %v815_v23, %v814_v55  ;;  %v821_v56 = vmul.f32 %v6103_v1, %v808_v10  ;;  %v822_v0 = vmul.f32 %v6103_v1, %v809_v61  ;;  %v823_v6 = vmul.f32 %v6103_v1, %v810_v29  ;;  %v2168_v30 = vpop.permute.xlu0 %2167 }
 0x15b   : > { %v1067_v15 = vpack.c.bf16 %v817_v8, %v816_v49  ;;  %v1068_v43 = vpack.c.bf16 %v819_v44, %v818_v59  ;;  %v2413_v60 = vsel %vm2306_vm4, %v2381_v32, %v2166_v34  ;;  %v2284_v50 = vsel %vm2273_vm3, %v2251_v2, %v1750_v57  ;;  %v6185_v57 = vld [vmem:[%s6418_s18] sm:$0xff] }
 0x15c   : > { %5852 = vmatprep.mubr.msk.bf16.mxu1 %vm730_vm2, %v1066_v47  ;;  %v1069_v17 = vpack.c.bf16 %v821_v56, %v820_v5  ;;  %v1070_v38 = vpack.c.bf16 %v823_v6, %v822_v0  ;;  %v2285_v10 = vsel %vm2273_vm3, %v2252_v7, %v1752_v31  ;;  %v2562_v61 = vmul.f32 %v2466_v52, %v2413_v60  ;;  %v1878_v54 = vpop.permute.xlu1 %1877  ;;  %v6184_v7 = vld [vmem:[%s6418_s18 + $0x8] sm:$0xff]  ;;  %v6186_v56 = vld [vmem:[%s6418_s18 + $0x30] sm:$0xff] }
 0x15d   : > { %5853 = vmatmul.mubr.msk.bf16.vlgmr.msra.gmra.mrb[0].mxu1 %vm730_vm2, %v1067_v15  ;;  %v2414_v29 = vsel %vm2306_vm4, %v2382_v26, %v2168_v30  ;;  %v2317_v1 = vsel %vm2306_vm4, %v2284_v50, %v1878_v54  ;;  %v1001_v32 = vsub.f32 %v6184_v7, %v7474_v37  ;;  %v1002_v26 = vsub.f32 %v7250_v22, %v7474_v37  ;;  %v10412_v22 = vld [vmem:[#allocation70_spill] sm:$0xff] }
 0x15e   : > { %5856 = vmatprep.mubr.msk.bf16.mxu1 %vm730_vm2, %v1068_v43  ;;  %5897 = vmatpush3.bf16.msra.mxu1 %v7433_v25  ;;  %v2565_v27 = vmul.f32 %v2469_v45, %v2414_v29  ;;  %v1880_v9 = vpop.permute.xlu0 %1879  ;;  %v2561_v2 = vmul.f32 %v2465_v51, %v2317_v1  ;;  %v1000_v31 = vsub.f32 %v6185_v57, %v7474_v37  ;;  %v7668_v7 = vld [vmem:[%s6418_s18 + $0x80] sm:$0xff]  ;;  %v7673_v57 = vld [vmem:[%s6418_s18 + $0x88] sm:$0xff] }
 0x15f   : > { %5898 = vmatprep.subr.bf16.mxu1 %v6067_v36  ;;  %v2318_v4 = vsel %vm2306_vm4, %v2285_v10, %v1880_v9  ;;  %v1035_v23 = vmul.f32 %v7595_v62, %v1001_v32  ;;  %v1036_v49 = vmul.f32 %v7595_v62, %v1002_v26  ;;  %v1003_v59 = vsub.f32 %v10412_v22, %v7474_v37 }
 0x160   : > { %v2643_v25 = vpack.c.bf16 %v2565_v27, %v2562_v61  ;;  %v2564_v41 = vmul.f32 %v2468_v16, %v2318_v4  ;;  %v1034_v8 = vmul.f32 %v7595_v62, %v1000_v31  ;;  %v1004_v44 = vsub.f32 %v7338_v40, %v7474_v37  ;;  %v7642_v61 = vld [vmem:[%s6418_s18 + $0x60] sm:$0xff]  ;;  %v7647_v27 = vld [vmem:[%s6418_s18 + $0x68] sm:$0xff]  ;;  %v7652_v16 = vld [vmem:[%s6418_s18 + $0x70] sm:$0xff] }
 0x161   : > { %v1072_v5 = vpack.c.bf16 %v1036_v49, %v1035_v23  ;;  %v1005_v47 = vsub.f32 %v7344_v63, %v7474_v37  ;;  %v1006_v0 = vsub.f32 %v6186_v56, %v7474_v37  ;;  %v1037_v52 = vmul.f32 %v7595_v62, %v1003_v59  ;;  %v6187_v63 = vld [vmem:[%s6418_s18 + $0x38] sm:$0xff]  ;;  %v7694_v56 = vld [vmem:[%s6418_s18 + $0xa0] sm:$0xff] }
 0x162   : > { %5899 = vmatpush3.bf16.msra.mxu1 %v6067_v36  ;;  %2944 = vmatprep.mubr.bf16.mxu0 %v2643_v25  ;;  %v2642_v55 = vpack.c.bf16 %v2564_v41, %v2561_v2  ;;  %v1071_v6 = vpack.c.bf16 %v1034_v8, %v7570_v28  ;;  %v1038_v15 = vmul.f32 %v7595_v62, %v1004_v44  ;;  %v7663_v2 = vld [vmem:[%s6418_s18 + $0x78] sm:$0xff] }
 0x163   : > { %v1039_v43 = vmul.f32 %v7595_v62, %v1005_v47  ;;  %v1040_v40 = vmul.f32 %v7595_v62, %v1006_v0  ;;  %v1007_v34 = vsub.f32 %v6187_v63, %v7474_v37  ;;  %v1008_v28 = vsub.f32 %v7470_v19, %v7474_v37 }
 0x164   : > { %2945 = vmatmul.mubr.bf16.gmra.mrb[44].mxu0 %v2642_v55  ;;  %v1073_v36 = vpack.c.bf16 %v1038_v15, %v1037_v52  ;;  %v1009_v30 = vsub.f32 %v7477_v46, %v7474_v37  ;;  %v1011_v46 = vsub.f32 %v7521_v42, %v7474_v37  ;;  %v1013_v51 = vsub.f32 %v7647_v27, %v7474_v37  ;;  %v7678_v55 = vld [vmem:[%s6418_s18 + $0x90] sm:$0xff]  ;;  %v7699_v52 = vld [vmem:[%s6418_s18 + $0xa8] sm:$0xff] }
 0x165   : > { %5857 = vmatmul.mubr.msk.bf16.gmra.mrb[4].mxu1 %vm730_vm2, %v1069_v17  ;;  %v1074_v45 = vpack.c.bf16 %v1040_v40, %v1039_v43  ;;  %v1010_v17 = vsub.f32 %v7556_v39, %v7474_v37  ;;  %v1042_v60 = vmul.f32 %v7595_v62, %v1008_v28  ;;  %v1012_v39 = vsub.f32 %v7642_v61, %v7474_v37  ;;  %v7704_v43 = vld [vmem:[%s6418_s18 + $0xb0] sm:$0xff] }
 0x166   : > { %5860 = vmatprep.mubr.msk.bf16.mxu1 %vm730_vm2, %v1070_v38  ;;  %v1041_v38 = vmul.f32 %v7595_v62, %v1007_v34  ;;  %v1043_v50 = vmul.f32 %v7595_v62, %v1009_v30  ;;  %v1014_v54 = vsub.f32 %v7652_v16, %v7474_v37  ;;  %v1045_v42 = vmul.f32 %v7595_v62, %v1011_v46  ;;  %v7715_v30 = vld [vmem:[%s6418_s18 + $0xb8] sm:$0xff]  ;;  %v7730_v46 = vld [vmem:[%s6418_s18 + $0xd0] sm:$0xff] }
 0x167   : > { %v1044_v19 = vmul.f32 %v7595_v62, %v1010_v17  ;;  %v1046_v9 = vmul.f32 %v7595_v62, %v1012_v39  ;;  %v1047_v1 = vmul.f32 %v7595_v62, %v1013_v51  ;;  %v1015_v41 = vsub.f32 %v7663_v2, %v7474_v37  ;;  %10413 = vst [vmem:[#allocation44_spill] sm:$0xff] %v7704_v43 }
 0x168   : > { %v1075_v10 = vpack.c.bf16 %v1042_v60, %v1041_v38  ;;  %v1048_v4 = vmul.f32 %v7595_v62, %v1014_v54  ;;  %v1016_v32 = vsub.f32 %v7668_v7, %v7474_v37  ;;  %v1017_v31 = vsub.f32 %v7673_v57, %v7474_v37  ;;  %10414 = vst [vmem:[#allocation50_spill] sm:$0xff] %v7715_v30  ;;  %v7720_v38 = vld [vmem:[%s6418_s18 + $0xc0] sm:$0xff] }
 0x169   : > { %v1076_v29 = vpack.c.bf16 %v1044_v19, %v1043_v50  ;;  %v1077_v25 = vpack.c.bf16 %v1046_v9, %v1045_v42  ;;  %v1018_v23 = vsub.f32 %v7678_v55, %v7474_v37  ;;  %v1049_v49 = vmul.f32 %v7595_v62, %v1015_v41  ;;  %10415 = vst [vmem:[#allocation45_spill] sm:$0xff] %v7720_v38  ;;  %v7725_v19 = vld [vmem:[%s6418_s18 + $0xc8] sm:$0xff] }
 0x16a   : > { %v1078_v26 = vpack.c.bf16 %v1048_v4, %v1047_v1  ;;  %v1050_v8 = vmul.f32 %v7595_v62, %v1016_v32  ;;  %v1051_v22 = vmul.f32 %v7595_v62, %v1017_v31  ;;  %v1020_v0 = vsub.f32 %v7694_v56, %v7474_v37  ;;  %10416 = vst [vmem:[#allocation48_spill] sm:$0xff] %v7725_v19  ;;  %v7741_v1 = vld [vmem:[%s6418_s18 + $0xd8] sm:$0xff] }
 0x16b   : > { %v1052_v59 = vmul.f32 %v7595_v62, %v1018_v23  ;;  %v1021_v15 = vsub.f32 %v7699_v52, %v7474_v37  ;;  %v1022_v40 = vsub.f32 %v7704_v43, %v7474_v37  ;;  %v1023_v17 = vsub.f32 %v7715_v30, %v7474_v37  ;;  %10417 = vst [vmem:[#allocation49_spill] sm:$0xff] %v7741_v1  ;;  %v10420_v23 = vld [vmem:[#allocation69_spill] sm:$0xff] }
 0x16c   : > { %v1079_v44 = vpack.c.bf16 %v1050_v8, %v1049_v49  ;;  %v1054_v63 = vmul.f32 %v7595_v62, %v1020_v0  ;;  %v1024_v60 = vsub.f32 %v7720_v38, %v7474_v37  ;;  %v1026_v39 = vsub.f32 %v7730_v46, %v7474_v37 }
 0x16d   : > { %5861 = vmatmul.mubr.msk.bf16.gmra.mrb[8].mxu1 %vm730_vm2, %v1071_v6  ;;  %v1080_v6 = vpack.c.bf16 %v1052_v59, %v1051_v22  ;;  %v1055_v34 = vmul.f32 %v7595_v62, %v1021_v15  ;;  %v1056_v28 = vmul.f32 %v7595_v62, %v1022_v40  ;;  %v1027_v4 = vsub.f32 %v7741_v1, %v7474_v37  ;;  %v2437_v15 = vld [vmem:[%s10192_s8 + $0x10] sm:$0xff]  ;;  %v2440_v40 = vld [vmem:[%s10192_s8 + $0x28] sm:$0xff] }
 0x16e   : > { %5864 = vmatprep.mubr.msk.bf16.mxu1 %vm730_vm2, %v1072_v5  ;;  %v7689_v5 = vld [vmem:[%s6418_s18 + $0x98] sm:$0xff]  ;;  %v1058_v51 = vmul.f32 %v7595_v62, %v1024_v60  ;;  %v1060_v42 = vmul.f32 %v7595_v62, %v1026_v39  ;;  %v1030_v49 = vsub.f32 %v10420_v23, %v7474_v37  ;;  %v1031_v0 = vsub.f32 %v7184_v48, %v7474_v37  ;;  %v10423_v60 = vld [vmem:[#allocation43_spill] sm:$0xff]  ;;  %v10426_v39 = vld [vmem:[#allocation56_spill] sm:$0xff] }
 0x16f   : > { %v1019_v47 = vsub.f32 %v7689_v5, %v7474_v37  ;;  %v1082_v50 = vpack.c.bf16 %v1056_v28, %v1055_v34  ;;  %v1061_v8 = vmul.f32 %v7595_v62, %v1027_v4  ;;  %v10422_v28 = vld [vmem:[#allocation40_spill] sm:$0xff]  ;;  %v2470_v23 = vld [vmem:[%s10192_s8 + $0x118] sm:$0xff] }
 0x170   : > { %v2566_v12 = vmul.f32 %v2470_v23, %v7492_v58  ;;  %v1528_v23 = vrot.slane %v7720_v38, 1 }
 0x175   : > { %5865 = vmatmul.mubr.msk.bf16.gmra.mrb[12].mxu1 %vm730_vm2, %v1073_v36  ;;  %v1053_v36 = vmul.f32 %v7595_v62, %v1019_v47 }
 0x176   : > { %5868 = vmatprep.mubr.msk.bf16.mxu1 %vm730_vm2, %v1074_v45 }
 0x177   : > { %v1081_v45 = vpack.c.bf16 %v1054_v63, %v1053_v36  ;;  %v1065_v36 = vmul.f32 %v7595_v62, %v1031_v0  ;;  %v10421_v63 = vld [vmem:[#allocation41_spill] sm:$0xff] }
 0x178   : > { %v2533_v34 = vmul.f32 %v2437_v15, %v10421_v63  ;;  %v1522_v63 = vrot.slane %v7678_v55, 1 }
 0x179   : > { %v1087_v48 = vpack.c.bf16 %v1065_v36, %v1065_v36  ;;  %v1521_v36 = vrot.slane %v7673_v57, 1 }
 0x17d   : > { %5869 = vmatmul.mubr.msk.bf16.gmra.mrb[16].mxu1 %vm730_vm2, %v1075_v10  ;;  %v1025_v10 = vsub.f32 %v7725_v19, %v7474_v37 }
 0x17e   : > { %5872 = vmatprep.mubr.msk.bf16.mxu1 %vm730_vm2, %v1076_v29  ;;  %v1057_v29 = vmul.f32 %v7595_v62, %v1023_v17  ;;  %v2461_v17 = vld [vmem:[%s10192_s8 + $0xd0] sm:$0xff] }
 0x17f   : > { %v1059_v54 = vmul.f32 %v7595_v62, %v1025_v10 }
 0x180   : > { %v1083_v9 = vpack.c.bf16 %v1058_v51, %v1057_v29  ;;  %v2557_v29 = vmul.f32 %v2461_v17, %v10426_v39  ;;  %v10427_v51 = vld [vmem:[#allocation57_spill] sm:$0xff] }
 0x181   : > { %v1084_v32 = vpack.c.bf16 %v1060_v42, %v1059_v54  ;;  %v10428_v42 = vld [vmem:[#allocation47_spill] sm:$0xff] }
 0x185   : > { %5873 = vmatmul.mubr.msk.bf16.gmra.mrb[20].mxu1 %vm730_vm2, %v1077_v25  ;;  %v10418_v25 = vld [vmem:[#allocation65_spill] sm:$0xff] }
 0x186   : > { %5876 = vmatprep.mubr.msk.bf16.mxu1 %vm730_vm2, %v1078_v26  ;;  %v1028_v41 = vsub.f32 %v10418_v25, %v7474_v37  ;;  %v10419_v26 = vld [vmem:[#allocation66_spill] sm:$0xff]  ;;  %v1519_v25 = vrot.slane %v7663_v2, 1 }
 0x187   : > { %v1029_v31 = vsub.f32 %v10419_v26, %v7474_v37 }
 0x188   : > { %v1062_v22 = vmul.f32 %v7595_v62, %v1028_v41  ;;  %v1520_v41 = vrot.slane %v7668_v7, 1 }
 0x189   : > { %v1063_v59 = vmul.f32 %v7595_v62, %v1029_v31  ;;  %v2467_v31 = vld [vmem:[%s10192_s8 + $0x100] sm:$0xff] }
 0x18a   : > { %v1085_v47 = vpack.c.bf16 %v1062_v22, %v1061_v8  ;;  %v7804_v8 = vsel %vm1536_vm0, %v1518_v21, %v1519_v25  ;;  %v2473_v22 = vld [vmem:[%s10192_s8 + $0x130] sm:$0xff]  ;;  %v7831_v17 = vsel %vm1536_vm0, %v1520_v41, %v1521_v36 }
 0x18b   : > { %v2569_v21 = vmul.f32 %v2473_v22, %v7804_v8 }
 0x18d   : > { %5877 = vmatmul.mubr.msk.bf16.gmra.mrb[24].mxu1 %vm730_vm2, %v1079_v44  ;;  %v1064_v44 = vmul.f32 %v7595_v62, %v1030_v49  ;;  %v2464_v62 = vld [vmem:[%s10192_s8 + $0xe8] sm:$0xff]  ;;  %v7798_v49 = vsel %vm1536_vm0, %v1519_v25, %v1520_v41  ;;  %v1525_v41 = vrot.slane %v7699_v52, 1 }
 0x18e   : > { %5880 = vmatprep.mubr.msk.bf16.mxu1 %vm730_vm2, %v1080_v6  ;;  %v2560_v54 = vmul.f32 %v2464_v62, %v10427_v51  ;;  %v2479_v62 = vld [vmem:[%s10192_s8 + $0x160] sm:$0xff] }
 0x18f   : > { %v1086_v6 = vpack.c.bf16 %v1064_v44, %v1063_v59  ;;  %v2476_v59 = vld [vmem:[%s10192_s8 + $0x148] sm:$0xff] }
 0x190   : > { %v10431_v44 = vld [vmem:[#allocation59_spill] sm:$0xff] }
 0x195   : > { %5881 = vmatmul.mubr.msk.bf16.gmra.mrb[28].mxu1 %vm730_vm2, %v1081_v45  ;;  %v2536_v45 = vmul.f32 %v2440_v40, %v10422_v28  ;;  %v2572_v40 = vmul.f32 %v2476_v59, %v7798_v49  ;;  %v1524_v28 = vrot.slane %v7694_v56, 1 }
 0x196   : > { %5884 = vmatprep.mubr.msk.bf16.mxu1 %vm730_vm2, %v1082_v50  ;;  %v10424_v50 = vld [vmem:[#allocation42_spill] sm:$0xff] }
 0x197   : > { %v2629_v37 = vpack.c.bf16 %v2536_v45, %v2533_v34  ;;  %v10425_v10 = vpack.c.bf16 %v10423_v60, %v10424_v50  ;;  %v1523_v34 = vrot.slane %v7689_v5, 1  ;;  %v2482_v60 = vld [vmem:[%s10192_s8 + $0x178] sm:$0xff] }
 0x199   : > { %v7841_v50 = vsel %vm1536_vm0, %v1523_v34, %v1524_v28 }
 0x19d   : > { %5885 = vmatmul.mubr.msk.bf16.gmra.mrb[32].mxu1 %vm730_vm2, %v1083_v9  ;;  %v10429_v9 = vld [vmem:[#allocation46_spill] sm:$0xff] }
 0x19e   : > { %5888 = vmatprep.mubr.msk.bf16.mxu1 %vm730_vm2, %v1084_v32  ;;  %v10430_v4 = vpack.c.bf16 %v10428_v42, %v10429_v9  ;;  %v2641_v32 = vpack.c.bf16 %v2560_v54, %v2557_v29  ;;  %v2485_v29 = vld [vmem:[%s10192_s8 + $0x190] sm:$0xff]  ;;  %v2488_v54 = vld [vmem:[%s10192_s8 + $0x1a8] sm:$0xff]  ;;  %v2575_v42 = vmul.f32 %v2479_v62, %v7831_v17  ;;  %v1530_v62 = vrot.slane %v7730_v46, 1  ;;  %v2503_v46 = vld [vmem:[%s10192_s8 + $0x220] sm:$0xff] }
 0x19f   : > { %v2584_v25 = vmul.f32 %v2488_v54, %v7841_v50 }
 0x1a5   : > { %5889 = vmatmul.mubr.msk.bf16.gmra.mrb[36].mxu1 %vm730_vm2, %v1085_v47  ;;  %v10432_v47 = vld [vmem:[#allocation58_spill] sm:$0xff] }
 0x1a6   : > { %5892 = vmatprep.mubr.msk.bf16.mxu1 %vm730_vm2, %v1086_v6  ;;  %v10433_v0 = vpack.c.bf16 %v10431_v44, %v10432_v47  ;;  %v10434_v6 = vld [vmem:[#allocation64_spill] sm:$0xff]  ;;  %v7869_v47 = vsel %vm1536_vm0, %v1524_v28, %v1525_v41 }
 0x1a7   : > { %v2563_v15 = vmul.f32 %v2467_v31, %v10434_v6  ;;  %v1527_v31 = vrot.slane %v7715_v30, 1  ;;  %10435 = vst [vmem:[#allocation70_spill] sm:$0xff] %v7869_v47 }
 0x1a9   : > { %v2644_v45 = vpack.c.bf16 %v2566_v12, %v2563_v15  ;;  %v2494_v15 = vld [vmem:[%s10192_s8 + $0x1d8] sm:$0xff]  ;;  %v7879_v12 = vsel %vm1536_vm0, %v1527_v31, %v1528_v23 }
 0x1aa   : > { %10436 = vst [vmem:[#allocation65_spill] sm:$0xff] %v7879_v12 }
 0x1ad   : > { %5893 = vmatmul.mubr.msk.bf16.gmra.mrb[40].mxu1 %vm730_vm2, %v1087_v48  ;;  %v2647_v48 = vpack.c.bf16 %v2572_v40, %v2569_v21  ;;  %v2497_v40 = vld [vmem:[%s10192_s8 + $0x1f0] sm:$0xff] }
 0x1ae   : > { %5900 = vmatprep.mubr.msk.bf16.mxu1 %vm730_vm2, %v2629_v37  ;;  %v7827_v37 = vsel %vm1536_vm0, %v1521_v36, %v1522_v63  ;;  %v2500_v36 = vld [vmem:[%s10192_s8 + $0x208] sm:$0xff] }
 0x1af   : > { %v2578_v9 = vmul.f32 %v2482_v60, %v7827_v37  ;;  %v1531_v60 = vrot.slane %v7741_v1, 1 }
 0x1b1   : > { %v2650_v22 = vpack.c.bf16 %v2578_v9, %v2575_v42 }
 0x1b5   : > { %5901 = vmatmul.mubr.msk.bf16.vlgmr.msra.gmra.mrb[44].mxu1 %vm730_vm2, %v10425_v10  ;;  %v7845_v10 = vsel %vm1536_vm0, %v1522_v63, %v1523_v34 }
 0x1b6   : > { %5904 = vmatprep.mubr.msk.bf16.mxu1 %vm730_vm2, %v10430_v4  ;;  %v2581_v4 = vmul.f32 %v2485_v29, %v7845_v10  ;;  %v7901_v29 = vld [vmem:[%s6418_s18 + $0xe0] sm:$0xff] }
 0x1b7   : > { %10438 = vst [vmem:[#allocation41_spill] sm:$0xff] %v7901_v29  ;;  %v1532_v54 = vrot.slane %v7901_v29, 1 }
 0x1b8   : > { %v2653_v59 = vpack.c.bf16 %v2584_v25, %v2581_v4 }
 0x1bd   : > { %5905 = vmatmul.mubr.msk.bf16.gmra.mrb[48].mxu1 %vm730_vm2, %v10433_v0  ;;  %v2491_v0 = vld [vmem:[%s10192_s8 + $0x1c0] sm:$0xff] }
 0x1be   : > { %5908 = vmatprep.mubr.msk.bf16.mxu1 %vm730_vm2, %v2641_v32  ;;  %v1526_v32 = vrot.slane %v7704_v43, 1  ;;  %v2587_v63 = vmul.f32 %v2491_v0, %v7869_v47  ;;  %v10458_v43 = vld [vmem:[#allocation53_spill] sm:$0xff] }
 0x1c0   : > { %v7865_v44 = vsel %vm1536_vm0, %v1525_v41, %v1526_v32  ;;  %v7883_v21 = vsel %vm1536_vm0, %v1526_v32, %v1527_v31  ;;  %v2506_v41 = vld [vmem:[%s10192_s8 + $0x238] sm:$0xff]  ;;  %v7920_v32 = vsel %vm1536_vm0, %v1531_v60, %v1532_v54  ;;  %v7924_v31 = vsel %vm1536_vm0, %v1530_v62, %v1531_v60 }
 0x1c1   : > { %10437 = vst [vmem:[#allocation69_spill] sm:$0xff] %v7883_v21  ;;  %v2590_v34 = vmul.f32 %v2494_v15, %v7865_v44  ;;  %v2593_v28 = vmul.f32 %v2497_v40, %v7883_v21  ;;  %10441 = vst [vmem:[#allocation42_spill] sm:$0xff] %v7920_v32  ;;  %v7936_v15 = vld [vmem:[%s6418_s18 + $0xe8] sm:$0xff] }
 0x1c2   : > { %10442 = vst [vmem:[#allocation56_spill] sm:$0xff] %v7924_v31  ;;  %10443 = vst [vmem:[#allocation57_spill] sm:$0xff] %v7936_v15  ;;  %v1533_v40 = vrot.slane %v7936_v15, 1 }
 0x1c3   : > { %v2656_v42 = vpack.c.bf16 %v2590_v34, %v2587_v63 }
 0x1c4   : > { %v7950_v60 = vsel %vm1536_vm0, %v1532_v54, %v1533_v40 }
 0x1c5   : > { %5909 = vmatmul.mubr.msk.bf16.gmra.mrb[52].mxu1 %vm730_vm2, %v2644_v45  ;;  %v2596_v45 = vmul.f32 %v2500_v36, %v7879_v12  ;;  %10447 = vst [vmem:[#allocation46_spill] sm:$0xff] %v7950_v60 }
 0x1c6   : > { %5912 = vmatprep.mubr.msk.bf16.mxu1 %vm730_vm2, %v2647_v48  ;;  %v1529_v48 = vrot.slane %v7725_v19, 1 }
 0x1c7   : > { %v2659_v9 = vpack.c.bf16 %v2596_v45, %v2593_v28  ;;  %v10444_v28 = vld [vmem:[#allocation27_spill] sm:$0xff] }
 0x1c8   : > { %v7906_v4 = vsel %vm1536_vm0, %v1529_v48, %v1530_v62  ;;  %v7910_v25 = vsel %vm1536_vm0, %v1528_v23, %v1529_v48  ;;  %v2509_v23 = vld [vmem:[%s10192_s8 + $0x250] sm:$0xff]  ;;  %v10445_v45 = vrot.slane %v10444_v28, 1  ;;  %v10450_v28 = vld [vmem:[#allocation33_spill] sm:$0xff] }
 0x1c9   : > { %10439 = vst [vmem:[#allocation40_spill] sm:$0xff] %v7906_v4  ;;  %10440 = vst [vmem:[#allocation43_spill] sm:$0xff] %v7910_v25  ;;  %v2602_v0 = vmul.f32 %v2506_v41, %v7906_v4  ;;  %v2605_v36 = vmul.f32 %v2509_v23, %v7924_v31  ;;  %v2521_v41 = vld [vmem:[%s10192_s8 + $0x2b0] sm:$0xff] }
 0x1ca   : > { %v7946_v48 = vsel %vm1536_vm0, %v1533_v40, %v10445_v45  ;;  %v10451_v45 = vld [vmem:[#allocation35_spill] sm:$0xff] }
 0x1cb   : > { %10446 = vst [vmem:[#allocation47_spill] sm:$0xff] %v7946_v48  ;;  %v10452_v15 = vpack.c.bf16 %v10450_v28, %v10451_v45 }
 0x1cd   : > { %5913 = vmatmul.mubr.msk.bf16.gmra.mrb[56].mxu1 %vm730_vm2, %v2650_v22  ;;  %v2512_v22 = vld [vmem:[%s10192_s8 + $0x268] sm:$0xff] }
 0x1ce   : > { %5916 = vmatprep.mubr.msk.bf16.mxu1 %vm730_vm2, %v2653_v59  ;;  %v2599_v59 = vmul.f32 %v2503_v46, %v7910_v25  ;;  %v2608_v63 = vmul.f32 %v2512_v22, %v7920_v32  ;;  %v2524_v46 = vld [vmem:[%s10192_s8 + $0x2c8] sm:$0xff]  ;;  %v10448_v22 = vld [vmem:[#allocation36_spill] sm:$0xff] }
 0x1d0   : > { %v2662_v34 = vpack.c.bf16 %v2602_v0, %v2599_v59  ;;  %v2665_v62 = vpack.c.bf16 %v2608_v63, %v2605_v36  ;;  %v2620_v59 = vmul.f32 %v2524_v46, %v10448_v22  ;;  %v10449_v0 = vld [vmem:[#allocation37_spill] sm:$0xff] }
 0x1d1   : > { %v2617_v40 = vmul.f32 %v2521_v41, %v10449_v0 }
 0x1d3   : > { %v2671_v63 = vpack.c.bf16 %v2620_v59, %v2617_v40 }
 0x1d5   : > { %5917 = vmatmul.mubr.msk.bf16.gmra.mrb[60].mxu1 %vm730_vm2, %v2656_v42  ;;  %v2515_v42 = vld [vmem:[%s10192_s8 + $0x280] sm:$0xff] }
 0x1d6   : > { %5920 = vmatprep.mubr.msk.bf16.mxu1 %vm730_vm2, %v2659_v9  ;;  %v2518_v9 = vld [vmem:[%s10192_s8 + $0x298] sm:$0xff]  ;;  %v2611_v54 = vmul.f32 %v2515_v42, %v7950_v60 }
 0x1d7   : > { %v2614_v23 = vmul.f32 %v2518_v9, %v7946_v48 }
 0x1d9   : > { %v2668_v36 = vpack.c.bf16 %v2614_v23, %v2611_v54 }
 0x1dd   : > { %5921 = vmatmul.mubr.msk.bf16.gmra.mrb[64].mxu1 %vm730_vm2, %v2662_v34 }
 0x1de   : > { %5924 = vmatprep.mubr.msk.bf16.mxu1 %vm730_vm2, %v2665_v62 }
 0x1e5   : > { %5925 = vmatmul.mubr.msk.bf16.gmra.mrb[68].mxu1 %vm730_vm2, %v2668_v36 }
 0x1e6   : > { %5928 = vmatprep.mubr.msk.bf16.mxu1 %vm730_vm2, %v2671_v63 }
 0x1ed   : > { %5929 = vmatmul.mubr.msk.bf16.gmra.mrb[72].mxu1 %vm730_vm2, %v10452_v15 }
 0x1f3   : > { %v5572_v34 = vpop.f32.mrb[24].mxu0 }
 0x1f4   : > { %v5573_v42 = vpop.f32.mrb[25].mxu0 }
 0x1f5   : > { %v7976_v9 = vadd.f32 %v5573_v42, %v5572_v34  ;;  %v5575_v46 = vpop.f32.mrb[26].mxu0 }
 0x1f6   : > { %v5576_v22 = vpop.f32.mrb[27].mxu0 }
 0x1f7   : > { %v7978_v41 = vadd.f32 %v5576_v22, %v5575_v46 }
 0x1fb   : > { %v5578_v62 = vpop.f32.mrb[28].mxu0 }
 0x1fc   : > { %v5579_v54 = vpop.f32.mrb[29].mxu0 }
 0x1fd   : > { %v7980_v23 = vadd.f32 %v5579_v54, %v5578_v62  ;;  %v5581_v59 = vpop.f32.mrb[30].mxu0 }
 0x1fe   : > { %v5582_v40 = vpop.f32.mrb[31].mxu0 }
 0x1ff   : > { %v7982_v36 = vadd.f32 %v5582_v40, %v5581_v59 }
 0x203   : > { %v5584_v63 = vpop.f32.mrb[32].mxu0 }
 0x204   : > { %v5585_v28 = vpop.f32.mrb[33].mxu0 }
 0x205   : > { %v7984_v45 = vadd.f32 %v5585_v28, %v5584_v63  ;;  %v5587_v15 = vpop.f32.mrb[34].mxu0 }
 0x206   : > { %v5588_v34 = vpop.f32.mrb[35].mxu0 }
 0x207   : > { %v7986_v42 = vadd.f32 %v5588_v34, %v5587_v15  ;;  %v5373_v15 = vld [vmem:[%s485_s30] ss:$0 sm:$0xff] }
 0x20b   : > { %v5590_v0 = vpop.f32.mrb[36].mxu0 }
 0x20c   : > { %v5591_v22 = vpop.f32.mrb[37].mxu0 }
 0x20d   : > { %v7988_v46 = vadd.f32 %v5591_v22, %v5590_v0  ;;  %v5593_v60 = vpop.f32.mrb[38].mxu0 }
 0x20e   : > { %v5594_v62 = vpop.f32.mrb[39].mxu0 }
 0x20f   : > { %v7990_v54 = vadd.f32 %v5594_v62, %v5593_v60 }
 0x220   : > { %v5596_v48 = vpop.f32.mrb[40].mxu0 }
 0x221   : > { %v5597_v59 = vpop.f32.mrb[41].mxu0 }
 0x222   : > { %v7992_v40 = vadd.f32 %v5597_v59, %v5596_v48  ;;  %v5599_v26 = vpop.f32.mrb[42].mxu0 }
 0x223   : > { %v5600_v63 = vpop.f32.mrb[43].mxu0 }
 0x224   : > { %v7994_v28 = vadd.f32 %v5600_v63, %v5599_v26 }
 0x230   : > { %v5854_v34 = vpop.f32.mrb[0].mxu1 }
 0x231   : > { %v1387_v0 = vadd.f32 %v5854_v34, %v5373_v15  ;;  %v1204_v22 = vpop.f32.mrb[1].mxu1 }
 0x232   : > { %v5855_v31 = vpop.f32.mrb[2].mxu1  ;;  %v1385_v62 = vadd.f32 %v5373_v15, %v1204_v22 }
 0x233   : > { %v1388_v29 = vadd.f32 %v5855_v31, %v5373_v15  ;;  %v1207_v60 = vpop.f32.mrb[3].mxu1 }
 0x234   : > { %v1386_v32 = vadd.f32 %v5373_v15, %v1207_v60 }
 0x235   : > { %v8000_v25 = vpack.c.bf16 %v1388_v29, %v1387_v0 }
 0x236   : > { %v8002_v48 = vpack.c.bf16 %v1386_v32, %v1385_v62 }
 0x237   : > { %10453 = vst [vmem:[#allocation59_spill] sm:$0xff] %v8000_v25  ;;  %v5602_v26 = vpop.f32.mrb[44].mxu0 }
 0x238   : > { %10454 = vst [vmem:[#allocation58_spill] sm:$0xff] %v8002_v48  ;;  %v5858_v59 = vpop.f32.mrb[4].mxu1  ;;  %5702 = vmatprep.mubr.msk.bf16.mxu1 %vm730_vm2, %v8002_v48  ;;  %v5603_v4 = vpop.f32.mrb[45].mxu0 }
 0x239   : > { %v1391_v63 = vadd.f32 %v5858_v59, %v5373_v15  ;;  %v1220_v1 = vpop.f32.mrb[5].mxu1  ;;  %v8006_v19 = vadd.f32 %v5603_v4, %v5602_v26  ;;  %v5605_v31 = vpop.f32.mrb[46].mxu0 }
 0x23a   : > { %v1389_v21 = vadd.f32 %v5373_v15, %v1220_v1  ;;  %v5859_v34 = vpop.f32.mrb[6].mxu1  ;;  %v5606_v60 = vpop.f32.mrb[47].mxu0 }
 0x23b   : > { %v1392_v38 = vadd.f32 %v5859_v34, %v5373_v15  ;;  %v1223_v22 = vpop.f32.mrb[7].mxu1  ;;  %v8008_v0 = vadd.f32 %v5606_v60, %v5605_v31 }
 0x23c   : > { %v1390_v29 = vadd.f32 %v5373_v15, %v1223_v22 }
 0x23d   : > { %v8010_v32 = vpack.c.bf16 %v1392_v38, %v1391_v63 }
 0x23e   : > { %v8012_v62 = vpack.c.bf16 %v1390_v29, %v1389_v21  ;;  %v1451_v21 = vrot.slane %v7652_v16, 7 }
 0x23f   : > { %10455 = vst [vmem:[#allocation64_spill] sm:$0xff] %v8010_v32 }
 0x240   : > { %v5862_v25 = vpop.f32.mrb[8].mxu1 }
 0x241   : > { %v8014_v48 = vadd.f32 %v5862_v25, %v5373_v15  ;;  %v1236_v59 = vpop.f32.mrb[9].mxu1  ;;  %v10316_v25 = vrot.slane %v7663_v2, 7 }
 0x242   : > { %v1393_v12 = vadd.f32 %v5373_v15, %v1236_v59  ;;  %v5863_v1 = vpop.f32.mrb[10].mxu1 }
 0x243   : > { %10456 = vst [vmem:[#allocation27_spill] sm:$0xff] %v8014_v48  ;;  %v1239_v47 = vpop.f32.mrb[11].mxu1  ;;  %v1405_v22 = vadd.f32 %v5863_v1, %v10458_v43 }
 0x244   : > { %v1394_v4 = vadd.f32 %v5373_v15, %v1239_v47 }
 0x246   : > { %v8016_v26 = vpack.c.bf16 %v1394_v4, %v1393_v12 }
 0x248   : > { %10457 = vst [vmem:[#allocation33_spill] sm:$0xff] %v8016_v26  ;;  %v5866_v34 = vpop.f32.mrb[12].mxu1 }
 0x249   : > { %v1252_v30 = vpop.f32.mrb[13].mxu1  ;;  %v1408_v60 = vadd.f32 %v5866_v34, %v10458_v43 }
 0x24a   : > { %v1406_v31 = vadd.f32 %v10458_v43, %v1252_v30  ;;  %v5867_v38 = vpop.f32.mrb[14].mxu1  ;;  %v8031_v30 = vsel %vm1471_vm1, %v1451_v21, %v10316_v25 }
 0x24b   : > { %v1255_v63 = vpop.f32.mrb[15].mxu1  ;;  %v1409_v1 = vadd.f32 %v5867_v38, %v10458_v43 }
 0x24c   : > { %v3200_v29 = vpack.c.bf16 %v1406_v31, %v1405_v22  ;;  %v1407_v59 = vadd.f32 %v10458_v43, %v1255_v63 }
 0x24e   : > { %v3201_v47 = vpack.c.bf16 %v1408_v60, %v1407_v59  ;;  %3232 = vrot.lane.b32.xlu0 %v3200_v29, %s6239_s28 }
 0x250   : > { %3234 = vrot.lane.b32.xlu1 %v3201_v47, %s6239_s28  ;;  %v5870_v12 = vpop.f32.mrb[16].mxu1 }
 0x251   : > { %v1268_v15 = vpop.f32.mrb[17].mxu1  ;;  %v1412_v31 = vadd.f32 %v5870_v12, %v10458_v43 }
 0x252   : > { %v1410_v4 = vadd.f32 %v10458_v43, %v1268_v15  ;;  %2075 = vrot.lane.b32.xlu0 %v8031_v30, %s6238_s27  ;;  %v5871_v34 = vpop.f32.mrb[18].mxu1 }
 0x253   : > { %v1271_v22 = vpop.f32.mrb[19].mxu1  ;;  %v1413_v47 = vadd.f32 %v5871_v34, %v10458_v43 }
 0x254   : > { %v3202_v63 = vpack.c.bf16 %v1410_v4, %v1409_v1  ;;  %v1411_v60 = vadd.f32 %v10458_v43, %v1271_v22 }
 0x256   : > { %v3203_v29 = vpack.c.bf16 %v1412_v31, %v1411_v60  ;;  %1755 = vrot.lane.b32.xlu0 %v10427_v51, %s6238_s27  ;;  %3236 = vrot.lane.b32.xlu1 %v3202_v63, %s6239_s28  ;;  %v10459_v63 = vld [vmem:[#allocation61_spill] sm:$0xff] }
 0x258   : > { %v5874_v59 = vpop.f32.mrb[20].mxu1 }
 0x259   : > { %v1284_v38 = vpop.f32.mrb[21].mxu1  ;;  %v1416_v4 = vadd.f32 %v5874_v59, %v10458_v43 }
 0x25a   : > { %v1414_v15 = vadd.f32 %v10458_v43, %v1284_v38  ;;  %2171 = vrot.lane.b32.xlu0 %v7663_v2, %s6239_s28  ;;  %3238 = vrot.lane.b32.xlu1 %v3203_v29, %s6239_s28  ;;  %v5875_v12 = vpop.f32.mrb[22].mxu1 }
 0x25b   : > { %v1287_v1 = vpop.f32.mrb[23].mxu1  ;;  %v1417_v38 = vadd.f32 %v5875_v12, %v10458_v43 }
 0x25c   : > { %v3204_v22 = vpack.c.bf16 %v1414_v15, %v1413_v47  ;;  %v1415_v51 = vadd.f32 %v10458_v43, %v1287_v1  ;;  %v10318_v47 = vrot.slane %v7668_v7, 7  ;;  %v10317_v15 = vrot.slane %v7673_v57, 7 }
 0x25e   : > { %v3205_v31 = vpack.c.bf16 %v1416_v4, %v1415_v51  ;;  %1883 = vrot.lane.b32.xlu0 %v10459_v63, %s6239_s28  ;;  %3240 = vrot.lane.b32.xlu1 %v3204_v22, %s6239_s28  ;;  %v8071_v12 = vsel %vm1471_vm1, %v10318_v47, %v10317_v15 }
 0x260   : > { %v5878_v34 = vpop.f32.mrb[24].mxu1 }
 0x261   : > { %v1300_v60 = vpop.f32.mrb[25].mxu1  ;;  %v1420_v1 = vadd.f32 %v5878_v34, %v10458_v43 }
 0x262   : > { %v1418_v25 = vadd.f32 %v10458_v43, %v1300_v60  ;;  %1983 = vrot.lane.b32.xlu0 %v7798_v49, %s6237_s25  ;;  %3242 = vrot.lane.b32.xlu1 %v3205_v31, %s6239_s28  ;;  %v5879_v29 = vpop.f32.mrb[26].mxu1 }
 0x263   : > { %v1303_v59 = vpop.f32.mrb[27].mxu1 }
 0x264   : > { %v3206_v4 = vpack.c.bf16 %v1418_v25, %v1417_v38  ;;  %v1419_v22 = vadd.f32 %v10458_v43, %v1303_v59  ;;  %v1421_v25 = vadd.f32 %v5879_v29, %v10458_v43  ;;  %v10460_v29 = vrot.slane %v10407_v53, 7 }
 0x266   : > { %v3207_v51 = vpack.c.bf16 %v1420_v1, %v1419_v22  ;;  %1631 = vrot.lane.b32.xlu0 %v7647_v27, %s6237_s25  ;;  %3244 = vrot.lane.b32.xlu1 %v3206_v4, %s6239_s28 }
 0x268   : > { %v5882_v31 = vpop.f32.mrb[28].mxu1 }
 0x269   : > { %v1316_v60 = vpop.f32.mrb[29].mxu1  ;;  %v1424_v1 = vadd.f32 %v5882_v31, %v10458_v43 }
 0x26a   : > { %v1422_v34 = vadd.f32 %v10458_v43, %v1316_v60  ;;  %2079 = vrot.lane.b32.xlu0 %v8071_v12, %s6238_s27  ;;  %3246 = vrot.lane.b32.xlu1 %v3207_v51, %s6239_s28  ;;  %v5883_v38 = vpop.f32.mrb[30].mxu1  ;;  %v8089_v51 = vsel %vm1471_vm1, %v10460_v29, %v1451_v21 }
 0x26b   : > { %v1319_v59 = vpop.f32.mrb[31].mxu1  ;;  %v1425_v31 = vadd.f32 %v5883_v38, %v10458_v43 }
 0x26c   : > { %v3208_v4 = vpack.c.bf16 %v1422_v34, %v1421_v25  ;;  %v1423_v22 = vadd.f32 %v10458_v43, %v1319_v59 }
 0x26e   : > { %v3209_v15 = vpack.c.bf16 %v1424_v1, %v1423_v22  ;;  %1759 = vrot.lane.b32.xlu0 %v7492_v58, %s6238_s27  ;;  %3248 = vrot.lane.b32.xlu1 %v3208_v4, %s6239_s28 }
 0x270   : > { %v5886_v60 = vpop.f32.mrb[32].mxu1 }
 0x271   : > { %v1332_v47 = vpop.f32.mrb[33].mxu1  ;;  %v1428_v59 = vadd.f32 %v5886_v60, %v10458_v43 }
 0x272   : > { %v1426_v25 = vadd.f32 %v10458_v43, %v1332_v47  ;;  %2073 = vrot.lane.b32.xlu1 %v8089_v51, %s6238_s27  ;;  %3250 = vrot.lane.b32.xlu0 %v3209_v15, %s6239_s28  ;;  %v5887_v58 = vpop.f32.mrb[34].mxu1 }
 0x273   : > { %v1335_v34 = vpop.f32.mrb[35].mxu1  ;;  %v1429_v4 = vadd.f32 %v5887_v58, %v10458_v43 }
 0x274   : > { %v3210_v53 = vpack.c.bf16 %v1426_v25, %v1425_v31  ;;  %v1427_v1 = vadd.f32 %v10458_v43, %v1335_v34  ;;  %v10461_v34 = vld [vmem:[#allocation60_spill] sm:$0xff] }
 0x276   : > { %v3211_v21 = vpack.c.bf16 %v1428_v59, %v1427_v1  ;;  %1753 = vrot.lane.b32.xlu1 %v10426_v39, %s6238_s27  ;;  %2175 = vrot.lane.b32.xlu0 %v7673_v57, %s6239_s28 }
 0x278   : > { %v5890_v47 = vpop.f32.mrb[36].mxu1 }
 0x279   : > { %v1348_v38 = vpop.f32.mrb[37].mxu1  ;;  %v1432_v60 = vadd.f32 %v5890_v47, %v10458_v43 }
 0x27a   : > { %v1430_v15 = vadd.f32 %v10458_v43, %v1348_v38  ;;  %2169 = vrot.lane.b32.xlu1 %v7652_v16, %s6239_s28  ;;  %3252 = vrot.lane.b32.xlu0 %v3210_v53, %s6239_s28  ;;  %v5891_v22 = vpop.f32.mrb[38].mxu1  ;;  %v5375_v38 = vld [vmem:[%s10191_s7 + $0x1] ss:$0 sm:$0xff] }
 0x27b   : > { %v1351_v29 = vpop.f32.mrb[39].mxu1  ;;  %v8114_v1 = vadd.f32 %v5891_v22, %v10458_v43 }
 0x27c   : > { %v3212_v31 = vpack.c.bf16 %v1430_v15, %v1429_v4  ;;  %v1431_v39 = vadd.f32 %v10458_v43, %v1351_v29 }
 0x27e   : > { %v3213_v25 = vpack.c.bf16 %v1432_v60, %v1431_v39  ;;  %1881 = vrot.lane.b32.xlu1 %v10461_v34, %s6239_s28  ;;  %1887 = vrot.lane.b32.xlu0 %v8031_v30, %s6239_s28  ;;  %v2915_v60 = vadd.f32 %v7980_v23, %v5375_v38  ;;  %v2907_v39 = vadd.f32 %v7976_v9, %v5375_v38 }
 0x27f   : > { %v2918_v23 = vadd.f32 %v7982_v36, %v5375_v38 }
 0x280   : > { %v5894_v58 = vpop.f32.mrb[40].mxu1 }
 0x281   : > { %v1364_v59 = vpop.f32.mrb[41].mxu1  ;;  %v8126_v15 = vadd.f32 %v5894_v58, %v10458_v43  ;;  %v10462_v58 = vrot.slane %v7668_v7, 7 }
 0x282   : > { %v8117_v53 = vadd.f32 %v10458_v43, %v1364_v59  ;;  %1981 = vrot.lane.b32.xlu1 %v7804_v8, %s6237_s25  ;;  %3254 = vrot.lane.b32.xlu0 %v3211_v21, %s6239_s28  ;;  %v5895_v47 = vpop.f32.mrb[42].mxu1  ;;  %v10463_v59 = vrot.slane %v7663_v2, 7 }
 0x283   : > { %v1367_v4 = vpop.f32.mrb[43].mxu1 }
 0x284   : > { %v3214_v22 = vpack.c.bf16 %v8117_v53, %v8114_v1  ;;  %v8131_v29 = vadd.f32 %v10458_v43, %v1367_v4  ;;  %v8147_v43 = vsel %vm1471_vm1, %v10463_v59, %v10462_v58  ;;  %v2910_v53 = vadd.f32 %v7978_v41, %v5375_v38 }
 0x285   : > { %v2931_v41 = vadd.f32 %v7988_v46, %v5375_v38  ;;  %v1456_v46 = vrot.slane %v7689_v5, 7 }
 0x286   : > { %1629 = vrot.lane.b32.xlu1 %v7642_v61, %s6237_s25  ;;  %1987 = vrot.lane.b32.xlu0 %v7827_v37, %s6237_s25 }
 0x288   : > { %v5902_v1 = vpop.f32.mrb[44].mxu1 }
 0x289   : > { %v3076_v47 = vadd.f32 %v5902_v1, %v2915_v60  ;;  %v3067_v4 = vpop.f32.mrb[45].mxu1  ;;  %v2923_v60 = vadd.f32 %v7984_v45, %v5375_v38  ;;  %v1455_v45 = vrot.slane %v7678_v55, 7 }
 0x28a   : > { %v3068_v21 = vadd.f32 %v3067_v4, %v2907_v39  ;;  %2077 = vrot.lane.b32.xlu1 %v8147_v43, %s6238_s27  ;;  %3256 = vrot.lane.b32.xlu0 %v3212_v31, %s6239_s28  ;;  %v5903_v9 = vpop.f32.mrb[46].mxu1  ;;  %v10464_v39 = vld [vmem:[#allocation62_spill] sm:$0xff] }
 0x28b   : > { %v3079_v48 = vadd.f32 %v5903_v9, %v2918_v23  ;;  %v3070_v26 = vpop.f32.mrb[47].mxu1  ;;  %v8156_v58 = vsel %vm730_vm2, %v3076_v47, %v7111_v33  ;;  %v8193_v9 = vpop.permute.xlu1 %1977 }
 0x28c   : > { %v3071_v32 = vadd.f32 %v3070_v26, %v2910_v53  ;;  %v8166_v59 = vsel %vm730_vm2, %v3068_v21, %v10464_v39  ;;  %v10465_v26 = vld [vmem:[#allocation63_spill] sm:$0xff]  ;;  %v2926_v21 = vadd.f32 %v7986_v42, %v5375_v38 }
 0x28d   : > { %v8160_v36 = vsel %vm730_vm2, %v3079_v48, %v7113_v24  ;;  %v2934_v24 = vadd.f32 %v7990_v54, %v5375_v38  ;;  %v8191_v54 = vsel %vm1471_vm1, %v1455_v45, %v1456_v46 }
 0x28e   : > { %v8172_v23 = vsel %vm730_vm2, %v3071_v32, %v10465_v26  ;;  %1757 = vrot.lane.b32.xlu1 %v10434_v6, %s6238_s27  ;;  %1635 = vrot.lane.b32.xlu0 %v7663_v2, %s6237_s25  ;;  %v10480_v26 = vld [vmem:[#allocation69_spill] sm:$0xff] }
 0x290   : > { %v5906_v48 = vpop.f32.mrb[48].mxu1 }
 0x291   : > { %v3092_v32 = vadd.f32 %v5906_v48, %v2931_v41  ;;  %v3083_v1 = vpop.f32.mrb[49].mxu1 }
 0x292   : > { %v3084_v53 = vadd.f32 %v3083_v1, %v2923_v60  ;;  %2173 = vrot.lane.b32.xlu1 %v7668_v7, %s6239_s28  ;;  %3258 = vrot.lane.b32.xlu0 %v3213_v25, %s6239_s28  ;;  %v5907_v2 = vpop.f32.mrb[50].mxu1  ;;  %v2939_v25 = vadd.f32 %v7992_v40, %v5375_v38  ;;  %v2947_v60 = vadd.f32 %v8006_v19, %v5375_v38  ;;  %v8228_v1 = vpop.permute.xlu1 %1625 }
 0x293   : > { %v3095_v6 = vadd.f32 %v5907_v2, %v2934_v24  ;;  %v3086_v47 = vpop.f32.mrb[51].mxu1  ;;  %v8197_v42 = vsel %vm730_vm2, %v3092_v32, %v7465_v20  ;;  %v8219_v20 = vpop.permute.xlu0 %1979  ;;  %v2942_v40 = vadd.f32 %v7994_v28, %v5375_v38 }
 0x294   : > { %v3087_v4 = vadd.f32 %v3086_v47, %v2926_v21  ;;  %10466 = vst [vmem:[#allocation35_spill] sm:$0xff] %v8197_v42  ;;  %v8207_v39 = vsel %vm730_vm2, %v3084_v53, %v7332_v3  ;;  %v2950_v3 = vadd.f32 %v8008_v0, %v5375_v38 }
 0x295   : > { %v8201_v41 = vsel %vm730_vm2, %v3095_v6, %v7467_v18 }
 0x296   : > { %10467 = vst [vmem:[#allocation53_spill] sm:$0xff] %v8201_v41  ;;  %v8213_v24 = vsel %vm730_vm2, %v3087_v4, %v7349_v13  ;;  %1885 = vrot.lane.b32.xlu1 %v8089_v51, %s6239_s28  ;;  %2083 = vrot.lane.b32.xlu0 %v8191_v54, %s6238_s27  ;;  %v10472_v4 = vrot.slane %v7673_v57, 7 }
 0x297   : > { %v8238_v38 = vpop.permute.xlu0 %1627 }
 0x298   : > { %v5910_v19 = vpop.f32.mrb[52].mxu1 }
 0x299   : > { %v3099_v48 = vpop.f32.mrb[53].mxu1  ;;  %v3108_v21 = vadd.f32 %v5910_v19, %v2947_v60 }
 0x29a   : > { %1985 = vrot.lane.b32.xlu1 %v7831_v17, %s6237_s25  ;;  %3260 = vrot.lane.b32.xlu0 %v3214_v22, %s6239_s28  ;;  %v3100_v13 = vadd.f32 %v3099_v48, %v2939_v25  ;;  %v5911_v32 = vpop.f32.mrb[54].mxu1  ;;  %v8258_v25 = vsel %vm1471_vm1, %v10472_v4, %v1455_v45  ;;  %v10475_v45 = vld [vmem:[#allocation50_spill] sm:$0xff] }
 0x29b   : > { %v3102_v53 = vpop.f32.mrb[55].mxu1  ;;  %v3111_v2 = vadd.f32 %v5911_v32, %v2950_v3  ;;  %v8232_v6 = vsel %vm730_vm2, %v3108_v21, %v8228_v1 }
 0x29c   : > { %10468 = vst [vmem:[#allocation61_spill] sm:$0xff] %v8232_v6  ;;  %v8236_v28 = vsel %vm730_vm2, %v3100_v13, %v7551_v11  ;;  %v3103_v0 = vadd.f32 %v3102_v53, %v2942_v40  ;;  %v10476_v40 = vld [vmem:[#allocation70_spill] sm:$0xff]  ;;  %v10479_v11 = vld [vmem:[#allocation48_spill] sm:$0xff] }
 0x29d   : > { %10469 = vst [vmem:[#allocation60_spill] sm:$0xff] %v8236_v28  ;;  %v8242_v22 = vsel %vm730_vm2, %v3111_v2, %v8238_v38  ;;  %v2505_v6 = vld [vmem:[%s10192_s8 + $0x230] sm:$0xff] }
 0x29e   : > { %10470 = vst [vmem:[#allocation62_spill] sm:$0xff] %v8242_v22  ;;  %1633 = vrot.lane.b32.xlu1 %v7652_v16, %s6237_s25  ;;  %1763 = vrot.lane.b32.xlu0 %v7798_v49, %s6238_s27  ;;  %v8250_v47 = vsel %vm730_vm2, %v3103_v0, %v7553_v14  ;;  %v10473_v14 = vpack.c.bf16 %v8126_v15, %v8131_v29  ;;  %v1457_v16 = vrot.slane %v7694_v56, 7  ;;  %v1458_v49 = vrot.slane %v7699_v52, 7 }
 0x29f   : > { %10471 = vst [vmem:[#allocation63_spill] sm:$0xff] %v8250_v47 }
 0x2a0   : > { %v8298_v15 = vsel %vm1471_vm1, %v1456_v46, %v1457_v16  ;;  %v1460_v46 = vrot.slane %v10475_v45, 7 }
 0x2a2   : > { %2081 = vrot.lane.b32.xlu1 %v8258_v25, %s6238_s27  ;;  %3262 = vrot.lane.b32.xlu0 %v10473_v14, %s6239_s28 }
 0x2a6   : > { %1761 = vrot.lane.b32.xlu1 %v7804_v8, %s6238_s27  ;;  %2179 = vrot.lane.b32.xlu0 %v7689_v5, %s6239_s28  ;;  %v8288_v8 = vsel %vm1471_vm1, %v1457_v16, %v1458_v49 }
 0x2aa   : > { %2177 = vrot.lane.b32.xlu1 %v7678_v55, %s6239_s28  ;;  %1891 = vrot.lane.b32.xlu0 %v8071_v12, %s6239_s28 }
 0x2ae   : > { %1889 = vrot.lane.b32.xlu1 %v8147_v43, %s6239_s28  ;;  %1991 = vrot.lane.b32.xlu0 %v7841_v50, %s6237_s25 }
 0x2b2   : > { %1989 = vrot.lane.b32.xlu1 %v7845_v10, %s6237_s25  ;;  %1639 = vrot.lane.b32.xlu0 %v7673_v57, %s6237_s25 }
 0x2b6   : > { %1637 = vrot.lane.b32.xlu1 %v7668_v7, %s6237_s25  ;;  %2087 = vrot.lane.b32.xlu0 %v8288_v8, %s6238_s27 }
 0x2ba   : > { %2085 = vrot.lane.b32.xlu1 %v8298_v15, %s6238_s27  ;;  %1767 = vrot.lane.b32.xlu0 %v7827_v37, %s6238_s27  ;;  %v10474_v37 = vld [vmem:[#allocation44_spill] sm:$0xff] }
 0x2be   : > { %1765 = vrot.lane.b32.xlu1 %v7831_v17, %s6238_s27  ;;  %2183 = vrot.lane.b32.xlu0 %v7699_v52, %s6239_s28  ;;  %v1459_v17 = vrot.slane %v10474_v37, 7 }
 0x2c0   : > { %v3233_v7 = vpop.permute.xlu0 %3232  ;;  %v8326_v48 = vsel %vm1471_vm1, %v1459_v17, %v1460_v46  ;;  %v8336_v32 = vsel %vm1471_vm1, %v1458_v49, %v1459_v17  ;;  %v10478_v17 = vld [vmem:[#allocation45_spill] sm:$0xff] }
 0x2c1   : > { %v3283_v60 = vsel %vm730_vm2, %v3233_v7, 0 }
 0x2c2   : > { %2181 = vrot.lane.b32.xlu1 %v7694_v56, %s6239_s28  ;;  %1895 = vrot.lane.b32.xlu0 %v8191_v54, %s6239_s28  ;;  %v3235_v57 = vpop.permute.xlu1 %3234 }
 0x2c4   : > { %v2076_v29 = vpop.permute.xlu0 %2075 }
 0x2c6   : > { %1893 = vrot.lane.b32.xlu1 %v8258_v25, %s6239_s28  ;;  %1995 = vrot.lane.b32.xlu0 %v7865_v44, %s6237_s25 }
 0x2c8   : > { %v1756_v3 = vpop.permute.xlu0 %1755  ;;  %v8318_v19 = vpop.permute.xlu1 %3236 }
 0x2ca   : > { %1993 = vrot.lane.b32.xlu1 %v10476_v40, %s6237_s25  ;;  %1643 = vrot.lane.b32.xlu0 %v7689_v5, %s6237_s25 }
 0x2cc   : > { %v2172_v21 = vpop.permute.xlu0 %2171  ;;  %v8328_v13 = vpop.permute.xlu1 %3238 }
 0x2ce   : > { %1641 = vrot.lane.b32.xlu1 %v7678_v55, %s6237_s25  ;;  %2091 = vrot.lane.b32.xlu0 %v8326_v48, %s6238_s27 }
 0x2d0   : > { %v1884_v53 = vpop.permute.xlu0 %1883  ;;  %v8338_v2 = vpop.permute.xlu1 %3240 }
 0x2d2   : > { %2089 = vrot.lane.b32.xlu1 %v8336_v32, %s6238_s27  ;;  %1771 = vrot.lane.b32.xlu0 %v7841_v50, %s6238_s27 }
 0x2d4   : > { %v8344_v5 = vpop.permute.xlu0 %1983  ;;  %v8346_v0 = vpop.permute.xlu1 %3242 }
 0x2d6   : > { %1769 = vrot.lane.b32.xlu1 %v7845_v10, %s6238_s27  ;;  %2187 = vrot.lane.b32.xlu0 %v10475_v45, %s6239_s28  ;;  %v10477_v10 = vld [vmem:[#allocation65_spill] sm:$0xff]  ;;  %v1461_v45 = vrot.slane %v10478_v17, 7 }
 0x2d8   : > { %v8352_v55 = vpop.permute.xlu0 %1631  ;;  %v8354_v4 = vpop.permute.xlu1 %3244  ;;  %v8389_v7 = vsel %vm1471_vm1, %v1460_v46, %v1461_v45  ;;  %v2475_v46 = vld [vmem:[%s10192_s8 + $0x140] sm:$0xff] }
 0x2da   : > { %2185 = vrot.lane.b32.xlu1 %v10474_v37, %s6239_s28  ;;  %1899 = vrot.lane.b32.xlu0 %v8288_v8, %s6239_s28  ;;  %v10321_v37 = vrot.slane %v10479_v11, 7 }
 0x2dc   : > { %v8360_v50 = vpop.permute.xlu0 %2079  ;;  %v8362_v14 = vpop.permute.xlu1 %3246  ;;  %v8382_v33 = vsel %vm1471_vm1, %v1461_v45, %v10321_v37  ;;  %v3286_v37 = vsel %vm730_vm2, %v3235_v57, 0 }
 0x2de   : > { %1897 = vrot.lane.b32.xlu1 %v8298_v15, %s6239_s28  ;;  %1999 = vrot.lane.b32.xlu0 %v10477_v10, %s6237_s25 }
 0x2e0   : > { %v8368_v16 = vpop.permute.xlu0 %1759  ;;  %v3249_v49 = vpop.permute.xlu1 %3248 }
 0x2e1   : > { %6008 = vmatprep.subr.msk.bf16.mxu1 %vm730_vm2, %v3249_v49  ;;  %v2352_v49 = vsel %vm730_vm2, %v7647_v27, %v8219_v20  ;;  %v2472_v27 = vld [vmem:[%s10192_s8 + $0x128] sm:$0xff] }
 0x2e2   : > { %1997 = vrot.lane.b32.xlu1 %v10480_v26, %s6237_s25  ;;  %5687 = vmatpush3.bf16.xpose.msra.mxu1 %v3283_v60 }
 0x2e3   : > { %1647 = vrot.lane.b32.xlu0 %v7699_v52, %s6237_s25 }
 0x2e4   : > { %v2074_v18 = vpop.permute.xlu1 %2073  ;;  %v3251_v31 = vpop.permute.xlu0 %3250 }
 0x2e5   : > { %6009 = vmatprep.subr.msk.bf16.mxu1 %vm730_vm2, %v3251_v31  ;;  %v2384_v31 = vsel %vm2273_vm3, %v2352_v49, %v2076_v29 }
 0x2e6   : > { %1645 = vrot.lane.b32.xlu1 %v7694_v56, %s6237_s25  ;;  %v2351_v56 = vsel %vm730_vm2, %v7642_v61, %v8193_v9  ;;  %v2416_v45 = vsel %vm2306_vm4, %v2384_v31, %v2172_v21 }
 0x2e7   : > { %2095 = vrot.lane.b32.xlu0 %v8382_v33, %s6238_s27  ;;  %v2383_v20 = vsel %vm2273_vm3, %v2351_v56, %v2074_v18  ;;  %v2571_v49 = vmul.f32 %v2475_v46, %v2416_v45  ;;  %v2474_v56 = vld [vmem:[%s10192_s8 + $0x138] sm:$0xff] }
 0x2e8   : > { %v1754_v52 = vpop.permute.xlu1 %1753  ;;  %v8393_v60 = vpop.permute.xlu0 %2175 }
 0x2ea   : > { %2093 = vrot.lane.b32.xlu1 %v8389_v7, %s6238_s27  ;;  %5689 = vmatpush3.bf16.xpose.msra.mxu1 %v3286_v37  ;;  %v10481_v37 = vld [vmem:[#allocation52_spill] sm:$0xff] }
 0x2eb   : > { %1775 = vrot.lane.b32.xlu0 %v7865_v44, %s6238_s27  ;;  %v2254_v61 = vsel %vm730_vm2, %v10481_v37, %v8238_v38  ;;  %v10482_v44 = vld [vmem:[#allocation51_spill] sm:$0xff] }
 0x2ec   : > { %v2170_v57 = vpop.permute.xlu1 %2169  ;;  %v3253_v29 = vpop.permute.xlu0 %3252  ;;  %v2287_v21 = vsel %vm2273_vm3, %v2254_v61, %v1756_v3  ;;  %v2253_v18 = vsel %vm730_vm2, %v10482_v44, %v8228_v1  ;;  %v3292_v44 = vsel %vm730_vm2, %v8328_v13, 0  ;;  %v8476_v13 = vld [vmem:[%s6418_s18 + $0xb0] sm:$0xff] }
 0x2ed   : > { %v2415_v9 = vsel %vm2306_vm4, %v2383_v20, %v2170_v57  ;;  %6010 = vmatprep.subr.msk.bf16.mxu1 %vm730_vm2, %v3253_v29  ;;  %v2320_v38 = vsel %vm2306_vm4, %v2287_v21, %v1884_v53  ;;  %v2471_v20 = vld [vmem:[%s10192_s8 + $0x120] sm:$0xff]  ;;  %v2286_v3 = vsel %vm2273_vm3, %v2253_v18, %v1754_v52  ;;  %v10485_v18 = vld [vmem:[#allocation43_spill] sm:$0xff] }
 0x2ee   : > { %v2568_v31 = vmul.f32 %v2472_v27, %v2415_v9  ;;  %1773 = vrot.lane.b32.xlu1 %v10476_v40, %s6238_s27  ;;  %v3289_v27 = vsel %vm730_vm2, %v8318_v19, 0  ;;  %v2570_v53 = vmul.f32 %v2474_v56, %v2320_v38  ;;  %v10483_v19 = vld [vmem:[#allocation40_spill] sm:$0xff]  ;;  %v8464_v56 = vld [vmem:[%s6418_s18 + $0xb8] sm:$0xff] }
 0x2ef   : > { %2191 = vrot.lane.b32.xlu0 %v10479_v11, %s6239_s28  ;;  %v8455_v9 = vld [vmem:[%s6418_s18 + $0xd0] sm:$0xff] }
 0x2f0   : > { %v1882_v40 = vpop.permute.xlu1 %1881  ;;  %v8436_v46 = vpop.permute.xlu0 %1887  ;;  %v2646_v45 = vpack.c.bf16 %v2571_v49, %v2568_v31  ;;  %v1463_v21 = vrot.slane %v8455_v9, 7  ;;  %v10484_v49 = vld [vmem:[#allocation49_spill] sm:$0xff] }
 0x2f1   : > { %v2319_v1 = vsel %vm2306_vm4, %v2286_v3, %v1882_v40  ;;  %v1464_v31 = vrot.slane %v10484_v49, 7  ;;  %v6209_v40 = vld [vmem:[%s6418_s18 + $0x70] sm:$0xff] }
 0x2f2   : > { %v2567_v57 = vmul.f32 %v2471_v20, %v2319_v1  ;;  %2189 = vrot.lane.b32.xlu1 %v10478_v17, %s6239_s28  ;;  %2952 = vmatprep.mubr.bf16.mxu0 %v2646_v45  ;;  %v10486_v1 = vrot.slane %v10479_v11, 7 }
 0x2f3   : > { %5691 = vmatpush3.bf16.xpose.msra.mxu1 %v3289_v27  ;;  %1903 = vrot.lane.b32.xlu0 %v8326_v48, %s6239_s28  ;;  %v8472_v3 = vsel %vm1471_vm1, %v1463_v21, %v1464_v31 }
 0x2f4   : > { %v1982_v52 = vpop.permute.xlu1 %1981  ;;  %v3255_v29 = vpop.permute.xlu0 %3254  ;;  %v2645_v37 = vpack.c.bf16 %v2570_v53, %v2567_v57  ;;  %v8486_v27 = vsel %vm1471_vm1, %v10486_v1, %v1463_v21  ;;  %v2481_v21 = vld [vmem:[%s10192_s8 + $0x170] sm:$0xff] }
 0x2f5   : > { %6011 = vmatprep.subr.msk.bf16.mxu1 %vm730_vm2, %v3255_v29  ;;  %v2353_v45 = vsel %vm730_vm2, %v6209_v40, %v1982_v52  ;;  %v6210_v29 = vld [vmem:[%s6418_s18 + $0x78] sm:$0xff]  ;;  %v2256_v40 = vsel %vm730_vm2, %v10459_v63, %v8352_v55 }
 0x2f6   : > { %1901 = vrot.lane.b32.xlu1 %v8336_v32, %s6239_s28  ;;  %2953 = vmatmul.mubr.bf16.gmra.mrb[48].mxu0 %v2645_v37  ;;  %v2354_v37 = vsel %vm730_vm2, %v6210_v29, %v8344_v5 }
 0x2f7   : > { %2003 = vrot.lane.b32.xlu0 %v10483_v19, %s6237_s25  ;;  %v2386_v11 = vsel %vm2273_vm3, %v2354_v37, %v8360_v50  ;;  %v2477_v37 = vld [vmem:[%s10192_s8 + $0x150] sm:$0xff] }
 0x2f8   : > { %v8450_v17 = vpop.permute.xlu1 %1629  ;;  %v8452_v61 = vpop.permute.xlu0 %1987 }
 0x2f9   : > { %v2255_v5 = vsel %vm730_vm2, %v10461_v34, %v8450_v17  ;;  %v2289_v34 = vsel %vm2273_vm3, %v2256_v40, %v8368_v16  ;;  %v10488_v40 = vld [vmem:[#allocation41_spill] sm:$0xff] }
 0x2fa   : > { %2001 = vrot.lane.b32.xlu1 %v10485_v18, %s6237_s25  ;;  %v2322_v63 = vsel %vm2306_vm4, %v2289_v34, %v8436_v46  ;;  %v3301_v34 = vsel %vm730_vm2, %v8354_v4, 0  ;;  %v8570_v4 = vld [vmem:[%s6418_s18 + $0xc0] sm:$0xff] }
 0x2fb   : > { %5693 = vmatpush3.bf16.xpose.msra.mxu1 %v3292_v44  ;;  %1651 = vrot.lane.b32.xlu0 %v8464_v56, %s6237_s25  ;;  %v3295_v44 = vsel %vm730_vm2, %v8338_v2, 0  ;;  %v2478_v2 = vld [vmem:[%s10192_s8 + $0x158] sm:$0xff] }
 0x2fc   : > { %v2078_v38 = vpop.permute.xlu1 %2077  ;;  %v3257_v20 = vpop.permute.xlu0 %3256 }
 0x2fd   : > { %6012 = vmatprep.subr.msk.bf16.mxu1 %vm730_vm2, %v3257_v20  ;;  %v2385_v52 = vsel %vm2273_vm3, %v2353_v45, %v2078_v38  ;;  %v2418_v20 = vsel %vm2306_vm4, %v2386_v11, %v8393_v60 }
 0x2fe   : > { %1649 = vrot.lane.b32.xlu1 %v8476_v13, %s6237_s25  ;;  %v2577_v45 = vmul.f32 %v2481_v21, %v2418_v20 }
 0x2ff   : > { %2099 = vrot.lane.b32.xlu0 %v8472_v3, %s6238_s27 }
 0x300   : > { %v1758_v53 = vpop.permute.xlu1 %1757  ;;  %v8490_v57 = vpop.permute.xlu0 %1635 }
 0x301   : > { %v2288_v1 = vsel %vm2273_vm3, %v2255_v5, %v1758_v53 }
 0x302   : > { %2097 = vrot.lane.b32.xlu1 %v8486_v27, %s6238_s27 }
 0x303   : > { %5695 = vmatpush3.bf16.xpose.msra.mxu1 %v3295_v44  ;;  %1779 = vrot.lane.b32.xlu0 %v10477_v10, %s6238_s27  ;;  %v2480_v10 = vld [vmem:[%s10192_s8 + $0x168] sm:$0xff]  ;;  %v8534_v44 = vld [vmem:[%s6418_s18 + $0xd8] sm:$0xff] }
 0x304   : > { %v2174_v50 = vpop.permute.xlu1 %2173  ;;  %v3259_v38 = vpop.permute.xlu0 %3258  ;;  %v2576_v21 = vmul.f32 %v2480_v10, %v2322_v63  ;;  %v10490_v63 = vld [vmem:[#allocation66_spill] sm:$0xff] }
 0x305   : > { %v2417_v60 = vsel %vm2306_vm4, %v2385_v52, %v2174_v50  ;;  %6013 = vmatprep.subr.msk.bf16.mxu1 %vm730_vm2, %v3259_v38  ;;  %v3298_v52 = vsel %vm730_vm2, %v8346_v0, 0  ;;  %v10487_v0 = vld [vmem:[#allocation42_spill] sm:$0xff] }
 0x306   : > { %v2574_v29 = vmul.f32 %v2478_v2, %v2417_v60  ;;  %1777 = vrot.lane.b32.xlu1 %v10480_v26, %s6238_s27  ;;  %v1465_v60 = vrot.slane %v10488_v40, 7  ;;  %v3304_v40 = vsel %vm730_vm2, %v8362_v14, 0  ;;  %v2484_v14 = vld [vmem:[%s10192_s8 + $0x188] sm:$0xff] }
 0x307   : > { %2195 = vrot.lane.b32.xlu0 %v8534_v44, %s6239_s28 }
 0x308   : > { %v1886_v16 = vpop.permute.xlu1 %1885  ;;  %v2084_v53 = vpop.permute.xlu0 %2083  ;;  %v2649_v11 = vpack.c.bf16 %v2577_v45, %v2574_v29  ;;  %v10489_v45 = vld [vmem:[#allocation56_spill] sm:$0xff] }
 0x309   : > { %v2321_v26 = vsel %vm2306_vm4, %v2288_v1, %v1886_v16  ;;  %v8558_v1 = vld [vmem:[%s6418_s18 + $0xc8] sm:$0xff] }
 0x30a   : > { %v2573_v20 = vmul.f32 %v2477_v37, %v2321_v26  ;;  %2193 = vrot.lane.b32.xlu1 %v8455_v9, %s6239_s28  ;;  %2960 = vmatprep.mubr.bf16.mxu0 %v2649_v11  ;;  %v10491_v37 = vrot.slane %v10490_v63, 7  ;;  %v6214_v11 = vld [vmem:[%s6418_s18 + $0x80] sm:$0xff] }
 0x30b   : > { %5697 = vmatpush3.bf16.xpose.msra.mxu1 %v3298_v52  ;;  %1907 = vrot.lane.b32.xlu0 %v8382_v33, %s6239_s28  ;;  %v8580_v52 = vsel %vm1471_vm1, %v1464_v31, %v1465_v60 }
 0x30c   : > { %v1986_v46 = vpop.permute.xlu1 %1985  ;;  %v3261_v5 = vpop.permute.xlu0 %3260  ;;  %v2648_v2 = vpack.c.bf16 %v2576_v21, %v2573_v20  ;;  %v8566_v16 = vsel %vm1471_vm1, %v1465_v60, %v10491_v37  ;;  %v2487_v60 = vld [vmem:[%s10192_s8 + $0x1a0] sm:$0xff] }
 0x30d   : > { %6014 = vmatprep.subr.msk.bf16.mxu1 %vm730_vm2, %v3261_v5  ;;  %v2355_v26 = vsel %vm730_vm2, %v6214_v11, %v1986_v46  ;;  %v6215_v5 = vld [vmem:[%s6418_s18 + $0x88] sm:$0xff] }
 0x30e   : > { %1905 = vrot.lane.b32.xlu1 %v8389_v7, %s6239_s28  ;;  %2961 = vmatmul.mubr.bf16.gmra.mrb[52].mxu0 %v2648_v2  ;;  %v2356_v2 = vsel %vm730_vm2, %v6215_v5, %v8452_v61 }
 0x30f   : > { %2007 = vrot.lane.b32.xlu0 %v10487_v0, %s6237_s25  ;;  %v2388_v46 = vsel %vm2273_vm3, %v2356_v2, %v2084_v53 }
 0x310   : > { %v8550_v50 = vpop.permute.xlu1 %1633  ;;  %v1764_v38 = vpop.permute.xlu0 %1763 }
 0x311   : > { %v2257_v31 = vsel %vm730_vm2, %v8089_v51, %v8550_v50  ;;  %v2258_v51 = vsel %vm730_vm2, %v8031_v30, %v8490_v57  ;;  %v2483_v30 = vld [vmem:[%s10192_s8 + $0x180] sm:$0xff] }
 0x312   : > { %2005 = vrot.lane.b32.xlu1 %v10489_v45, %s6237_s25 }
 0x313   : > { %5699 = vmatpush3.bf16.xpose.msra.mxu1 %v3301_v34  ;;  %1655 = vrot.lane.b32.xlu0 %v8558_v1, %s6237_s25 }
 0x314   : > { %v2082_v29 = vpop.permute.xlu1 %2081  ;;  %v3263_v10 = vpop.permute.xlu0 %3262 }
 0x315   : > { %6015 = vmatprep.subr.msk.bf16.mxu1 %vm730_vm2, %v3263_v10  ;;  %v2387_v49 = vsel %vm2273_vm3, %v2355_v26, %v2082_v29  ;;  %v2291_v10 = vsel %vm2273_vm3, %v2258_v51, %v1764_v38  ;;  %v10492_v38 = vld [vmem:[#allocation57_spill] sm:$0xff] }
 0x316   : > { %1653 = vrot.lane.b32.xlu1 %v8570_v4, %s6237_s25 }
 0x317   : > { %2103 = vrot.lane.b32.xlu0 %v8566_v16, %s6238_s27 }
 0x318   : > { %v1762_v21 = vpop.permute.xlu1 %1761  ;;  %v2180_v20 = vpop.permute.xlu0 %2179 }
 0x319   : > { %v2420_v61 = vsel %vm2306_vm4, %v2388_v46, %v2180_v20  ;;  %v2290_v63 = vsel %vm2273_vm3, %v2257_v31, %v1762_v21  ;;  %v10493_v46 = vld [vmem:[#allocation58_spill] sm:$0xff]  ;;  %v10494_v31 = vld [vmem:[#allocation59_spill] sm:$0xff] }
 0x31a   : > { %2101 = vrot.lane.b32.xlu1 %v8580_v52, %s6238_s27  ;;  %v2583_v37 = vmul.f32 %v2487_v60, %v2420_v61 }
 0x31b   : > { %5701 = vmatpush3.bf16.xpose.msra.mxu1 %v3304_v40  ;;  %1783 = vrot.lane.b32.xlu0 %v10483_v19, %s6238_s27  ;;  %v2486_v19 = vld [vmem:[%s10192_s8 + $0x198] sm:$0xff] }
 0x31c   : > { %v2178_v53 = vpop.permute.xlu1 %2177  ;;  %v1892_v34 = vpop.permute.xlu0 %1891 }
 0x31d   : > { %v2419_v29 = vsel %vm2306_vm4, %v2387_v49, %v2178_v53  ;;  %v2324_v26 = vsel %vm2306_vm4, %v2291_v10, %v1892_v34  ;;  %v8626_v49 = vld [vmem:[%s6418_s18 + $0xe0] sm:$0xff]  ;;  %v10495_v34 = vld [vmem:[#allocation47_spill] sm:$0xff]  ;;  %v6217_v10 = vld [vmem:[%s6418_s18 + $0x98] sm:$0xff] }
 0x31e   : > { %v2580_v11 = vmul.f32 %v2484_v14, %v2419_v29  ;;  %1781 = vrot.lane.b32.xlu1 %v10485_v18, %s6238_s27  ;;  %v2582_v40 = vmul.f32 %v2486_v19, %v2324_v26  ;;  %v10496_v29 = vld [vmem:[#allocation46_spill] sm:$0xff]  ;;  %v6218_v26 = vld [vmem:[%s6418_s18 + $0x90] sm:$0xff] }
 0x31f   : > { %2199 = vrot.lane.b32.xlu0 %v10492_v38, %s6239_s28 }
 0x320   : > { %v1890_v20 = vpop.permute.xlu1 %1889  ;;  %v2652_v21 = vpack.c.bf16 %v2583_v37, %v2580_v11  ;;  %v1992_v5 = vpop.permute.xlu0 %1991 }
 0x321   : > { %v2323_v2 = vsel %vm2306_vm4, %v2290_v63, %v1890_v20  ;;  %v2358_v63 = vsel %vm730_vm2, %v6217_v10, %v1992_v5 }
 0x322   : > { %v2579_v18 = vmul.f32 %v2483_v30, %v2323_v2  ;;  %5703 = vmatmul.mubr.msk.bf16.vlgmr.msra.gmra.mrb[76].mxu1 %vm730_vm2, %v10493_v46  ;;  %2197 = vrot.lane.b32.xlu1 %v8626_v49, %s6239_s28  ;;  %v2493_v2 = vld [vmem:[%s10192_s8 + $0x1d0] sm:$0xff] }
 0x323   : > { %2968 = vmatprep.mubr.bf16.mxu0 %v2652_v21  ;;  %5704 = vmatprep.mubr.msk.bf16.mxu1 %vm730_vm2, %v10494_v31  ;;  %v10497_v21 = vld [vmem:[#allocation67_spill] sm:$0xff] }
 0x324   : > { %v1990_v60 = vpop.permute.xlu1 %1989  ;;  %1911 = vrot.lane.b32.xlu0 %v8472_v3, %s6239_s28  ;;  %v2651_v61 = vpack.c.bf16 %v2582_v40, %v2579_v18  ;;  %v8634_v14 = vpop.permute.xlu0 %1639 }
 0x325   : > { %v2357_v30 = vsel %vm730_vm2, %v6218_v26, %v1990_v60  ;;  %v2260_v38 = vsel %vm730_vm2, %v8071_v12, %v8634_v14  ;;  %v10498_v12 = vld [vmem:[#allocation68_spill] sm:$0xff] }
 0x326   : > { %1909 = vrot.lane.b32.xlu1 %v8486_v27, %s6239_s28  ;;  %2969 = vmatmul.mubr.bf16.gmra.mrb[56].mxu0 %v2651_v61  ;;  %v10499_v60 = vld [vmem:[#allocation64_spill] sm:$0xff]  ;;  %v2490_v61 = vld [vmem:[%s10192_s8 + $0x1b8] sm:$0xff] }
 0x328   : > { %v8638_v53 = vpop.permute.xlu1 %1637  ;;  %2011 = vrot.lane.b32.xlu0 %v10495_v34, %s6237_s25  ;;  %v2088_v51 = vpop.permute.xlu0 %2087 }
 0x329   : > { %v2390_v19 = vsel %vm2273_vm3, %v2358_v63, %v2088_v51 }
 0x32a   : > { %5705 = vmatmul.mubr.msk.bf16.gmra.mrb[80].mxu1 %vm730_vm2, %v10494_v31  ;;  %2009 = vrot.lane.b32.xlu1 %v10496_v29, %s6237_s25  ;;  %v2259_v31 = vsel %vm730_vm2, %v8147_v43, %v8638_v53  ;;  %v2492_v43 = vld [vmem:[%s10192_s8 + $0x1c8] sm:$0xff] }
 0x32b   : > { %5706 = vmatprep.mubr.msk.bf16.mxu1 %vm730_vm2, %v8012_v62 }
 0x32c   : > { %v2086_v37 = vpop.permute.xlu1 %2085  ;;  %1659 = vrot.lane.b32.xlu0 %v8534_v44, %s6237_s25  ;;  %v1768_v11 = vpop.permute.xlu0 %1767 }
 0x32d   : > { %v2389_v18 = vsel %vm2273_vm3, %v2357_v30, %v2086_v37  ;;  %v2293_v46 = vsel %vm2273_vm3, %v2260_v38, %v1768_v11  ;;  %v8694_v38 = vld [vmem:[%s6418_s18 + $0xf8] sm:$0xff] }
 0x32e   : > { %1657 = vrot.lane.b32.xlu1 %v8455_v9, %s6237_s25 }
 0x330   : > { %v1766_v20 = vpop.permute.xlu1 %1765  ;;  %2107 = vrot.lane.b32.xlu0 %v10497_v21, %s6238_s27  ;;  %v2184_v5 = vpop.permute.xlu0 %2183 }
 0x331   : > { %v2422_v40 = vsel %vm2306_vm4, %v2390_v19, %v2184_v5  ;;  %v2292_v11 = vsel %vm2273_vm3, %v2259_v31, %v1766_v20 }
 0x332   : > { %5707 = vmatmul.mubr.msk.bf16.gmra.mrb[84].mxu1 %vm730_vm2, %v8012_v62  ;;  %2105 = vrot.lane.b32.xlu1 %v10498_v12, %s6238_s27  ;;  %v2589_v10 = vmul.f32 %v2493_v2, %v2422_v40 }
 0x333   : > { %5708 = vmatprep.mubr.msk.bf16.mxu1 %vm730_vm2, %v10499_v60 }
 0x334   : > { %v2182_v51 = vpop.permute.xlu1 %2181  ;;  %1787 = vrot.lane.b32.xlu0 %v10487_v0, %s6238_s27  ;;  %v1896_v62 = vpop.permute.xlu0 %1895  ;;  %v2489_v0 = vld [vmem:[%s10192_s8 + $0x1b0] sm:$0xff] }
 0x335   : > { %v2421_v63 = vsel %vm2306_vm4, %v2389_v18, %v2182_v51  ;;  %v2326_v37 = vsel %vm2306_vm4, %v2293_v46, %v1896_v62  ;;  %v10500_v18 = vld [vmem:[#allocation33_spill] sm:$0xff]  ;;  %v10501_v51 = vld [vmem:[#allocation36_spill] sm:$0xff]  ;;  %v10502_v62 = vld [vmem:[#allocation27_spill] sm:$0xff] }
 0x336   : > { %v2586_v19 = vmul.f32 %v2490_v61, %v2421_v63  ;;  %1785 = vrot.lane.b32.xlu1 %v10489_v45, %s6238_s27  ;;  %v2588_v30 = vmul.f32 %v2492_v43, %v2326_v37  ;;  %v8702_v45 = vld [vmem:[%s6418_s18 + $0xf0] sm:$0xff]  ;;  %v3199_v63 = vpack.c.bf16 %v10502_v62, %v10502_v62  ;;  %v10503_v43 = vld [vmem:[#allocation37_spill] sm:$0xff]  ;;  %v6221_v37 = vld [vmem:[%s6418_s18 + $0xa8] sm:$0xff] }
 0x338   : > { %v1894_v26 = vpop.permute.xlu1 %1893  ;;  %2203 = vrot.lane.b32.xlu0 %v8694_v38, %s6239_s28  ;;  %v1996_v5 = vpop.permute.xlu0 %1995  ;;  %v2655_v2 = vpack.c.bf16 %v2589_v10, %v2586_v19 }
 0x339   : > { %v2325_v40 = vsel %vm2306_vm4, %v2292_v11, %v1894_v26  ;;  %v2360_v11 = vsel %vm730_vm2, %v6221_v37, %v1996_v5 }
 0x33a   : > { %v2585_v20 = vmul.f32 %v2489_v0, %v2325_v40  ;;  %5709 = vmatmul.mubr.msk.bf16.gmra.mrb[88].mxu1 %vm730_vm2, %v10499_v60  ;;  %2201 = vrot.lane.b32.xlu1 %v8702_v45, %s6239_s28  ;;  %v8728_v0 = vld [vmem:[%s6418_s18 + $0xe8] sm:$0xff] }
 0x33b   : > { %5710 = vmatprep.mubr.msk.bf16.mxu1 %vm730_vm2, %v10500_v18  ;;  %2976 = vmatprep.mubr.bf16.mxu0 %v2655_v2  ;;  %v6223_v2 = vld [vmem:[%s6418_s18 + $0xa0] sm:$0xff] }
 0x33c   : > { %v1994_v46 = vpop.permute.xlu1 %1993  ;;  %1915 = vrot.lane.b32.xlu0 %v8566_v16, %s6239_s28  ;;  %v2654_v31 = vpack.c.bf16 %v2588_v30, %v2585_v20  ;;  %v8710_v61 = vpop.permute.xlu0 %1643 }
 0x33d   : > { %v2359_v40 = vsel %vm730_vm2, %v6223_v2, %v1994_v46  ;;  %v2262_v5 = vsel %vm730_vm2, %v8191_v54, %v8710_v61  ;;  %v10505_v46 = vld [vmem:[#allocation39_spill] sm:$0xff]  ;;  %v8751_v54 = vpop.f32.mrb[56].mxu1  ;;  %v2498_v2 = vld [vmem:[%s10192_s8 + $0x1f8] sm:$0xff] }
 0x33e   : > { %1913 = vrot.lane.b32.xlu1 %v8580_v52, %s6239_s28  ;;  %2977 = vmatmul.mubr.bf16.gmra.mrb[60].mxu0 %v2654_v31 }
 0x340   : > { %v8714_v60 = vpop.permute.xlu1 %1641  ;;  %2015 = vrot.lane.b32.xlu0 %v10501_v51, %s6237_s25  ;;  %v2092_v10 = vpop.permute.xlu0 %2091  ;;  %v2499_v51 = vld [vmem:[%s10192_s8 + $0x200] sm:$0xff] }
 0x341   : > { %v2392_v30 = vsel %vm2273_vm3, %v2360_v11, %v2092_v10  ;;  %v2261_v37 = vsel %vm730_vm2, %v8258_v25, %v8714_v60  ;;  %v2496_v11 = vld [vmem:[%s10192_s8 + $0x1e8] sm:$0xff]  ;;  %v8766_v25 = vpop.f32.mrb[57].mxu1 }
 0x342   : > { %5711 = vmatmul.mubr.msk.bf16.gmra.mrb[92].mxu1 %vm730_vm2, %v10500_v18  ;;  %2013 = vrot.lane.b32.xlu1 %v10503_v43, %s6237_s25  ;;  %v10504_v18 = vld [vmem:[#allocation38_spill] sm:$0xff] }
 0x343   : > { %5712 = vmatprep.mubr.msk.bf16.mxu1 %vm730_vm2, %v3199_v63 }
 0x344   : > { %v2090_v19 = vpop.permute.xlu1 %2089  ;;  %1663 = vrot.lane.b32.xlu0 %v8728_v0, %s6237_s25  ;;  %v1772_v26 = vpop.permute.xlu0 %1771 }
 0x345   : > { %v2391_v62 = vsel %vm2273_vm3, %v2359_v40, %v2090_v19  ;;  %v2295_v43 = vsel %vm2273_vm3, %v2262_v5, %v1772_v26 }
 0x346   : > { %1661 = vrot.lane.b32.xlu1 %v8626_v49, %s6237_s25 }
 0x348   : > { %v1770_v20 = vpop.permute.xlu1 %1769  ;;  %2111 = vrot.lane.b32.xlu0 %v10504_v18, %s6238_s27  ;;  %v2188_v31 = vpop.permute.xlu0 %2187 }
 0x349   : > { %v2424_v10 = vsel %vm2306_vm4, %v2392_v30, %v2188_v31  ;;  %v2294_v5 = vsel %vm2273_vm3, %v2261_v37, %v1770_v20  ;;  %v8771_v31 = vpop.f32.mrb[58].mxu1 }
 0x34a   : > { %5713 = vmatmul.mubr.msk.bf16.gmra.mrb[96].mxu1 %vm730_vm2, %v3199_v63  ;;  %2109 = vrot.lane.b32.xlu1 %v10505_v46, %s6238_s27  ;;  %v2595_v19 = vmul.f32 %v2499_v51, %v2424_v10  ;;  %v8776_v51 = vpop.f32.mrb[59].mxu1 }
 0x34c   : > { %v2186_v30 = vpop.permute.xlu1 %2185  ;;  %1791 = vrot.lane.b32.xlu0 %v10495_v34, %s6238_s27  ;;  %v1900_v63 = vpop.permute.xlu0 %1899  ;;  %v2495_v34 = vld [vmem:[%s10192_s8 + $0x1e0] sm:$0xff] }
 0x34d   : > { %v2423_v26 = vsel %vm2306_vm4, %v2391_v62, %v2186_v30  ;;  %v2328_v40 = vsel %vm2306_vm4, %v2295_v43, %v1900_v63  ;;  %v6224_v43 = vld [vmem:[%s6418_s18 + $0x8] sm:$0xff] }
 0x34e   : > { %v2592_v18 = vmul.f32 %v2496_v11, %v2423_v26  ;;  %1789 = vrot.lane.b32.xlu1 %v10496_v29, %s6238_s27  ;;  %v2594_v62 = vmul.f32 %v2498_v2, %v2328_v40  ;;  %v6225_v11 = vld [vmem:[%s6418_s18] sm:$0xff]  ;;  %v8785_v26 = vpop.f32.mrb[60].mxu1 }
 0x34f   : > { %v8789_v40 = vpop.f32.mrb[61].mxu1 }
 0x350   : > { %v1898_v10 = vpop.permute.xlu1 %1897  ;;  %2207 = vrot.lane.b32.xlu0 %v6224_v43, %s6239_s28  ;;  %v2000_v46 = vpop.permute.xlu0 %1999  ;;  %v2658_v30 = vpack.c.bf16 %v2595_v19, %v2592_v18 }
 0x351   : > { %v2327_v20 = vsel %vm2306_vm4, %v2294_v5, %v1898_v10  ;;  %v8793_v19 = vpop.f32.mrb[62].mxu1 }
 0x352   : > { %v2591_v37 = vmul.f32 %v2495_v34, %v2327_v20  ;;  %2205 = vrot.lane.b32.xlu1 %v6225_v11, %s6239_s28  ;;  %2984 = vmatprep.mubr.bf16.mxu0 %v2658_v30  ;;  %v8795_v5 = vpop.f32.mrb[63].mxu1  ;;  %v2362_v30 = vsel %vm730_vm2, %v8464_v56, %v2000_v46 }
 0x353   : > { %v8799_v34 = vpop.f32.mrb[64].mxu1 }
 0x354   : > { %v1998_v29 = vpop.permute.xlu1 %1997  ;;  %1919 = vrot.lane.b32.xlu0 %v10497_v21, %s6239_s28  ;;  %v2657_v63 = vpack.c.bf16 %v2594_v62, %v2591_v37  ;;  %v8801_v10 = vpop.f32.mrb[65].mxu1 }
 0x355   : > { %v8787_v2 = vpop.permute.xlu0 %1647  ;;  %v8803_v62 = vpop.f32.mrb[66].mxu1  ;;  %v2361_v37 = vsel %vm730_vm2, %v8476_v13, %v1998_v29 }
 0x356   : > { %1917 = vrot.lane.b32.xlu1 %v10498_v12, %s6239_s28  ;;  %2985 = vmatmul.mubr.bf16.gmra.mrb[64].mxu0 %v2657_v63  ;;  %v8805_v43 = vpop.f32.mrb[67].mxu1  ;;  %v2264_v63 = vsel %vm730_vm2, %v8288_v8, %v8787_v2  ;;  %v2502_v8 = vld [vmem:[%s10192_s8 + $0x218] sm:$0xff] }
 0x357   : > { %v8818_v28 = vpop.f32.mrb[68].mxu1 }
 0x358   : > { %v8797_v18 = vpop.permute.xlu1 %1645  ;;  %10506 = vst [vmem:[#allocation44_spill] sm:$0xff] %v8818_v28 }
 0x359   : > { %v2096_v21 = vpop.permute.xlu0 %2095  ;;  %v2263_v13 = vsel %vm730_vm2, %v8298_v15, %v8797_v18 }
 0x35a   : > { %v2394_v11 = vsel %vm2273_vm3, %v2362_v30, %v2096_v21 }
 0x35c   : > { %v2094_v12 = vpop.permute.xlu1 %2093 }
 0x35d   : > { %v1776_v20 = vpop.permute.xlu0 %1775  ;;  %v2393_v56 = vsel %vm2273_vm3, %v2361_v37, %v2094_v12  ;;  %v2504_v12 = vld [vmem:[%s10192_s8 + $0x228] sm:$0xff] }
 0x35e   : > { %v2297_v29 = vsel %vm2273_vm3, %v2264_v63, %v1776_v20 }
 0x360   : > { %v1774_v35 = vpop.permute.xlu1 %1773 }
 0x361   : > { %v2192_v22 = vpop.permute.xlu0 %2191 }
 0x362   : > { %v2426_v46 = vsel %vm2306_vm4, %v2394_v11, %v2192_v22  ;;  %v8833_v22 = vpop.f32.mrb[69].mxu1  ;;  %v2296_v11 = vsel %vm2273_vm3, %v2263_v13, %v1774_v35 }
 0x363   : > { %v2601_v30 = vmul.f32 %v2505_v6, %v2426_v46  ;;  %10507 = vst [vmem:[#allocation50_spill] sm:$0xff] %v8833_v22  ;;  %v8837_v63 = vpop.f32.mrb[70].mxu1  ;;  %v2501_v6 = vld [vmem:[%s10192_s8 + $0x210] sm:$0xff] }
 0x364   : > { %v2190_v21 = vpop.permute.xlu1 %2189  ;;  %10508 = vst [vmem:[#allocation70_spill] sm:$0xff] %v8837_v63  ;;  %v8842_v46 = vpop.f32.mrb[71].mxu1 }
 0x365   : > { %v2425_v47 = vsel %vm2306_vm4, %v2393_v56, %v2190_v21  ;;  %v1904_v37 = vpop.permute.xlu0 %1903  ;;  %v8845_v22 = vpop.f32.mrb[72].mxu1 }
 0x366   : > { %v2598_v15 = vmul.f32 %v2502_v8, %v2425_v47  ;;  %v2330_v20 = vsel %vm2306_vm4, %v2297_v29, %v1904_v37  ;;  %10509 = vst [vmem:[#allocation65_spill] sm:$0xff] %v8845_v22  ;;  %v8847_v47 = vpop.f32.mrb[73].mxu1 }
 0x367   : > { %v2600_v21 = vmul.f32 %v2504_v12, %v2330_v20  ;;  %10510 = vst [vmem:[#allocation45_spill] sm:$0xff] %v8847_v47  ;;  %v8849_v13 = vpop.f32.mrb[74].mxu1 }
 0x368   : > { %v1902_v56 = vpop.permute.xlu1 %1901  ;;  %v2661_v28 = vpack.c.bf16 %v2601_v30, %v2598_v15  ;;  %10511 = vst [vmem:[#allocation48_spill] sm:$0xff] %v8849_v13  ;;  %v8851_v37 = vpop.f32.mrb[75].mxu1 }
 0x369   : > { %v2329_v42 = vsel %vm2306_vm4, %v2296_v11, %v1902_v56  ;;  %v2004_v41 = vpop.permute.xlu0 %2003  ;;  %10512 = vst [vmem:[#allocation69_spill] sm:$0xff] %v8851_v37 }
 0x36a   : > { %v2597_v35 = vmul.f32 %v2501_v6, %v2329_v42  ;;  %2992 = vmatprep.mubr.bf16.mxu0 %v2661_v28  ;;  %v2364_v11 = vsel %vm730_vm2, %v8558_v1, %v2004_v41 }
 0x36c   : > { %v2002_v29 = vpop.permute.xlu1 %2001  ;;  %v2660_v8 = vpack.c.bf16 %v2600_v21, %v2597_v35  ;;  %v2511_v21 = vld [vmem:[%s10192_s8 + $0x260] sm:$0xff] }
 0x36d   : > { %v8853_v63 = vpop.permute.xlu0 %1651  ;;  %v2363_v28 = vsel %vm730_vm2, %v8570_v4, %v2002_v29 }
 0x36e   : > { %2993 = vmatmul.mubr.bf16.gmra.mrb[68].mxu0 %v2660_v8  ;;  %v2266_v6 = vsel %vm730_vm2, %v8326_v48, %v8853_v63  ;;  %v2508_v48 = vld [vmem:[%s10192_s8 + $0x248] sm:$0xff] }
 0x370   : > { %v8855_v12 = vpop.permute.xlu1 %1649 }
 0x371   : > { %v2100_v30 = vpop.permute.xlu0 %2099  ;;  %v2265_v1 = vsel %vm730_vm2, %v8336_v32, %v8855_v12 }
 0x372   : > { %v2396_v20 = vsel %vm2273_vm3, %v2364_v11, %v2100_v30 }
 0x374   : > { %v2098_v15 = vpop.permute.xlu1 %2097 }
 0x375   : > { %v1780_v42 = vpop.permute.xlu0 %1779  ;;  %v2395_v8 = vsel %vm2273_vm3, %v2363_v28, %v2098_v15  ;;  %v2510_v15 = vld [vmem:[%s10192_s8 + $0x258] sm:$0xff] }
 0x376   : > { %v2299_v4 = vsel %vm2273_vm3, %v2266_v6, %v1780_v42  ;;  %v2507_v42 = vld [vmem:[%s10192_s8 + $0x240] sm:$0xff] }
 0x378   : > { %v1778_v56 = vpop.permute.xlu1 %1777 }
 0x379   : > { %v2196_v35 = vpop.permute.xlu0 %2195 }
 0x37a   : > { %v2428_v41 = vsel %vm2306_vm4, %v2396_v20, %v2196_v35  ;;  %v2298_v20 = vsel %vm2273_vm3, %v2265_v1, %v1778_v56 }
 0x37b   : > { %v2607_v30 = vmul.f32 %v2511_v21, %v2428_v41 }
 0x37c   : > { %v2194_v29 = vpop.permute.xlu1 %2193 }
 0x37d   : > { %v2427_v11 = vsel %vm2306_vm4, %v2395_v8, %v2194_v29  ;;  %v1908_v28 = vpop.permute.xlu0 %1907 }
 0x37e   : > { %v2604_v35 = vmul.f32 %v2508_v48, %v2427_v11  ;;  %v2332_v32 = vsel %vm2306_vm4, %v2299_v4, %v1908_v28 }
 0x37f   : > { %v2606_v13 = vmul.f32 %v2510_v15, %v2332_v32 }
 0x380   : > { %v1906_v6 = vpop.permute.xlu1 %1905  ;;  %v2664_v22 = vpack.c.bf16 %v2607_v30, %v2604_v35  ;;  %v2514_v35 = vld [vmem:[%s10192_s8 + $0x278] sm:$0xff] }
 0x381   : > { %v2331_v21 = vsel %vm2306_vm4, %v2298_v20, %v1906_v6  ;;  %v2008_v8 = vpop.permute.xlu0 %2007 }
 0x382   : > { %v2603_v41 = vmul.f32 %v2507_v42, %v2331_v21  ;;  %3000 = vmatprep.mubr.bf16.mxu0 %v2664_v22  ;;  %v2366_v4 = vsel %vm730_vm2, %v8534_v44, %v2008_v8  ;;  %v2516_v21 = vld [vmem:[%s10192_s8 + $0x288] sm:$0xff] }
 0x384   : > { %v2006_v29 = vpop.permute.xlu1 %2005  ;;  %v2663_v37 = vpack.c.bf16 %v2606_v13, %v2603_v41  ;;  %v2517_v13 = vld [vmem:[%s10192_s8 + $0x290] sm:$0xff] }
 0x385   : > { %v8887_v47 = vpop.permute.xlu0 %1655  ;;  %v2365_v30 = vsel %vm730_vm2, %v8455_v9, %v2006_v29 }
 0x386   : > { %3001 = vmatmul.mubr.bf16.gmra.mrb[72].mxu0 %v2663_v37  ;;  %v2268_v22 = vsel %vm730_vm2, %v8382_v33, %v8887_v47 }
 0x388   : > { %v8889_v56 = vpop.permute.xlu1 %1653 }
 0x389   : > { %v2104_v1 = vpop.permute.xlu0 %2103  ;;  %v2267_v9 = vsel %vm730_vm2, %v8389_v7, %v8889_v56  ;;  %v2513_v7 = vld [vmem:[%s10192_s8 + $0x270] sm:$0xff] }
 0x38a   : > { %v2398_v15 = vsel %vm2273_vm3, %v2366_v4, %v2104_v1 }
 0x38c   : > { %v2102_v48 = vpop.permute.xlu1 %2101 }
 0x38d   : > { %v1784_v11 = vpop.permute.xlu0 %1783  ;;  %v2397_v20 = vsel %vm2273_vm3, %v2365_v30, %v2102_v48 }
 0x38e   : > { %v2301_v32 = vsel %vm2273_vm3, %v2268_v22, %v1784_v11 }
 0x390   : > { %v1782_v28 = vpop.permute.xlu1 %1781 }
 0x391   : > { %v2200_v37 = vpop.permute.xlu0 %2199  ;;  %v2300_v8 = vsel %vm2273_vm3, %v2267_v9, %v1782_v28 }
 0x392   : > { %v2430_v44 = vsel %vm2306_vm4, %v2398_v15, %v2200_v37 }
 0x393   : > { %v2613_v42 = vmul.f32 %v2517_v13, %v2430_v44 }
 0x394   : > { %v2198_v33 = vpop.permute.xlu1 %2197 }
 0x395   : > { %v2429_v6 = vsel %vm2306_vm4, %v2397_v20, %v2198_v33 }
 0x396   : > { %v2610_v41 = vmul.f32 %v2514_v35, %v2429_v6  ;;  %v1912_v29 = vpop.permute.xlu0 %1911 }
 0x397   : > { %v2334_v1 = vsel %vm2306_vm4, %v2301_v32, %v1912_v29 }
 0x398   : > { %v1910_v4 = vpop.permute.xlu1 %1909  ;;  %v2612_v48 = vmul.f32 %v2516_v21, %v2334_v1  ;;  %v2667_v11 = vpack.c.bf16 %v2613_v42, %v2610_v41 }
 0x399   : > { %v2333_v30 = vsel %vm2306_vm4, %v2300_v8, %v1910_v4  ;;  %v2523_v8 = vld [vmem:[%s10192_s8 + $0x2c0] sm:$0xff] }
 0x39a   : > { %v2609_v15 = vmul.f32 %v2513_v7, %v2333_v30  ;;  %v2012_v22 = vpop.permute.xlu0 %2011  ;;  %3008 = vmatprep.mubr.bf16.mxu0 %v2667_v11  ;;  %v2522_v11 = vld [vmem:[%s10192_s8 + $0x2b8] sm:$0xff] }
 0x39b   : > { %v2368_v35 = vsel %vm730_vm2, %v8728_v0, %v2012_v22  ;;  %v2519_v22 = vld [vmem:[%s10192_s8 + $0x2a0] sm:$0xff] }
 0x39c   : > { %v2010_v13 = vpop.permute.xlu1 %2009  ;;  %v2666_v37 = vpack.c.bf16 %v2612_v48, %v2609_v15 }
 0x39d   : > { %v2367_v33 = vsel %vm730_vm2, %v8626_v49, %v2010_v13  ;;  %v2520_v49 = vld [vmem:[%s10192_s8 + $0x2a8] sm:$0xff] }
 0x39e   : > { %3009 = vmatmul.mubr.bf16.gmra.mrb[76].mxu0 %v2666_v37  ;;  %v8921_v28 = vpop.permute.xlu0 %1659 }
 0x39f   : > { %v2270_v21 = vsel %vm730_vm2, %v8472_v3, %v8921_v28 }
 0x3a0   : > { %v8923_v20 = vpop.permute.xlu1 %1657 }
 0x3a1   : > { %v2269_v0 = vsel %vm730_vm2, %v8486_v27, %v8923_v20 }
 0x3a2   : > { %v2108_v44 = vpop.permute.xlu0 %2107 }
 0x3a3   : > { %v2400_v42 = vsel %vm2273_vm3, %v2368_v35, %v2108_v44 }
 0x3a4   : > { %v2106_v9 = vpop.permute.xlu1 %2105 }
 0x3a5   : > { %v2399_v41 = vsel %vm2273_vm3, %v2367_v33, %v2106_v9 }
 0x3a6   : > { %v1788_v32 = vpop.permute.xlu0 %1787 }
 0x3a7   : > { %v2303_v1 = vsel %vm2273_vm3, %v2270_v21, %v1788_v32 }
 0x3a8   : > { %v1786_v6 = vpop.permute.xlu1 %1785 }
 0x3a9   : > { %v2302_v30 = vsel %vm2273_vm3, %v2269_v0, %v1786_v6 }
 0x3aa   : > { %v2204_v29 = vpop.permute.xlu0 %2203 }
 0x3ab   : > { %v2432_v7 = vsel %vm2306_vm4, %v2400_v42, %v2204_v29 }
 0x3ac   : > { %v2202_v3 = vpop.permute.xlu1 %2201  ;;  %v2619_v4 = vmul.f32 %v2523_v8, %v2432_v7 }
 0x3ad   : > { %v2431_v48 = vsel %vm2306_vm4, %v2399_v41, %v2202_v3 }
 0x3ae   : > { %v2616_v15 = vmul.f32 %v2520_v49, %v2431_v48  ;;  %v1916_v27 = vpop.permute.xlu0 %1915  ;;  %v2529_v48 = vld [vmem:[%s10192_s8 + $0x2f0] sm:$0xff] }
 0x3af   : > { %v2336_v13 = vsel %vm2306_vm4, %v2303_v1, %v1916_v27 }
 0x3b0   : > { %v1914_v37 = vpop.permute.xlu1 %1913  ;;  %v2618_v44 = vmul.f32 %v2522_v11, %v2336_v13  ;;  %v2670_v9 = vpack.c.bf16 %v2619_v4, %v2616_v15 }
 0x3b1   : > { %v2335_v35 = vsel %vm2306_vm4, %v2302_v30, %v1914_v37  ;;  %v2528_v37 = vld [vmem:[%s10192_s8 + $0x2e8] sm:$0xff] }
 0x3b2   : > { %v2615_v32 = vmul.f32 %v2519_v22, %v2335_v35  ;;  %v2016_v33 = vpop.permute.xlu0 %2015  ;;  %3016 = vmatprep.mubr.bf16.mxu0 %v2670_v9  ;;  %v2525_v35 = vld [vmem:[%s10192_s8 + $0x2d0] sm:$0xff] }
 0x3b3   : > { %v2370_v0 = vsel %vm730_vm2, %v8694_v38, %v2016_v33 }
 0x3b4   : > { %v2014_v42 = vpop.permute.xlu1 %2013  ;;  %v2669_v21 = vpack.c.bf16 %v2618_v44, %v2615_v32 }
 0x3b5   : > { %v2369_v7 = vsel %vm730_vm2, %v8702_v45, %v2014_v42  ;;  %v2526_v45 = vld [vmem:[%s10192_s8 + $0x2d8] sm:$0xff] }
 0x3b6   : > { %3017 = vmatmul.mubr.bf16.gmra.mrb[80].mxu0 %v2669_v21  ;;  %v8955_v6 = vpop.permute.xlu0 %1663 }
 0x3b7   : > { %v2272_v4 = vsel %vm730_vm2, %v8566_v16, %v8955_v6 }
 0x3b8   : > { %v8957_v8 = vpop.permute.xlu1 %1661 }
 0x3b9   : > { %v2271_v38 = vsel %vm730_vm2, %v8580_v52, %v8957_v8 }
 0x3ba   : > { %v2112_v41 = vpop.permute.xlu0 %2111 }
 0x3bb   : > { %v2402_v1 = vsel %vm2273_vm3, %v2370_v0, %v2112_v41 }
 0x3bc   : > { %v2110_v29 = vpop.permute.xlu1 %2109 }
 0x3bd   : > { %v2401_v11 = vsel %vm2273_vm3, %v2369_v7, %v2110_v29 }
 0x3be   : > { %v1792_v49 = vpop.permute.xlu0 %1791 }
 0x3bf   : > { %v2305_v27 = vsel %vm2273_vm3, %v2272_v4, %v1792_v49 }
 0x3c0   : > { %v1790_v3 = vpop.permute.xlu1 %1789 }
 0x3c1   : > { %v2304_v44 = vsel %vm2273_vm3, %v2271_v38, %v1790_v3 }
 0x3c2   : > { %v2208_v30 = vpop.permute.xlu0 %2207 }
 0x3c3   : > { %v2434_v15 = vsel %vm2306_vm4, %v2402_v1, %v2208_v30 }
 0x3c4   : > { %v2206_v16 = vpop.permute.xlu1 %2205  ;;  %v2625_v22 = vmul.f32 %v2529_v48, %v2434_v15  ;;  %v8992_v48 = vld [vmem:[%s10191_s7 + $0x1] ss:$0 sm:$0xff] }
 0x3c5   : > { %v2433_v13 = vsel %vm2306_vm4, %v2401_v11, %v2206_v16 }
 0x3c6   : > { %v2622_v9 = vmul.f32 %v2526_v45, %v2433_v13  ;;  %v1920_v52 = vpop.permute.xlu0 %1919 }
 0x3c7   : > { %v2338_v32 = vsel %vm2306_vm4, %v2305_v27, %v1920_v52 }
 0x3c8   : > { %v1918_v33 = vpop.permute.xlu1 %1917  ;;  %v2624_v42 = vmul.f32 %v2528_v37, %v2338_v32  ;;  %v2673_v21 = vpack.c.bf16 %v2625_v22, %v2622_v9 }
 0x3c9   : > { %v2337_v41 = vsel %vm2306_vm4, %v2304_v44, %v1918_v33  ;;  %v5608_v29 = vpop.f32.mrb[48].mxu0 }
 0x3ca   : > { %v2621_v0 = vmul.f32 %v2525_v35, %v2337_v41  ;;  %v5609_v49 = vpop.f32.mrb[49].mxu0  ;;  %3024 = vmatprep.mubr.bf16.mxu0 %v2673_v21 }
 0x3cb   : > { %v5610_v7 = vadd.f32 %v5609_v49, %v5608_v29  ;;  %v5611_v1 = vpop.f32.mrb[50].mxu0 }
 0x3cc   : > { %v5612_v3 = vpop.f32.mrb[51].mxu0  ;;  %v2672_v4 = vpack.c.bf16 %v2624_v42, %v2621_v0 }
 0x3cd   : > { %v2955_v11 = vadd.f32 %v8992_v48, %v5610_v7  ;;  %v5613_v30 = vadd.f32 %v5612_v3, %v5611_v1 }
 0x3ce   : > { %3025 = vmatmul.mubr.bf16.gmra.mrb[84].mxu0 %v2672_v4 }
 0x3cf   : > { %v3116_v38 = vadd.f32 %v8766_v25, %v2955_v11  ;;  %v2958_v45 = vadd.f32 %v8992_v48, %v5613_v30 }
 0x3d1   : > { %v3119_v15 = vadd.f32 %v8776_v51, %v2958_v45  ;;  %v9000_v27 = vsel %vm730_vm2, %v3116_v38, %v8450_v17 }
 0x3d3   : > { %v9004_v16 = vsel %vm730_vm2, %v3119_v15, %v8352_v55 }
 0x3d4   : > { %v3679_v22 = vpack.c.bf16 %v9004_v16, %v9000_v27 }
 0x3e1   : > { %v5614_v13 = vpop.f32.mrb[52].mxu0 }
 0x3e2   : > { %v5615_v37 = vpop.f32.mrb[53].mxu0 }
 0x3e3   : > { %v5616_v44 = vadd.f32 %v5615_v37, %v5614_v13  ;;  %v5617_v9 = vpop.f32.mrb[54].mxu0 }
 0x3e4   : > { %v5618_v25 = vpop.f32.mrb[55].mxu0 }
 0x3e5   : > { %v2963_v52 = vadd.f32 %v8992_v48, %v5616_v44  ;;  %v5619_v35 = vadd.f32 %v5618_v25, %v5617_v9 }
 0x3e7   : > { %v3124_v51 = vadd.f32 %v8751_v54, %v2963_v52  ;;  %v2966_v17 = vadd.f32 %v8992_v48, %v5619_v35 }
 0x3e9   : > { %v3127_v32 = vadd.f32 %v8771_v31, %v2966_v17  ;;  %v9014_v55 = vsel %vm730_vm2, %v3124_v51, %v8550_v50 }
 0x3eb   : > { %v9018_v33 = vsel %vm730_vm2, %v3127_v32, %v8490_v57  ;;  %v10513_v32 = vpack.c.bf16 %v8172_v23, %v8166_v59 }
 0x3ec   : > { %v3680_v42 = vpack.c.bf16 %v9018_v33, %v9014_v55 }
 0x3f5   : > { %v9022_v21 = vpop.f32.mrb[76].mxu1 }
 0x3f6   : > { %v9024_v41 = vpop.f32.mrb[77].mxu1 }
 0x3f7   : > { %v3421_v54 = vmax.f32 %v9022_v21, %v9024_v41  ;;  %v9028_v29 = vpop.f32.mrb[78].mxu1 }
 0x3f8   : > { %v9030_v31 = vpop.f32.mrb[79].mxu1 }
 0x3f9   : > { %v3424_v50 = vmax.f32 %v9028_v29, %v9030_v31  ;;  %3422 = vmax.xlane.f32.xlu1 %v3421_v54  ;;  %v5620_v57 = vpop.f32.mrb[56].mxu0 }
 0x3fa   : > { %v5621_v0 = vpop.f32.mrb[57].mxu0 }
 0x3fb   : > { %3425 = vmax.xlane.f32.xlu0 %v3424_v50  ;;  %v5622_v49 = vadd.f32 %v5621_v0, %v5620_v57  ;;  %v5623_v7 = vpop.f32.mrb[58].mxu0 }
 0x3fc   : > { %v5624_v1 = vpop.f32.mrb[59].mxu0 }
 0x3fd   : > { %v2971_v3 = vadd.f32 %v8992_v48, %v5622_v49  ;;  %v5625_v4 = vadd.f32 %v5624_v1, %v5623_v7  ;;  %v9035_v11 = vpop.f32.mrb[80].mxu1 }
 0x3fe   : > { %v9037_v30 = vpop.f32.mrb[81].mxu1 }
 0x3ff   : > { %v3132_v38 = vadd.f32 %v8789_v40, %v2971_v3  ;;  %v2974_v45 = vadd.f32 %v8992_v48, %v5625_v4  ;;  %v3427_v15 = vmax.f32 %v9035_v11, %v9037_v30  ;;  %v9043_v13 = vpop.f32.mrb[82].mxu1 }
 0x400   : > { %v9045_v37 = vpop.f32.mrb[83].mxu1 }
 0x401   : > { %v3135_v44 = vadd.f32 %v8795_v5, %v2974_v45  ;;  %v3430_v9 = vmax.f32 %v9043_v13, %v9045_v37  ;;  %3428 = vmax.xlane.f32.xlu0 %v3427_v15  ;;  %v3657_v25 = vsel %vm730_vm2, %v3132_v38, %v8638_v53 }
 0x403   : > { %3431 = vmax.xlane.f32.xlu1 %v3430_v9  ;;  %v3658_v40 = vsel %vm730_vm2, %v3135_v44, %v8634_v14 }
 0x404   : > { %v3681_v52 = vpack.c.bf16 %v3658_v40, %v3657_v25 }
 0x405   : > { %v9054_v35 = vpop.f32.mrb[84].mxu1 }
 0x406   : > { %v9056_v51 = vpop.f32.mrb[85].mxu1  ;;  %5714 = vmatprep.subr.bf16.mxu0 %v3681_v52 }
 0x407   : > { %v3433_v5 = vmax.f32 %v9054_v35, %v9056_v51  ;;  %v9060_v17 = vpop.f32.mrb[86].mxu1  ;;  %5715 = vmatpush3.bf16.msra.mxu0 %v10513_v32 }
 0x408   : > { %v9065_v54 = vpop.f32.mrb[87].mxu1 }
 0x409   : > { %v3436_v14 = vmax.f32 %v9060_v17, %v9065_v54  ;;  %3434 = vmax.xlane.f32.xlu0 %v3433_v5 }
 0x40b   : > { %3437 = vmax.xlane.f32.xlu1 %v3436_v14 }
 0x40d   : > { %v9069_v53 = vpop.f32.mrb[88].mxu1 }
 0x40e   : > { %v9071_v50 = vpop.f32.mrb[89].mxu1 }
 0x40f   : > { %v3439_v57 = vmax.f32 %v9069_v53, %v9071_v50  ;;  %v9075_v0 = vpop.f32.mrb[90].mxu1 }
 0x410   : > { %v9077_v49 = vpop.f32.mrb[91].mxu1 }
 0x411   : > { %v3442_v59 = vmax.f32 %v9075_v0, %v9077_v49  ;;  %3440 = vmax.xlane.f32.xlu0 %v3439_v57  ;;  %v5626_v23 = vpop.f32.mrb[60].mxu0 }
 0x412   : > { %v5627_v7 = vpop.f32.mrb[61].mxu0 }
 0x413   : > { %3443 = vmax.xlane.f32.xlu1 %v3442_v59  ;;  %v5628_v1 = vadd.f32 %v5627_v7, %v5626_v23  ;;  %v5629_v3 = vpop.f32.mrb[62].mxu0 }
 0x414   : > { %v5630_v4 = vpop.f32.mrb[63].mxu0 }
 0x415   : > { %v2979_v38 = vadd.f32 %v8992_v48, %v5628_v1  ;;  %v5631_v45 = vadd.f32 %v5630_v4, %v5629_v3  ;;  %v9082_v15 = vpop.f32.mrb[92].mxu1  ;;  %v10514_v3 = vpack.c.bf16 %v8160_v36, %v8156_v58 }
 0x416   : > { %v9084_v44 = vpop.f32.mrb[93].mxu1 }
 0x417   : > { %v3140_v9 = vadd.f32 %v8785_v26, %v2979_v38  ;;  %v2982_v25 = vadd.f32 %v8992_v48, %v5631_v45  ;;  %v3445_v40 = vmax.f32 %v9082_v15, %v9084_v44  ;;  %v9090_v52 = vpop.f32.mrb[94].mxu1 }
 0x418   : > { %v9092_v5 = vpop.f32.mrb[95].mxu1 }
 0x419   : > { %v3143_v32 = vadd.f32 %v8793_v19, %v2982_v25  ;;  %v3448_v14 = vmax.f32 %v9090_v52, %v9092_v5  ;;  %3446 = vmax.xlane.f32.xlu0 %v3445_v40  ;;  %v3659_v57 = vsel %vm730_vm2, %v3140_v9, %v8714_v60 }
 0x41b   : > { %3449 = vmax.xlane.f32.xlu1 %v3448_v14  ;;  %v3660_v26 = vsel %vm730_vm2, %v3143_v32, %v8710_v61 }
 0x41c   : > { %v3682_v59 = vpack.c.bf16 %v3660_v26, %v3659_v57 }
 0x41d   : > { %v9101_v23 = vpop.f32.mrb[96].mxu1 }
 0x41e   : > { %v9103_v7 = vpop.f32.mrb[97].mxu1  ;;  %5716 = vmatprep.subr.bf16.mxu0 %v3682_v59  ;;  %v10515_v59 = vpack.c.bf16 %v8213_v24, %v8207_v39 }
 0x41f   : > { %v3451_v19 = vmax.f32 %v9101_v23, %v9103_v7  ;;  %v3418_v1 = vpop.f32.mrb[98].mxu1  ;;  %5717 = vmatpush3.bf16.msra.mxu0 %v10514_v3 }
 0x420   : > { %v3419_v4 = vpop.f32.mrb[99].mxu1 }
 0x421   : > { %3452 = vmax.xlane.f32.xlu0 %v3451_v19 }
 0x429   : > { %v5632_v60 = vpop.f32.mrb[64].mxu0 }
 0x42a   : > { %v5633_v38 = vpop.f32.mrb[65].mxu0 }
 0x42b   : > { %v5634_v45 = vadd.f32 %v5633_v38, %v5632_v60  ;;  %v5635_v61 = vpop.f32.mrb[66].mxu0 }
 0x42c   : > { %v5636_v9 = vpop.f32.mrb[67].mxu0 }
 0x42d   : > { %v2987_v25 = vadd.f32 %v8992_v48, %v5634_v45  ;;  %v5637_v40 = vadd.f32 %v5636_v9, %v5635_v61  ;;  %v10516_v61 = vld [vmem:[#allocation53_spill] sm:$0xff]  ;;  %v10517_v9 = vld [vmem:[#allocation35_spill] sm:$0xff] }
 0x42f   : > { %v3148_v32 = vadd.f32 %v8801_v10, %v2987_v25  ;;  %v2990_v14 = vadd.f32 %v8992_v48, %v5637_v40  ;;  %v10518_v25 = vpack.c.bf16 %v10516_v61, %v10517_v9  ;;  %v10524_v61 = vld [vmem:[#allocation70_spill] sm:$0xff] }
 0x431   : > { %v3151_v57 = vadd.f32 %v8805_v43, %v2990_v14  ;;  %v3661_v58 = vsel %vm730_vm2, %v3148_v32, %v8797_v18 }
 0x433   : > { %v3662_v36 = vsel %vm730_vm2, %v3151_v57, %v8787_v2 }
 0x434   : > { %v3683_v26 = vpack.c.bf16 %v3662_v36, %v3661_v58  ;;  %v10519_v36 = vld [vmem:[#allocation50_spill] sm:$0xff] }
 0x436   : > { %5718 = vmatprep.subr.bf16.mxu0 %v3683_v26 }
 0x437   : > { %5719 = vmatpush3.bf16.msra.mxu0 %v10515_v59 }
 0x441   : > { %v5638_v19 = vpop.f32.mrb[68].mxu0 }
 0x442   : > { %v5639_v1 = vpop.f32.mrb[69].mxu0 }
 0x443   : > { %v5640_v3 = vadd.f32 %v5639_v1, %v5638_v19  ;;  %v5641_v10 = vpop.f32.mrb[70].mxu0 }
 0x444   : > { %v5642_v4 = vpop.f32.mrb[71].mxu0 }
 0x445   : > { %v2995_v60 = vadd.f32 %v8992_v48, %v5640_v3  ;;  %v5643_v43 = vadd.f32 %v5642_v4, %v5641_v10  ;;  %v10520_v3 = vld [vmem:[#allocation63_spill] sm:$0xff]  ;;  %v10521_v10 = vld [vmem:[#allocation60_spill] sm:$0xff] }
 0x446   : > { %v10522_v4 = vpack.c.bf16 %v10520_v3, %v10521_v10 }
 0x447   : > { %v3156_v38 = vadd.f32 %v8799_v34, %v2995_v60  ;;  %v2998_v18 = vadd.f32 %v8992_v48, %v5643_v43 }
 0x449   : > { %v3159_v2 = vadd.f32 %v8803_v62, %v2998_v18  ;;  %v3663_v45 = vsel %vm730_vm2, %v3156_v38, %v8855_v12 }
 0x44b   : > { %v3664_v39 = vsel %vm730_vm2, %v3159_v2, %v8853_v63 }
 0x44c   : > { %v3684_v24 = vpack.c.bf16 %v3664_v39, %v3663_v45  ;;  %v10523_v39 = vld [vmem:[#allocation44_spill] sm:$0xff] }
 0x44e   : > { %5720 = vmatprep.subr.bf16.mxu0 %v3684_v24 }
 0x44f   : > { %5721 = vmatpush3.bf16.msra.mxu0 %v10518_v25 }
 0x459   : > { %v5644_v40 = vpop.f32.mrb[72].mxu0 }
 0x45a   : > { %v5645_v32 = vpop.f32.mrb[73].mxu0 }
 0x45b   : > { %v5646_v14 = vadd.f32 %v5645_v32, %v5644_v40  ;;  %v5647_v34 = vpop.f32.mrb[74].mxu0  ;;  %v10525_v32 = vld [vmem:[#allocation62_spill] sm:$0xff] }
 0x45c   : > { %v5648_v57 = vpop.f32.mrb[75].mxu0 }
 0x45d   : > { %v3003_v58 = vadd.f32 %v8992_v48, %v5646_v14  ;;  %v5649_v62 = vadd.f32 %v5648_v57, %v5647_v34  ;;  %v10526_v14 = vld [vmem:[#allocation61_spill] sm:$0xff] }
 0x45e   : > { %v10527_v34 = vpack.c.bf16 %v10525_v32, %v10526_v14 }
 0x45f   : > { %v3164_v26 = vadd.f32 %v10519_v36, %v3003_v58  ;;  %v3006_v12 = vadd.f32 %v8992_v48, %v5649_v62 }
 0x461   : > { %v3167_v63 = vadd.f32 %v8842_v46, %v3006_v12  ;;  %v3665_v59 = vsel %vm730_vm2, %v3164_v26, %v8889_v56 }
 0x463   : > { %v3666_v19 = vsel %vm730_vm2, %v3167_v63, %v8887_v47 }
 0x464   : > { %v3685_v1 = vpack.c.bf16 %v3666_v19, %v3665_v59 }
 0x466   : > { %5722 = vmatprep.subr.bf16.mxu0 %v3685_v1 }
 0x467   : > { %5723 = vmatpush3.bf16.msra.mxu0 %v10522_v4 }
 0x471   : > { %v5650_v60 = vpop.f32.mrb[76].mxu0 }
 0x472   : > { %v5651_v43 = vpop.f32.mrb[77].mxu0 }
 0x473   : > { %v5652_v38 = vadd.f32 %v5651_v43, %v5650_v60  ;;  %v5653_v18 = vpop.f32.mrb[78].mxu0  ;;  %v10528_v43 = vld [vmem:[#allocation45_spill] sm:$0xff] }
 0x474   : > { %v5654_v2 = vpop.f32.mrb[79].mxu0 }
 0x475   : > { %v3011_v45 = vadd.f32 %v8992_v48, %v5652_v38  ;;  %v5655_v46 = vadd.f32 %v5654_v2, %v5653_v18 }
 0x477   : > { %v3172_v24 = vadd.f32 %v10523_v39, %v3011_v45  ;;  %v3014_v56 = vadd.f32 %v8992_v48, %v5655_v46  ;;  %v10529_v45 = vld [vmem:[#allocation69_spill] sm:$0xff] }
 0x479   : > { %v3175_v47 = vadd.f32 %v10524_v61, %v3014_v56  ;;  %v3667_v9 = vsel %vm730_vm2, %v3172_v24, %v8923_v20 }
 0x47b   : > { %v3668_v25 = vsel %vm730_vm2, %v3175_v47, %v8921_v28 }
 0x47c   : > { %v3686_v40 = vpack.c.bf16 %v3668_v25, %v3667_v9 }
 0x47e   : > { %5724 = vmatprep.subr.bf16.mxu0 %v3686_v40 }
 0x47f   : > { %5725 = vmatpush3.bf16.msra.mxu0 %v10527_v34 }
 0x486   : > { %v3423_v57 = vpop.xlane.xlu1 %3422 }
 0x487   : > { %v3454_v58 = vsub.f32 %v9022_v21, %v3423_v57  ;;  %v3455_v62 = vsub.f32 %v9024_v41, %v3423_v57 }
 0x488   : > { %v3426_v36 = vpop.xlane.xlu0 %3425 }
 0x489   : > { %v3476_v26 = vmul.f32 1.442695, %v3454_v58  ;;  %v3478_v12 = vmul.f32 1.442695, %v3455_v62  ;;  %v3456_v63 = vsub.f32 %v9028_v29, %v3426_v36  ;;  %v3457_v20 = vsub.f32 %v9030_v31, %v3426_v36  ;;  %v5656_v59 = vpop.f32.mrb[80].mxu0 }
 0x48a   : > { %v5657_v28 = vpop.f32.mrb[81].mxu0 }
 0x48b   : > { %6106 = vpow2.f32 %v3476_v26  ;;  %v3480_v19 = vmul.f32 1.442695, %v3456_v63  ;;  %v3482_v1 = vmul.f32 1.442695, %v3457_v20  ;;  %v5658_v3 = vadd.f32 %v5657_v28, %v5656_v59  ;;  %v5659_v10 = vpop.f32.mrb[82].mxu0 }
 0x48c   : > { %6108 = vpow2.f32 %v3478_v12  ;;  %v5660_v4 = vpop.f32.mrb[83].mxu0 }
 0x48d   : > { %6110 = vpow2.f32 %v3480_v19  ;;  %v3019_v21 = vadd.f32 %v8992_v48, %v5658_v3  ;;  %v5661_v41 = vadd.f32 %v5660_v4, %v5659_v10 }
 0x48e   : > { %6112 = vpow2.f32 %v3482_v1  ;;  %v3429_v60 = vpop.xlane.xlu0 %3428 }
 0x48f   : > { %v3180_v38 = vadd.f32 %v10528_v43, %v3019_v21  ;;  %v3022_v29 = vadd.f32 %v8992_v48, %v5661_v41  ;;  %v3458_v31 = vsub.f32 %v9035_v11, %v3429_v60  ;;  %v3459_v18 = vsub.f32 %v9037_v30, %v3429_v60 }
 0x490   : > { %v3432_v2 = vpop.xlane.xlu1 %3431 }
 0x491   : > { %v3183_v46 = vadd.f32 %v10529_v45, %v3022_v29  ;;  %v3484_v39 = vmul.f32 1.442695, %v3458_v31  ;;  %v3486_v24 = vmul.f32 1.442695, %v3459_v18  ;;  %v3460_v56 = vsub.f32 %v9043_v13, %v3432_v2  ;;  %v10530_v45 = vld [vmem:[#allocation65_spill] sm:$0xff] }
 0x492   : > { %v3461_v61 = vsub.f32 %v9045_v37, %v3432_v2  ;;  %v3669_v9 = vsel %vm730_vm2, %v3180_v38, %v8957_v8 }
 0x493   : > { %6114 = vpow2.f32 %v3484_v39  ;;  %v3488_v47 = vmul.f32 1.442695, %v3460_v56  ;;  %v3670_v25 = vsel %vm730_vm2, %v3183_v46, %v8955_v6 }
 0x494   : > { %6116 = vpow2.f32 %v3486_v24  ;;  %v3490_v11 = vmul.f32 1.442695, %v3461_v61  ;;  %v3687_v30 = vpack.c.bf16 %v3670_v25, %v3669_v9  ;;  %v10531_v25 = vld [vmem:[#allocation48_spill] sm:$0xff] }
 0x495   : > { %v9170_v40 = vpop.eup %6106  ;;  %6118 = vpow2.f32 %v3488_v47 }
 0x496   : > { %v9172_v32 = vpop.eup %6108  ;;  %6120 = vpow2.f32 %v3490_v11  ;;  %v3435_v13 = vpop.xlane.xlu0 %3434  ;;  %5726 = vmatprep.subr.bf16.mxu0 %v3687_v30 }
 0x497   : > { %v9174_v37 = vpop.eup %6110  ;;  %v3462_v14 = vsub.f32 %v9054_v35, %v3435_v13  ;;  %v3463_v8 = vsub.f32 %v9056_v51, %v3435_v13  ;;  %v3520_v6 = vadd.f32 %v9172_v32, %v9170_v40  ;;  %5727 = vmatpush3.bf16.msra.mxu0 %v3679_v22 }
 0x498   : > { %v9183_v34 = vpop.eup %6112  ;;  %v3438_v57 = vpop.xlane.xlu1 %3437 }
 0x499   : > { %v3492_v58 = vmul.f32 1.442695, %v3462_v14  ;;  %v3494_v62 = vmul.f32 1.442695, %v3463_v8  ;;  %v3464_v36 = vsub.f32 %v9060_v17, %v3438_v57  ;;  %v3465_v26 = vsub.f32 %v9065_v54, %v3438_v57  ;;  %3521 = vadd.xlane.f32.xlu1 %v3520_v6  ;;  %v10533_v57 = vld [vmem:[#allocation54_spill] sm:$0xff] }
 0x49a   : > { %v3523_v35 = vadd.f32 %v9183_v34, %v9174_v37 }
 0x49b   : > { %6122 = vpow2.f32 %v3492_v58  ;;  %v3496_v51 = vmul.f32 1.442695, %v3464_v36  ;;  %v3498_v12 = vmul.f32 1.442695, %v3465_v26 }
 0x49c   : > { %6124 = vpow2.f32 %v3494_v62  ;;  %3524 = vadd.xlane.f32.xlu0 %v3523_v35 }
 0x49d   : > { %v9189_v27 = vpop.eup %6114  ;;  %6126 = vpow2.f32 %v3496_v51 }
 0x49e   : > { %v9191_v16 = vpop.eup %6116  ;;  %6128 = vpow2.f32 %v3498_v12  ;;  %v3441_v22 = vpop.xlane.xlu0 %3440 }
 0x49f   : > { %v9193_v63 = vpop.eup %6118  ;;  %v3466_v17 = vsub.f32 %v9069_v53, %v3441_v22  ;;  %v3467_v54 = vsub.f32 %v9071_v50, %v3441_v22  ;;  %v3526_v20 = vadd.f32 %v9191_v16, %v9189_v27 }
 0x4a0   : > { %v9199_v59 = vpop.eup %6120  ;;  %v3444_v28 = vpop.xlane.xlu1 %3443 }
 0x4a1   : > { %v3500_v19 = vmul.f32 1.442695, %v3466_v17  ;;  %v3502_v1 = vmul.f32 1.442695, %v3467_v54  ;;  %v3468_v3 = vsub.f32 %v9075_v0, %v3444_v28  ;;  %v3469_v10 = vsub.f32 %v9077_v49, %v3444_v28  ;;  %3527 = vadd.xlane.f32.xlu1 %v3526_v20  ;;  %v5662_v4 = vpop.f32.mrb[84].mxu0 }
 0x4a2   : > { %v3529_v21 = vadd.f32 %v9199_v59, %v9193_v63  ;;  %v5663_v53 = vpop.f32.mrb[85].mxu0 }
 0x4a3   : > { %6130 = vpow2.f32 %v3500_v19  ;;  %v3504_v50 = vmul.f32 1.442695, %v3468_v3  ;;  %v3506_v41 = vmul.f32 1.442695, %v3469_v10  ;;  %v5664_v60 = vadd.f32 %v5663_v53, %v5662_v4  ;;  %v5665_v43 = vpop.f32.mrb[86].mxu0 }
 0x4a4   : > { %6132 = vpow2.f32 %v3502_v1  ;;  %3530 = vadd.xlane.f32.xlu0 %v3529_v21  ;;  %v5666_v38 = vpop.f32.mrb[87].mxu0 }
 0x4a5   : > { %v9205_v29 = vpop.eup %6122  ;;  %6134 = vpow2.f32 %v3504_v50  ;;  %v3027_v0 = vadd.f32 %v8992_v48, %v5664_v60  ;;  %v5667_v49 = vadd.f32 %v5666_v38, %v5665_v43 }
 0x4a6   : > { %v9208_v31 = vpop.eup %6124  ;;  %6136 = vpow2.f32 %v3506_v41  ;;  %v3447_v18 = vpop.xlane.xlu0 %3446 }
 0x4a7   : > { %v9210_v2 = vpop.eup %6126  ;;  %v3188_v46 = vadd.f32 %v10530_v45, %v3027_v0  ;;  %v3030_v39 = vadd.f32 %v8992_v48, %v5667_v49  ;;  %v3470_v24 = vsub.f32 %v9082_v15, %v3447_v18  ;;  %v3471_v56 = vsub.f32 %v9084_v44, %v3447_v18  ;;  %v10532_v44 = vld [vmem:[#allocation55_spill] sm:$0xff] }
 0x4a8   : > { %v9216_v61 = vpop.eup %6128  ;;  %v3450_v47 = vpop.xlane.xlu1 %3449  ;;  %v3532_v9 = vadd.f32 %v9208_v31, %v9205_v29 }
 0x4a9   : > { %v3191_v11 = vadd.f32 %v10531_v25, %v3030_v39  ;;  %v3508_v30 = vmul.f32 1.442695, %v3470_v24  ;;  %v3510_v13 = vmul.f32 1.442695, %v3471_v56  ;;  %v3472_v14 = vsub.f32 %v9090_v52, %v3450_v47 }
 0x4aa   : > { %v3473_v8 = vsub.f32 %v9092_v5, %v3450_v47  ;;  %3533 = vadd.xlane.f32.xlu1 %v3532_v9  ;;  %v3535_v48 = vadd.f32 %v9216_v61, %v9210_v2  ;;  %v3671_v6 = vsel %vm730_vm2, %v3188_v46, %v10532_v44 }
 0x4ab   : > { %6138 = vpow2.f32 %v3508_v30  ;;  %v3512_v15 = vmul.f32 1.442695, %v3472_v14  ;;  %v3672_v58 = vsel %vm730_vm2, %v3191_v11, %v10533_v57 }
 0x4ac   : > { %6140 = vpow2.f32 %v3510_v13  ;;  %v3514_v62 = vmul.f32 1.442695, %v3473_v8  ;;  %3536 = vadd.xlane.f32.xlu0 %v3535_v48  ;;  %v3688_v36 = vpack.c.bf16 %v3672_v58, %v3671_v6 }
 0x4ad   : > { %v9229_v26 = vpop.eup %6130  ;;  %6142 = vpow2.f32 %v3512_v15 }
 0x4ae   : > { %v9231_v52 = vpop.eup %6132  ;;  %6144 = vpow2.f32 %v3514_v62  ;;  %v3453_v5 = vpop.xlane.xlu0 %3452  ;;  %5728 = vmatprep.subr.bf16.mxu0 %v3688_v36 }
 0x4af   : > { %v9233_v35 = vpop.eup %6134  ;;  %v3474_v51 = vsub.f32 %v9101_v23, %v3453_v5  ;;  %v3475_v12 = vsub.f32 %v9103_v7, %v3453_v5  ;;  %5729 = vmatpush3.bf16.msra.mxu0 %v3680_v42  ;;  %v3538_v22 = vadd.f32 %v9231_v52, %v9229_v26 }
 0x4b0   : > { %v9242_v17 = vpop.eup %6136 }
 0x4b1   : > { %v3516_v54 = vmul.f32 1.442695, %v3474_v51  ;;  %v3518_v20 = vmul.f32 1.442695, %v3475_v12  ;;  %3539 = vadd.xlane.f32.xlu1 %v3538_v22  ;;  %v3541_v28 = vadd.f32 %v9242_v17, %v9233_v35 }
 0x4b3   : > { %6146 = vpow2.f32 %v3516_v54  ;;  %3542 = vadd.xlane.f32.xlu0 %v3541_v28 }
 0x4b4   : > { %6148 = vpow2.f32 %v3518_v20 }
 0x4b5   : > { %v9246_v23 = vpop.eup %6138 }
 0x4b6   : > { %v9248_v7 = vpop.eup %6140 }
 0x4b7   : > { %v9250_v55 = vpop.eup %6142  ;;  %v3544_v33 = vadd.f32 %v9248_v7, %v9246_v23 }
 0x4b8   : > { %v9254_v42 = vpop.eup %6144 }
 0x4b9   : > { %3545 = vadd.xlane.f32.xlu1 %v3544_v33  ;;  %v3547_v19 = vadd.f32 %v9254_v42, %v9250_v55 }
 0x4bb   : > { %3548 = vadd.xlane.f32.xlu0 %v3547_v19 }
 0x4bd   : > { %v9258_v1 = vpop.eup %6146 }
 0x4be   : > { %v9260_v3 = vpop.eup %6148 }
 0x4bf   : > { %v3550_v10 = vadd.f32 %v9260_v3, %v9258_v1 }
 0x4c1   : > { %3551 = vadd.xlane.f32.xlu1 %v3550_v10 }
 0x526   : > { %v3522_v4 = vpop.xlane.xlu1 %3521 }
 0x527   : > { %6150 = vrcp.f32 %v3522_v4 }
 0x529   : > { %v3525_v21 = vpop.xlane.xlu0 %3524 }
 0x52a   : > { %6152 = vrcp.f32 %v3525_v21 }
 0x52e   : > { %v3528_v53 = vpop.xlane.xlu1 %3527 }
 0x52f   : > { %6154 = vrcp.f32 %v3528_v53 }
 0x531   : > { %v6151_v50 = vpop.eup %6150  ;;  %v3531_v41 = vpop.xlane.xlu0 %3530 }
 0x532   : > { %v3564_v60 = vmul.f32 %v6151_v50, %v3522_v4  ;;  %6156 = vrcp.f32 %v3531_v41 }
 0x534   : > { %v6153_v43 = vpop.eup %6152  ;;  %v3575_v38 = vsub.f32 2.0, %v3564_v60 }
 0x535   : > { %v3565_v0 = vmul.f32 %v6153_v43, %v3525_v21 }
 0x536   : > { %v3586_v49 = vmul.f32 %v6151_v50, %v3575_v38 }
 0x537   : > { %v3576_v18 = vsub.f32 2.0, %v3565_v0  ;;  %v3534_v45 = vpop.xlane.xlu1 %3533 }
 0x538   : > { %v3597_v46 = vmul.f32 %v9170_v40, %v3586_v49  ;;  %6158 = vrcp.f32 %v3534_v45  ;;  %v3598_v39 = vmul.f32 %v9172_v32, %v3586_v49 }
 0x539   : > { %v6155_v24 = vpop.eup %6154  ;;  %v3587_v56 = vmul.f32 %v6153_v43, %v3576_v18  ;;  %v3537_v47 = vpop.xlane.xlu0 %3536 }
 0x53a   : > { %3619 = vst [vmem:[%s9268_s15] sm:$0xff] %v3597_v46  ;;  %v3566_v9 = vmul.f32 %v6155_v24, %v3528_v53  ;;  %6160 = vrcp.f32 %v3537_v47  ;;  %3620 = vst [vmem:[%s9268_s15 + $0x8] sm:$0xff] %v3598_v39 }
 0x53b   : > { %v3599_v25 = vmul.f32 %v9174_v37, %v3587_v56  ;;  %v3600_v11 = vmul.f32 %v9183_v34, %v3587_v56 }
 0x53c   : > { %v6157_v30 = vpop.eup %6156  ;;  %v3577_v13 = vsub.f32 2.0, %v3566_v9 }
 0x53d   : > { %3621 = vst [vmem:[%s9268_s15 + $0x10] sm:$0xff] %v3599_v25  ;;  %v3689_v14 = vpack.c.bf16 %v3599_v25, %v3597_v46  ;;  %v3567_v40 = vmul.f32 %v6157_v30, %v3531_v41  ;;  %3622 = vst [vmem:[%s9268_s15 + $0x18] sm:$0xff] %v3600_v11  ;;  %v3690_v32 = vpack.c.bf16 %v3600_v11, %v3598_v39 }
 0x53e   : > { %v3588_v8 = vmul.f32 %v6155_v24, %v3577_v13  ;;  %v3540_v48 = vpop.xlane.xlu1 %3539 }
 0x53f   : > { %v3578_v15 = vsub.f32 2.0, %v3567_v40  ;;  %6162 = vrcp.f32 %v3540_v48  ;;  %3733 = vmatprep.mubr.bf16.mxu0 %v3690_v32 }
 0x540   : > { %3734 = vmatmul.mubr.bf16.vlgmr.msra.gmra.mrb[88].mxu0 %v3689_v14  ;;  %v3543_v44 = vpop.xlane.xlu0 %3542  ;;  %v3602_v37 = vmul.f32 %v9191_v16, %v3588_v8  ;;  %v3601_v34 = vmul.f32 %v9189_v27, %v3588_v8 }
 0x541   : > { %v3589_v6 = vmul.f32 %v6157_v30, %v3578_v15  ;;  %6164 = vrcp.f32 %v3543_v44 }
 0x542   : > { %v6159_v57 = vpop.eup %6158  ;;  %3624 = vst [vmem:[%s9268_s15 + $0x28] sm:$0xff] %v3602_v37  ;;  %3623 = vst [vmem:[%s9268_s15 + $0x20] sm:$0xff] %v3601_v34 }
 0x543   : > { %v3568_v58 = vmul.f32 %v6159_v57, %v3534_v45  ;;  %v3604_v62 = vmul.f32 %v9199_v59, %v3589_v6  ;;  %v3603_v36 = vmul.f32 %v9193_v63, %v3589_v6 }
 0x544   : > { %v6161_v5 = vpop.eup %6160 }
 0x545   : > { %v3579_v51 = vsub.f32 2.0, %v3568_v58  ;;  %v3569_v12 = vmul.f32 %v6161_v5, %v3537_v47  ;;  %3626 = vst [vmem:[%s9268_s15 + $0x38] sm:$0xff] %v3604_v62  ;;  %v3692_v22 = vpack.c.bf16 %v3604_v62, %v3602_v37  ;;  %3625 = vst [vmem:[%s9268_s15 + $0x30] sm:$0xff] %v3603_v36  ;;  %v3691_v54 = vpack.c.bf16 %v3603_v36, %v3601_v34 }
 0x546   : > { %v3546_v16 = vpop.xlane.xlu1 %3545 }
 0x547   : > { %v3590_v27 = vmul.f32 %v6159_v57, %v3579_v51  ;;  %v3580_v20 = vsub.f32 2.0, %v3569_v12  ;;  %6166 = vrcp.f32 %v3546_v16  ;;  %3741 = vmatprep.mubr.bf16.mxu0 %v3692_v22 }
 0x548   : > { %3742 = vmatmul.mubr.bf16.gmra.mrb[92].mxu0 %v3691_v54  ;;  %v3549_v28 = vpop.xlane.xlu0 %3548 }
 0x549   : > { %v6163_v59 = vpop.eup %6162  ;;  %v3591_v63 = vmul.f32 %v6161_v5, %v3580_v20  ;;  %6168 = vrcp.f32 %v3549_v28  ;;  %v3606_v33 = vmul.f32 %v9208_v31, %v3590_v27  ;;  %v3605_v19 = vmul.f32 %v9205_v29, %v3590_v27 }
 0x54a   : > { %v3570_v10 = vmul.f32 %v6163_v59, %v3540_v48 }
 0x54b   : > { %v6165_v4 = vpop.eup %6164  ;;  %v3608_v21 = vmul.f32 %v9216_v61, %v3591_v63  ;;  %3628 = vst [vmem:[%s9268_s15 + $0x48] sm:$0xff] %v3606_v33  ;;  %v3607_v53 = vmul.f32 %v9210_v2, %v3591_v63  ;;  %3627 = vst [vmem:[%s9268_s15 + $0x40] sm:$0xff] %v3605_v19 }
 0x54c   : > { %v3581_v50 = vsub.f32 2.0, %v3570_v10  ;;  %v3571_v41 = vmul.f32 %v6165_v4, %v3543_v44 }
 0x54d   : > { %3630 = vst [vmem:[%s9268_s15 + $0x58] sm:$0xff] %v3608_v21  ;;  %v3694_v60 = vpack.c.bf16 %v3608_v21, %v3606_v33  ;;  %3629 = vst [vmem:[%s9268_s15 + $0x50] sm:$0xff] %v3607_v53  ;;  %v3693_v43 = vpack.c.bf16 %v3607_v53, %v3605_v19 }
 0x54e   : > { %v3592_v38 = vmul.f32 %v6163_v59, %v3581_v50  ;;  %v3582_v31 = vsub.f32 2.0, %v3571_v41  ;;  %v3552_v0 = vpop.xlane.xlu1 %3551 }
 0x54f   : > { %6170 = vrcp.f32 %v3552_v0  ;;  %3749 = vmatprep.mubr.bf16.mxu0 %v3694_v60 }
 0x550   : > { %v3593_v29 = vmul.f32 %v6165_v4, %v3582_v31  ;;  %3750 = vmatmul.mubr.bf16.gmra.mrb[96].mxu0 %v3693_v43  ;;  %v3610_v2 = vmul.f32 %v9231_v52, %v3592_v38  ;;  %v3609_v61 = vmul.f32 %v9229_v26, %v3592_v38 }
 0x551   : > { %v6167_v49 = vpop.eup %6166 }
 0x552   : > { %v3572_v18 = vmul.f32 %v6167_v49, %v3546_v16  ;;  %v3612_v45 = vmul.f32 %v9242_v17, %v3593_v29  ;;  %3632 = vst [vmem:[%s9268_s15 + $0x68] sm:$0xff] %v3610_v2  ;;  %v3611_v46 = vmul.f32 %v9233_v35, %v3593_v29  ;;  %3631 = vst [vmem:[%s9268_s15 + $0x60] sm:$0xff] %v3609_v61 }
 0x553   : > { %v6169_v39 = vpop.eup %6168 }
 0x554   : > { %v3583_v24 = vsub.f32 2.0, %v3572_v18  ;;  %v3573_v56 = vmul.f32 %v6169_v39, %v3549_v28  ;;  %3634 = vst [vmem:[%s9268_s15 + $0x78] sm:$0xff] %v3612_v45  ;;  %v3696_v47 = vpack.c.bf16 %v3612_v45, %v3610_v2  ;;  %3633 = vst [vmem:[%s9268_s15 + $0x70] sm:$0xff] %v3611_v46  ;;  %v3695_v52 = vpack.c.bf16 %v3611_v46, %v3609_v61 }
 0x556   : > { %v3594_v9 = vmul.f32 %v6167_v49, %v3583_v24  ;;  %v3584_v26 = vsub.f32 2.0, %v3573_v56  ;;  %3757 = vmatprep.mubr.bf16.mxu0 %v3696_v47 }
 0x558   : > { %v3595_v25 = vmul.f32 %v6169_v39, %v3584_v26  ;;  %3758 = vmatmul.mubr.bf16.gmra.mrb[100].mxu0 %v3695_v52  ;;  %v3614_v17 = vmul.f32 %v9248_v7, %v3594_v9  ;;  %v3613_v35 = vmul.f32 %v9246_v23, %v3594_v9 }
 0x559   : > { %v6171_v11 = vpop.eup %6170 }
 0x55a   : > { %v3574_v30 = vmul.f32 %v6171_v11, %v3552_v0  ;;  %v3616_v13 = vmul.f32 %v9254_v42, %v3595_v25  ;;  %3636 = vst [vmem:[%s9268_s15 + $0x88] sm:$0xff] %v3614_v17  ;;  %v3615_v14 = vmul.f32 %v9250_v55, %v3595_v25  ;;  %3635 = vst [vmem:[%s9268_s15 + $0x80] sm:$0xff] %v3613_v35 }
 0x55c   : > { %v3585_v40 = vsub.f32 2.0, %v3574_v30  ;;  %3638 = vst [vmem:[%s9268_s15 + $0x98] sm:$0xff] %v3616_v13  ;;  %v3698_v32 = vpack.c.bf16 %v3616_v13, %v3614_v17  ;;  %3637 = vst [vmem:[%s9268_s15 + $0x90] sm:$0xff] %v3615_v14  ;;  %v3697_v8 = vpack.c.bf16 %v3615_v14, %v3613_v35 }
 0x55e   : > { %v3596_v48 = vmul.f32 %v6171_v11, %v3585_v40  ;;  %3765 = vmatprep.mubr.bf16.mxu0 %v3698_v32 }
 0x560   : > { %3766 = vmatmul.mubr.bf16.gmra.mrb[104].mxu0 %v3697_v8  ;;  %v3618_v23 = vmul.f32 %v9260_v3, %v3596_v48  ;;  %v3617_v7 = vmul.f32 %v9258_v1, %v3596_v48 }
 0x562   : > { %3640 = vst [vmem:[%s9268_s15 + $0xa8] sm:$0x1] %v3618_v23  ;;  %v3700_v15 = vpack.c.bf16 %v3618_v23, %v3618_v23  ;;  %3639 = vst [vmem:[%s9268_s15 + $0xa0] sm:$0x1] %v3617_v7  ;;  %v3699_v42 = vpack.c.bf16 %v3617_v7, %v3617_v7 }
 0x564   : > { %3773 = vmatprep.mubr.bf16.mxu0 %v3700_v15 }
 0x568   : > { %3774 = vmatmul.mubr.bf16.gmra.mrb[108].mxu0 %v3699_v42 }
 0x613   : > { %v5730_v55 = vpop.f32.mrb[88].mxu0 }
 0x614   : > { %v5731_v44 = vpop.f32.mrb[89].mxu0 }
 0x615   : > { %v9314_v37 = vadd.f32 %v5731_v44, %v5730_v55  ;;  %v5733_v34 = vpop.f32.mrb[90].mxu0  ;;  %v10534_v55 = vld [vmem:[#allocation23_spill] sm:$0xff] }
 0x616   : > { %v5734_v6 = vpop.f32.mrb[91].mxu0  ;;  %v3790_v44 = vadd.s32 80, %v10534_v55  ;;  %vm3890_vm6 = vcmp.lt.s32.totalorder %v10534_v55, 2  ;;  %vm3957_vm7 = vcmp.lt.s32.totalorder %v10534_v55, 6 }
 0x617   : > { %v4661_v57 = vmul.f32 %v9314_v37, %v9314_v37  ;;  %v9318_v58 = vadd.f32 %v5734_v6, %v5733_v34  ;;  %3846 = vrot.lane.b32.xlu0 %v9314_v37, %s6239_s28  ;;  %v4633_v1 = vsel %vm730_vm2, %v9314_v37, 0.0 }
 0x618   : > { %vm3801_vm5 = vcmp.lt.s32.totalorder %v3790_v44, 81 }
 0x619   : > { %v4634_v3 = vsel %vm730_vm2, %v9318_v58, 0.0  ;;  %v4662_v62 = vmul.f32 %v9318_v58, %v9318_v58  ;;  %3848 = vrot.lane.b32.xlu1 %v9318_v58, %s6239_s28  ;;  %v4672_v5 = vsel %vm730_vm2, %v4661_v57, 0.0 }
 0x61a   : > { %v4635_v36 = vadd.f32 %v4634_v3, %v4633_v1 }
 0x61b   : > { %v4673_v51 = vsel %vm730_vm2, %v4662_v62, 0.0  ;;  %v5736_v12 = vpop.f32.mrb[92].mxu0 }
 0x61c   : > { %v4674_v22 = vadd.f32 %v4673_v51, %v4672_v5  ;;  %v5737_v54 = vpop.f32.mrb[93].mxu0 }
 0x61d   : > { %v9332_v16 = vadd.f32 %v5737_v54, %v5736_v12  ;;  %v5739_v27 = vpop.f32.mrb[94].mxu0 }
 0x61e   : > { %v5740_v20 = vpop.f32.mrb[95].mxu0 }
 0x61f   : > { %v4636_v28 = vsel %vm730_vm2, %v9332_v16, 0.0  ;;  %v4663_v59 = vmul.f32 %v9332_v16, %v9332_v16  ;;  %v9338_v63 = vadd.f32 %v5740_v20, %v5739_v27  ;;  %3850 = vrot.lane.b32.xlu1 %v9332_v16, %s6239_s28 }
 0x620   : > { %v4637_v33 = vadd.f32 %v4636_v28, %v4635_v36 }
 0x621   : > { %v4675_v19 = vsel %vm730_vm2, %v4663_v59, 0.0  ;;  %v4638_v10 = vsel %vm730_vm2, %v9338_v63, 0.0  ;;  %v4664_v4 = vmul.f32 %v9338_v63, %v9338_v63  ;;  %3852 = vrot.lane.b32.xlu0 %v9338_v63, %s6239_s28 }
 0x622   : > { %v4676_v21 = vadd.f32 %v4675_v19, %v4674_v22  ;;  %v4639_v53 = vadd.f32 %v4638_v10, %v4637_v33  ;;  %v6240_v33 = vmov 0.0  }
 0x623   : > { %v4677_v50 = vsel %vm730_vm2, %v4664_v4, 0.0  ;;  %v5742_v41 = vpop.f32.mrb[96].mxu0  ;;  %v5416_v19 = vsel %vm3801_vm5, 1.0, %v6240_v33 }
 0x624   : > { %v4678_v60 = vadd.f32 %v4677_v50, %v4676_v21  ;;  %v5743_v43 = vpop.f32.mrb[97].mxu0 }
 0x625   : > { %v9350_v38 = vadd.f32 %v5743_v43, %v5742_v41  ;;  %v5745_v31 = vpop.f32.mrb[98].mxu0 }
 0x626   : > { %v5746_v0 = vpop.f32.mrb[99].mxu0 }
 0x627   : > { %v4640_v29 = vsel %vm730_vm2, %v9350_v38, 0.0  ;;  %v4665_v2 = vmul.f32 %v9350_v38, %v9350_v38  ;;  %v9356_v61 = vadd.f32 %v5746_v0, %v5745_v31  ;;  %3854 = vrot.lane.b32.xlu1 %v9350_v38, %s6239_s28 }
 0x628   : > { %v4641_v49 = vadd.f32 %v4640_v29, %v4639_v53 }
 0x629   : > { %v4679_v18 = vsel %vm730_vm2, %v4665_v2, 0.0  ;;  %v4642_v45 = vsel %vm730_vm2, %v9356_v61, 0.0  ;;  %v4666_v46 = vmul.f32 %v9356_v61, %v9356_v61  ;;  %3856 = vrot.lane.b32.xlu0 %v9356_v61, %s6239_s28 }
 0x62a   : > { %v4680_v39 = vadd.f32 %v4679_v18, %v4678_v60  ;;  %v4643_v24 = vadd.f32 %v4642_v45, %v4641_v49 }
 0x62b   : > { %v4681_v56 = vsel %vm730_vm2, %v4666_v46, 0.0  ;;  %v5748_v47 = vpop.f32.mrb[100].mxu0 }
 0x62c   : > { %v4682_v52 = vadd.f32 %v4681_v56, %v4680_v39  ;;  %v5749_v9 = vpop.f32.mrb[101].mxu0 }
 0x62d   : > { %v9368_v26 = vadd.f32 %v5749_v9, %v5748_v47  ;;  %v5751_v25 = vpop.f32.mrb[102].mxu0 }
 0x62e   : > { %v5752_v17 = vpop.f32.mrb[103].mxu0 }
 0x62f   : > { %v4644_v35 = vsel %vm730_vm2, %v9368_v26, 0.0  ;;  %v4667_v11 = vmul.f32 %v9368_v26, %v9368_v26  ;;  %v9374_v30 = vadd.f32 %v5752_v17, %v5751_v25  ;;  %3858 = vrot.lane.b32.xlu1 %v9368_v26, %s6239_s28 }
 0x630   : > { %v4645_v13 = vadd.f32 %v4644_v35, %v4643_v24 }
 0x631   : > { %v4683_v14 = vsel %vm730_vm2, %v4667_v11, 0.0  ;;  %v4646_v40 = vsel %vm730_vm2, %v9374_v30, 0.0  ;;  %v4668_v32 = vmul.f32 %v9374_v30, %v9374_v30  ;;  %3860 = vrot.lane.b32.xlu0 %v9374_v30, %s6239_s28 }
 0x632   : > { %v4684_v8 = vadd.f32 %v4683_v14, %v4682_v52  ;;  %v4647_v48 = vadd.f32 %v4646_v40, %v4645_v13 }
 0x633   : > { %v4685_v23 = vsel %vm730_vm2, %v4668_v32, 0.0  ;;  %v5754_v7 = vpop.f32.mrb[104].mxu0 }
 0x634   : > { %v4686_v15 = vadd.f32 %v4685_v23, %v4684_v8  ;;  %v5755_v42 = vpop.f32.mrb[105].mxu0 }
 0x635   : > { %v9387_v34 = vadd.f32 %v5755_v42, %v5754_v7  ;;  %v5757_v6 = vpop.f32.mrb[106].mxu0 }
 0x636   : > { %v5758_v57 = vpop.f32.mrb[107].mxu0 }
 0x637   : > { %v4648_v1 = vsel %vm730_vm2, %v9387_v34, 0.0  ;;  %v4669_v3 = vmul.f32 %v9387_v34, %v9387_v34  ;;  %v9393_v62 = vadd.f32 %v5758_v57, %v5757_v6  ;;  %3862 = vrot.lane.b32.xlu1 %v9387_v34, %s6239_s28 }
 0x638   : > { %v4649_v36 = vadd.f32 %v4648_v1, %v4647_v48 }
 0x639   : > { %v4687_v5 = vsel %vm730_vm2, %v4669_v3, 0.0  ;;  %v4650_v51 = vsel %vm730_vm2, %v9393_v62, 0.0  ;;  %v4670_v12 = vmul.f32 %v9393_v62, %v9393_v62  ;;  %3864 = vrot.lane.b32.xlu0 %v9393_v62, %s6239_s28 }
 0x63a   : > { %v4688_v22 = vadd.f32 %v4687_v5, %v4686_v15  ;;  %v4651_v54 = vadd.f32 %v4650_v51, %v4649_v36 }
 0x63b   : > { %v4689_v27 = vsel %vm730_vm2, %v4670_v12, 0.0  ;;  %v5760_v20 = vpop.f32.mrb[108].mxu0 }
 0x63c   : > { %v4690_v28 = vadd.f32 %v4689_v27, %v4688_v22  ;;  %v5761_v59 = vpop.f32.mrb[109].mxu0 }
 0x63d   : > { %v5762_v10 = vadd.f32 %v5761_v59, %v5760_v20  ;;  %v5763_v4 = vpop.f32.mrb[110].mxu0 }
 0x63e   : > { %v5764_v21 = vpop.f32.mrb[111].mxu0  ;;  %v6069_v4 = vld [vmem:[%s10190_s6] sm:$0xff]  }
 0x63f   : > { %v3834_v53 = vmul.f32 %v5762_v10, %v5416_v19  ;;  %3866 = vrot.lane.b32.xlu1 %v5762_v10, %s6239_s28  ;;  %v6068_v10 = vld [vmem:[%s10190_s6 + $0x40] sm:$0xff]  }
 0x640   : > { %5766 = vmatprep.subr.bf16.mxu0 %v6068_v10  ;;  %5992 = vmatprep.subr.bf16.mxu1 %v6068_v10 }
 0x641   : > { %v4652_v50 = vsel %vm730_vm2, %v3834_v53, 0.0  ;;  %v4671_v41 = vmul.f32 %v3834_v53, %v3834_v53  ;;  %5767 = vmatpush3.bf16.msra.mxu0 %v6069_v4  ;;  %6000 = vmatpush3.bf16.msra.mxu1 %v6069_v4 }
 0x642   : > { %v4653_v60 = vadd.f32 %v4652_v50, %v4651_v54  ;;  %v6070_v50 = vld [vmem:[%s10190_s6 + $0x48] sm:$0xff]  }
 0x643   : > { %v4691_v43 = vsel %vm730_vm2, %v4671_v41, 0.0  ;;  %v6071_v41 = vld [vmem:[%s10190_s6 + $0x8] sm:$0xff]   ;;  %5768 = vmatprep.subr.bf16.mxu0 %v6070_v50  ;;  %5993 = vmatprep.subr.bf16.mxu1 %v6070_v50 }
 0x644   : > { %v4654_v31 = vrot.slane %v4653_v60, 4  ;;  %v4692_v0 = vadd.f32 %v4691_v43, %v4690_v28 }
 0x645   : > { %5769 = vmatpush3.bf16.msra.mxu0 %v6071_v41  ;;  %6001 = vmatpush3.bf16.msra.mxu1 %v6071_v41 }
 0x646   : > { %v4655_v29 = vadd.f32 %v4654_v31, %v4653_v60  ;;  %v4693_v2 = vrot.slane %v4692_v0, 4 }
 0x648   : > { %v4656_v49 = vrot.slane %v4655_v29, 2  ;;  %v4694_v18 = vadd.f32 %v4693_v2, %v4692_v0  ;;  %v6072_v0 = vld [vmem:[%s10190_s6 + $0x50] sm:$0xff]  }
 0x649   : > { %5770 = vmatprep.subr.bf16.mxu0 %v6072_v0  ;;  %v6073_v2 = vld [vmem:[%s10190_s6 + $0x10] sm:$0xff]   ;;  %5994 = vmatprep.subr.bf16.mxu1 %v6072_v0 }
 0x64a   : > { %v4657_v45 = vadd.f32 %v4656_v49, %v4655_v29  ;;  %v4695_v46 = vrot.slane %v4694_v18, 2  ;;  %5771 = vmatpush3.bf16.msra.mxu0 %v6073_v2  ;;  %6002 = vmatpush3.bf16.msra.mxu1 %v6073_v2 }
 0x64c   : > { %v4658_v39 = vrot.slane %v4657_v45, 1  ;;  %v4696_v24 = vadd.f32 %v4695_v46, %v4694_v18  ;;  %v6074_v18 = vld [vmem:[%s10190_s6 + $0x58] sm:$0xff]  }
 0x64d   : > { %5772 = vmatprep.subr.bf16.mxu0 %v6074_v18  ;;  %5995 = vmatprep.subr.bf16.mxu1 %v6074_v18 }
 0x64e   : > { %v4659_v56 = vadd.f32 %v4658_v39, %v4657_v45  ;;  %v4697_v47 = vrot.slane %v4696_v24, 1  ;;  %v6075_v45 = vld [vmem:[%s10190_s6 + $0x18] sm:$0xff]  }
 0x64f   : > { %5773 = vmatpush3.bf16.msra.mxu0 %v6075_v45  ;;  %6003 = vmatpush3.bf16.msra.mxu1 %v6075_v45 }
 0x650   : > { %v4660_v52 = vmul.f32 0.012345679, %v4659_v56  ;;  %v4698_v9 = vadd.f32 %v4697_v47, %v4696_v24  ;;  %v6076_v56 = vld [vmem:[%s10190_s6 + $0x60] sm:$0xff]  }
 0x651   : > { %5774 = vmatprep.subr.bf16.mxu0 %v6076_v56  ;;  %5996 = vmatprep.subr.bf16.mxu1 %v6076_v56 }
 0x652   : > { %v4699_v25 = vmul.f32 0.012345679, %v4698_v9  ;;  %v4700_v17 = vmul.f32 %v4660_v52, %v4660_v52  ;;  %v4703_v35 = vsub.f32 %v9314_v37, %v4660_v52  ;;  %v4704_v11 = vsub.f32 %v9318_v58, %v4660_v52  ;;  %v6077_v9 = vld [vmem:[%s10190_s6 + $0x20] sm:$0xff]  }
 0x653   : > { %v4705_v13 = vsub.f32 %v9332_v16, %v4660_v52  ;;  %v4706_v14 = vsub.f32 %v9338_v63, %v4660_v52  ;;  %v4707_v40 = vsub.f32 %v9350_v38, %v4660_v52  ;;  %v4708_v32 = vsub.f32 %v9356_v61, %v4660_v52  ;;  %5775 = vmatpush3.bf16.msra.mxu0 %v6077_v9 }
 0x654   : > { %v4701_v8 = vsub.f32 %v4699_v25, %v4700_v17  ;;  %v4709_v48 = vsub.f32 %v9368_v26, %v4660_v52  ;;  %v4710_v23 = vsub.f32 %v9374_v30, %v4660_v52  ;;  %v4711_v7 = vsub.f32 %v9387_v34, %v4660_v52  ;;  %6004 = vmatpush3.bf16.msra.mxu1 %v6077_v9 }
 0x655   : > { %v4712_v15 = vsub.f32 %v9393_v62, %v4660_v52  ;;  %v4713_v37 = vsub.f32 %v3834_v53, %v4660_v52 }
 0x656   : > { %v4702_v42 = vmax.f32 %v4701_v8, 0.0 }
 0x658   : > { %v4714_v58 = vadd.f32 1e-05, %v4702_v42 }
 0x65a   : > { %6172 = vrsqrt.f32 %v4714_v58  ;;  %v6082_v58 = vld [vmem:[%s10190_s6 + $0x78] sm:$0xff]  }
 0x664   : > { %v6173_v16 = vpop.eup %6172 }
 0x665   : > { %v9418_v44 = vmul.f32 %v6173_v16, %v4703_v35  ;;  %v9420_v63 = vmul.f32 %v6173_v16, %v4704_v11  ;;  %v9422_v38 = vmul.f32 %v6173_v16, %v4705_v13  ;;  %v9424_v61 = vmul.f32 %v6173_v16, %v4706_v14  ;;  %v6078_v35 = vld [vmem:[%s10190_s6 + $0x68] sm:$0xff]  }
 0x666   : > { %v9426_v26 = vmul.f32 %v6173_v16, %v4707_v40  ;;  %v9428_v30 = vmul.f32 %v6173_v16, %v4708_v32  ;;  %v9430_v34 = vmul.f32 %v6173_v16, %v4709_v48  ;;  %v9432_v6 = vmul.f32 %v6173_v16, %v4710_v23  ;;  %v6079_v11 = vld [vmem:[%s10190_s6 + $0x28] sm:$0xff]   ;;  %5776 = vmatprep.subr.bf16.mxu0 %v6078_v35 }
 0x667   : > { %v9434_v57 = vmul.f32 %v6173_v16, %v4711_v7  ;;  %v9436_v1 = vmul.f32 %v6173_v16, %v4712_v15  ;;  %v9438_v3 = vmul.f32 %v6173_v16, %v4713_v37  ;;  %5997 = vmatprep.subr.bf16.mxu1 %v6078_v35  ;;  %5777 = vmatpush3.bf16.msra.mxu0 %v6079_v11  ;;  %v6080_v7 = vld [vmem:[%s10190_s6 + $0x70] sm:$0xff]   ;;  %v6083_v16 = vld [vmem:[%s10190_s6 + $0x38] sm:$0xff]  }
 0x668   : > { %6005 = vmatpush3.bf16.msra.mxu1 %v6079_v11  ;;  %v6081_v15 = vld [vmem:[%s10190_s6 + $0x30] sm:$0xff]   ;;  %5778 = vmatprep.subr.bf16.mxu0 %v6080_v7 }
 0x669   : > { %5998 = vmatprep.subr.bf16.mxu1 %v6080_v7 }
 0x66b   : > { %5779 = vmatpush3.bf16.msra.mxu0 %v6081_v15 }
 0x66c   : > { %6006 = vmatpush3.bf16.msra.mxu1 %v6081_v15  ;;  %5780 = vmatprep.subr.bf16.mxu0 %v6082_v58  ;;  %v4223_v15 = vld [vmem:[%s10193_s9 + $0x8] sm:$0xff] }
 0x66d   : > { %5999 = vmatprep.subr.bf16.mxu1 %v6082_v58  ;;  %v4226_v58 = vld [vmem:[%s10193_s9 + $0x20] sm:$0xff] }
 0x66f   : > { %5781 = vmatpush3.bf16.msra.mxu0 %v6083_v16 }
 0x670   : > { %6007 = vmatpush3.bf16.msra.mxu1 %v6083_v16 }
 0x689   : > { %v9440_v62 = vpop.permute.xlu0 %3846 }
 0x68a   : > { %4015 = vrot.lane.b32.xlu1 %v9440_v62, %s6238_s27  ;;  %v3902_v5 = vrot.slane %v9440_v62, 7  ;;  %v3924_v12 = vrot.slane %v9440_v62, 1 }
 0x68b   : > { %v9444_v36 = vpop.permute.xlu1 %3848 }
 0x68c   : > { %4017 = vrot.lane.b32.xlu0 %v9444_v36, %s6238_s27  ;;  %v3903_v51 = vrot.slane %v9444_v36, 7  ;;  %v3925_v22 = vrot.slane %v9444_v36, 1 }
 0x68e   : > { %v3922_v54 = vsel %vm1471_vm1, %v3902_v5, %v3903_v51  ;;  %v9460_v27 = vsel %vm1536_vm0, %v3924_v12, %v3925_v22 }
 0x68f   : > { %4048 = vrot.lane.b32.xlu1 %v3922_v54, %s6239_s28 }
 0x690   : > { %4090 = vrot.lane.b32.xlu0 %v9460_v27, %s6237_s25 }
 0x691   : > { %v9465_v20 = vpop.permute.xlu1 %3850 }
 0x692   : > { %v3926_v28 = vrot.slane %v9465_v20, 1  ;;  %v3904_v33 = vrot.slane %v9465_v20, 7  ;;  %v3881_v35 = vrot.slane %v9465_v20, 6 }
 0x693   : > { %4019 = vrot.lane.b32.xlu1 %v9465_v20, %s6238_s27  ;;  %v9474_v19 = vpop.permute.xlu0 %3852 }
 0x694   : > { %3984 = vrot.lane.b32.xlu0 %v3922_v54, %s6237_s25  ;;  %v3943_v59 = vsel %vm1536_vm0, %v3925_v22, %v3926_v28  ;;  %v3921_v21 = vsel %vm1471_vm1, %v3903_v51, %v3904_v33  ;;  %v3927_v53 = vrot.slane %v9474_v19, 1  ;;  %v3905_v43 = vrot.slane %v9474_v19, 7 }
 0x696   : > { %v3942_v60 = vsel %vm1536_vm0, %v3926_v28, %v3927_v53  ;;  %v3920_v31 = vsel %vm1471_vm1, %v3904_v33, %v3905_v43  ;;  %v9603_v33 = vld [vmem:[%s10190_s6 + $0x80] sm:$0xff]  }
 0x697   : > { %4092 = vrot.lane.b32.xlu1 %v3943_v59, %s6237_s25  ;;  %5932 = vmatprep.subr.bf16.mxu0 %v9603_v33 }
 0x698   : > { %4021 = vrot.lane.b32.xlu0 %v9474_v19, %s6238_s27 }
 0x699   : > { %v9506_v29 = vpop.permute.xlu1 %3854 }
 0x69a   : > { %v3928_v49 = vrot.slane %v9506_v29, 1  ;;  %v3906_v39 = vrot.slane %v9506_v29, 7 }
 0x69b   : > { %3986 = vrot.lane.b32.xlu1 %v3921_v21, %s6237_s25  ;;  %v9526_v24 = vpop.permute.xlu0 %3856 }
 0x69c   : > { %4123 = vrot.lane.b32.xlu0 %v3943_v59, %s6239_s28  ;;  %v3941_v46 = vsel %vm1536_vm0, %v3927_v53, %v3928_v49  ;;  %v3919_v47 = vsel %vm1471_vm1, %v3905_v43, %v3906_v39  ;;  %v3929_v52 = vrot.slane %v9526_v24, 1  ;;  %v3907_v17 = vrot.slane %v9526_v24, 7 }
 0x69e   : > { %v3940_v25 = vsel %vm1536_vm0, %v3928_v49, %v3929_v52  ;;  %v3918_v14 = vsel %vm1471_vm1, %v3906_v39, %v3907_v17 }
 0x69f   : > { %4125 = vrot.lane.b32.xlu1 %v3942_v60, %s6239_s28 }
 0x6a0   : > { %4050 = vrot.lane.b32.xlu0 %v3921_v21, %s6239_s28 }
 0x6a1   : > { %v9552_v13 = vpop.permute.xlu1 %3858 }
 0x6a2   : > { %v3930_v40 = vrot.slane %v9552_v13, 1 }
 0x6a3   : > { %4052 = vrot.lane.b32.xlu1 %v3920_v31, %s6239_s28  ;;  %v9559_v32 = vpop.permute.xlu0 %3860 }
 0x6a4   : > { %4094 = vrot.lane.b32.xlu0 %v3942_v60, %s6237_s25  ;;  %v3939_v48 = vsel %vm1536_vm0, %v3929_v52, %v3930_v40  ;;  %v3931_v23 = vrot.slane %v9559_v32, 1  ;;  %v3909_v41 = vrot.slane %v9559_v32, 7 }
 0x6a6   : > { %v3938_v42 = vsel %vm1536_vm0, %v3930_v40, %v3931_v23 }
 0x6a7   : > { %4023 = vrot.lane.b32.xlu1 %v9506_v29, %s6238_s27 }
 0x6a8   : > { %3988 = vrot.lane.b32.xlu0 %v3920_v31, %s6237_s25 }
 0x6a9   : > { %v9562_v8 = vpop.permute.xlu1 %3862 }
 0x6aa   : > { %v3932_v59 = vrot.slane %v9562_v8, 1  ;;  %v3910_v43 = vrot.slane %v9562_v8, 7 }
 0x6ab   : > { %4096 = vrot.lane.b32.xlu1 %v3941_v46, %s6237_s25  ;;  %v9588_v51 = vpop.permute.xlu0 %3864 }
 0x6ac   : > { %4025 = vrot.lane.b32.xlu0 %v9526_v24, %s6238_s27  ;;  %v3911_v54 = vrot.slane %v9588_v51, 7  ;;  %v3937_v4 = vsel %vm1536_vm0, %v3931_v23, %v3932_v59  ;;  %v3933_v53 = vrot.slane %v9588_v51, 1  ;;  %v3915_v31 = vsel %vm1471_vm1, %v3909_v41, %v3910_v43 }
 0x6ae   : > { %v3936_v50 = vsel %vm1536_vm0, %v3932_v59, %v3933_v53  ;;  %v3914_v18 = vsel %vm1471_vm1, %v3910_v43, %v3911_v54 }
 0x6af   : > { %3990 = vrot.lane.b32.xlu1 %v3919_v47, %s6237_s25 }
 0x6b0   : > { %4127 = vrot.lane.b32.xlu0 %v3941_v46, %s6239_s28 }
 0x6b1   : > { %v9576_v37 = vpop.permute.xlu1 %3866 }
 0x6b2   : > { %v3912_v22 = vrot.slane %v9576_v37, 7  ;;  %v3934_v0 = vrot.slane %v9576_v37, 1 }
 0x6b3   : > { %4129 = vrot.lane.b32.xlu1 %v3940_v25, %s6239_s28 }
 0x6b4   : > { %4054 = vrot.lane.b32.xlu0 %v3919_v47, %s6239_s28  ;;  %v3923_v28 = vsel %vm1471_vm1, %v3912_v22, %v3902_v5  ;;  %v3913_v10 = vsel %vm1471_vm1, %v3911_v54, %v3912_v22  ;;  %v3908_v5 = vrot.slane %v9552_v13, 7  ;;  %v3935_v2 = vsel %vm1536_vm0, %v3933_v53, %v3934_v0  ;;  %v4228_v53 = vld [vmem:[%s10193_s9 + $0x30] sm:$0xff] }
 0x6b5   : > { %v3945_v49 = vsel %vm1536_vm0, %v3934_v0, %v3924_v12 }
 0x6b6   : > { %v3917_v21 = vsel %vm1471_vm1, %v3907_v17, %v3908_v5  ;;  %v3916_v60 = vsel %vm1471_vm1, %v3908_v5, %v3909_v41  ;;  %v3879_v17 = vrot.slane %v9440_v62, 6  ;;  %v4231_v41 = vld [vmem:[%s10193_s9 + $0x48] sm:$0xff] }
 0x6b7   : > { %4056 = vrot.lane.b32.xlu1 %v3918_v14, %s6239_s28 }
 0x6b8   : > { %4098 = vrot.lane.b32.xlu0 %v3940_v25, %s6237_s25  ;;  %v3880_v25 = vrot.slane %v9444_v36, 6 }
 0x6ba   : > { %v3899_v16 = vsel %vm3890_vm6, %v3880_v25, %v3881_v35 }
 0x6bb   : > { %4027 = vrot.lane.b32.xlu1 %v9552_v13, %s6238_s27 }
 0x6bc   : > { %4131 = vrot.lane.b32.xlu0 %v3939_v48, %s6239_s28 }
 0x6bf   : > { %4100 = vrot.lane.b32.xlu1 %v3939_v48, %s6237_s25  ;;  %v3900_v48 = vsel %vm3890_vm6, %v3879_v17, %v3880_v25 }
 0x6c0   : > { %4102 = vrot.lane.b32.xlu0 %v3938_v42, %s6237_s25 }
 0x6c3   : > { %4133 = vrot.lane.b32.xlu1 %v3938_v42, %s6239_s28 }
 0x6c4   : > { %4013 = vrot.lane.b32.xlu0 %v9576_v37, %s6238_s27 }
 0x6c7   : > { %3982 = vrot.lane.b32.xlu1 %v3923_v28, %s6237_s25 }
 0x6c8   : > { %3980 = vrot.lane.b32.xlu0 %v3913_v10, %s6237_s25 }
 0x6cb   : > { %4104 = vrot.lane.b32.xlu1 %v3937_v4, %s6237_s25 }
 0x6cc   : > { %4046 = vrot.lane.b32.xlu0 %v3923_v28, %s6239_s28 }
 0x6cf   : > { %3994 = vrot.lane.b32.xlu1 %v3917_v21, %s6237_s25 }
 0x6d0   : > { %3992 = vrot.lane.b32.xlu0 %v3918_v14, %s6237_s25 }
 0x6d3   : > { %4031 = vrot.lane.b32.xlu1 %v9562_v8, %s6238_s27 }
 0x6d4   : > { %4029 = vrot.lane.b32.xlu0 %v9559_v32, %s6238_s27 }
 0x6d7   : > { %4137 = vrot.lane.b32.xlu1 %v3936_v50, %s6239_s28 }
 0x6d8   : > { %4135 = vrot.lane.b32.xlu0 %v3937_v4, %s6239_s28 }
 0x6db   : > { %4060 = vrot.lane.b32.xlu1 %v3916_v60, %s6239_s28 }
 0x6dc   : > { %4058 = vrot.lane.b32.xlu0 %v3917_v21, %s6239_s28 }
 0x6df   : > { %3998 = vrot.lane.b32.xlu1 %v3915_v31, %s6237_s25 }
 0x6e0   : > { %4106 = vrot.lane.b32.xlu0 %v3936_v50, %s6237_s25 }
 0x6e3   : > { %4062 = vrot.lane.b32.xlu1 %v3915_v31, %s6239_s28 }
 0x6e4   : > { %3996 = vrot.lane.b32.xlu0 %v3916_v60, %s6237_s25 }
 0x6e7   : > { %4108 = vrot.lane.b32.xlu1 %v3935_v2, %s6237_s25 }
 0x6e8   : > { %4033 = vrot.lane.b32.xlu0 %v9588_v51, %s6238_s27 }
 0x6eb   : > { %4139 = vrot.lane.b32.xlu1 %v3935_v2, %s6239_s28 }
 0x6ec   : > { %4141 = vrot.lane.b32.xlu0 %v3945_v49, %s6239_s28 }
 0x6ef   : > { %4110 = vrot.lane.b32.xlu1 %v3945_v49, %s6237_s25 }
 0x6f0   : > { %4064 = vrot.lane.b32.xlu0 %v3914_v18, %s6239_s28 }
 0x6f3   : > { %4143 = vrot.lane.b32.xlu1 %v9460_v27, %s6239_s28 }
 0x6f4   : > { %4000 = vrot.lane.b32.xlu0 %v3914_v18, %s6237_s25 }
 0x6f8   : > { %4066 = vrot.lane.b32.xlu0 %v3913_v10, %s6239_s28 }
 0x6fc   : > { %v9660_v45 = vpop.permute.xlu1 %4015 }
 0x6fe   : > { %v4018_v46 = vpop.permute.xlu0 %4017 }
 0x701   : > { %v9662_v12 = vpop.permute.xlu1 %4048 }
 0x702   : > { %v4091_v39 = vpop.permute.xlu0 %4090 }
 0x703   : > { %v4189_v27 = vsel %vm730_vm2, %v9440_v62, %v4091_v39 }
 0x704   : > { %v4200_v23 = vsel %vm2273_vm3, %v4189_v27, %v4018_v46 }
 0x705   : > { %v4020_v56 = vpop.permute.xlu1 %4019 }
 0x706   : > { %v3985_v47 = vpop.permute.xlu0 %3984 }
 0x707   : > { %v4158_v7 = vsel %vm730_vm2, %v3900_v48, %v3985_v47 }
 0x708   : > { %v4169_v21 = vsel %vm2273_vm3, %v4158_v7, %v4018_v46 }
 0x709   : > { %v4093_v52 = vpop.permute.xlu1 %4092 }
 0x70a   : > { %v9664_v9 = vpop.permute.xlu0 %4021  ;;  %v4190_v14 = vsel %vm730_vm2, %v9444_v36, %v4093_v52 }
 0x70b   : > { %v4201_v22 = vsel %vm2273_vm3, %v4190_v14, %v4020_v56 }
 0x70d   : > { %v3987_v11 = vpop.permute.xlu1 %3986 }
 0x70e   : > { %v4124_v40 = vpop.permute.xlu0 %4123  ;;  %v4159_v28 = vsel %vm730_vm2, %v3899_v16, %v3987_v11  ;;  %v3889_v16 = vrot.slane %v9576_v37, 6 }
 0x70f   : > { %v4211_v42 = vsel %vm2306_vm4, %v4200_v23, %v4124_v40  ;;  %v4170_v60 = vsel %vm2273_vm3, %v4159_v28, %v4020_v56  ;;  %v10330_v28 = vrot.slane %v9588_v51, 6 }
 0x710   : > { %v4256_v4 = vmul.f32 %v4223_v15, %v4211_v42 }
 0x711   : > { %v4126_v54 = vpop.permute.xlu1 %4125 }
 0x712   : > { %v4212_v59 = vsel %vm2306_vm4, %v4201_v22, %v4126_v54  ;;  %v4051_v10 = vpop.permute.xlu0 %4050 }
 0x713   : > { %v4259_v5 = vmul.f32 %v4226_v58, %v4212_v59  ;;  %v4180_v50 = vsel %vm2306_vm4, %v4169_v21, %v4051_v10  ;;  %v3901_v59 = vsel %vm3890_vm6, %v3889_v16, %v3879_v17  ;;  %v3891_v21 = vsel %vm3890_vm6, %v10330_v28, %v3889_v16  ;;  %v4225_v16 = vld [vmem:[%s10193_s9 + $0x18] sm:$0xff] }
 0x714   : > { %v9702_v49 = vmul.f32 %v4228_v53, %v4180_v50 }
 0x715   : > { %v4053_v43 = vpop.permute.xlu1 %4052  ;;  %v4289_v31 = vpack.c.bf16 %v4259_v5, %v4256_v4 }
 0x716   : > { %v4181_v0 = vsel %vm2306_vm4, %v4170_v60, %v4053_v43  ;;  %v4095_v2 = vpop.permute.xlu0 %4094  ;;  %v4232_v60 = vld [vmem:[%s10193_s9 + $0x50] sm:$0xff] }
 0x717   : > { %v9704_v18 = vmul.f32 %v4231_v41, %v4181_v0  ;;  %4505 = vmatprep.mubr.bf16.mxu0 %v4289_v31  ;;  %v4191_v4 = vsel %vm730_vm2, %v9465_v20, %v4095_v2 }
 0x718   : > { %v4202_v31 = vsel %vm2273_vm3, %v4191_v4, %v9664_v9 }
 0x719   : > { %v9706_v46 = vpop.permute.xlu1 %4023 }
 0x71a   : > { %v9710_v47 = vpop.permute.xlu0 %3988 }
 0x71d   : > { %v4097_v52 = vpop.permute.xlu1 %4096 }
 0x71e   : > { %v9712_v25 = vpop.permute.xlu0 %4025  ;;  %v4192_v54 = vsel %vm730_vm2, %v9474_v19, %v4097_v52  ;;  %v4222_v52 = vld [vmem:[%s10193_s9] sm:$0xff] }
 0x71f   : > { %v4203_v50 = vsel %vm2273_vm3, %v4192_v54, %v9706_v46  ;;  %v4229_v54 = vld [vmem:[%s10193_s9 + $0x38] sm:$0xff] }
 0x721   : > { %v9714_v56 = vpop.permute.xlu1 %3990 }
 0x722   : > { %v4128_v27 = vpop.permute.xlu0 %4127 }
 0x725   : > { %v4130_v11 = vpop.permute.xlu1 %4129 }
 0x726   : > { %v9716_v14 = vpop.permute.xlu0 %4054  ;;  %v4214_v43 = vsel %vm2306_vm4, %v4203_v50, %v4130_v11  ;;  %v4213_v11 = vsel %vm2306_vm4, %v4202_v31, %v4128_v27  ;;  %v3883_v50 = vrot.slane %v9506_v29, 6 }
 0x729   : > { %v9718_v40 = vpop.permute.xlu1 %4056 }
 0x72a   : > { %v4099_v48 = vpop.permute.xlu0 %4098 }
 0x72b   : > { %v4193_v39 = vsel %vm730_vm2, %v9506_v29, %v4099_v48  ;;  %v3884_v48 = vrot.slane %v9526_v24, 6 }
 0x72d   : > { %v9720_v23 = vpop.permute.xlu1 %4027 }
 0x72e   : > { %v4132_v7 = vpop.permute.xlu0 %4131 }
 0x731   : > { %v4101_v15 = vpop.permute.xlu1 %4100 }
 0x732   : > { %v9722_v42 = vpop.permute.xlu0 %4102 }
 0x735   : > { %v4134_v58 = vpop.permute.xlu1 %4133 }
 0x736   : > { %v9725_v22 = vpop.permute.xlu0 %4013 }
 0x739   : > { %v3983_v10 = vpop.permute.xlu1 %3982 }
 0x73a   : > { %v4157_v5 = vsel %vm730_vm2, %v3901_v59, %v3983_v10  ;;  %v3981_v53 = vpop.permute.xlu0 %3980 }
 0x73b   : > { %v4168_v41 = vsel %vm2273_vm3, %v4157_v5, %v9660_v45  ;;  %v4156_v17 = vsel %vm730_vm2, %v3891_v21, %v3981_v53  ;;  %v4194_v5 = vsel %vm730_vm2, %v9526_v24, %v4101_v15 }
 0x73c   : > { %v4179_v0 = vsel %vm2306_vm4, %v4168_v41, %v9662_v12  ;;  %v4167_v59 = vsel %vm2273_vm3, %v4156_v17, %v9725_v22  ;;  %v4265_v12 = vmul.f32 %v4232_v60, %v4214_v43  ;;  %v4262_v41 = vmul.f32 %v4229_v54, %v4213_v11  ;;  %v6085_v17 = vld [vmem:[%s10190_s6 + $0x88] sm:$0xff]  }
 0x73d   : > { %v4105_v2 = vpop.permute.xlu1 %4104  ;;  %v4258_v21 = vmul.f32 %v4225_v16, %v4179_v0  ;;  %v3882_v60 = vrot.slane %v9474_v19, 6  ;;  %v4205_v15 = vsel %vm2273_vm3, %v4194_v5, %v9720_v23  ;;  %v4238_v0 = vld [vmem:[%s10193_s9 + $0x80] sm:$0xff]  ;;  %v3885_v16 = vrot.slane %v9552_v13, 6 }
 0x73e   : > { %v4047_v10 = vpop.permute.xlu0 %4046  ;;  %v4292_v43 = vpack.c.bf16 %v4265_v12, %v4262_v41  ;;  %v4204_v11 = vsel %vm2273_vm3, %v4193_v39, %v9712_v25  ;;  %v4235_v12 = vld [vmem:[%s10193_s9 + $0x68] sm:$0xff]  ;;  %v3948_v39 = vrot.slane %v9465_v20, 2  ;;  %v4196_v41 = vsel %vm730_vm2, %v9559_v32, %v4105_v2  ;;  %v4244_v20 = vld [vmem:[%s10193_s9 + $0xb0] sm:$0xff] }
 0x73f   : > { %v4178_v4 = vsel %vm2306_vm4, %v4167_v59, %v4047_v10  ;;  %v3897_v54 = vsel %vm3890_vm6, %v3882_v60, %v3883_v50  ;;  %v3947_v10 = vrot.slane %v9444_v36, 2 }
 0x740   : > { %v4255_v53 = vmul.f32 %v4222_v52, %v4178_v4  ;;  %v4216_v52 = vsel %vm2306_vm4, %v4205_v15, %v4134_v58  ;;  %v4161_v58 = vsel %vm730_vm2, %v3897_v54, %v9714_v56  ;;  %v4215_v4 = vsel %vm2306_vm4, %v4204_v11, %v4132_v7 }
 0x741   : > { %v3995_v28 = vpop.permute.xlu1 %3994  ;;  %v3895_v7 = vsel %vm3890_vm6, %v3884_v48, %v3885_v16 }
 0x742   : > { %v4288_v27 = vpack.c.bf16 %v4258_v21, %v4255_v53  ;;  %v3993_v31 = vpop.permute.xlu0 %3992  ;;  %v3898_v21 = vsel %vm3890_vm6, %v3881_v35, %v3882_v60  ;;  %v4271_v53 = vmul.f32 %v4238_v0, %v4216_v52  ;;  %v4172_v35 = vsel %vm2273_vm3, %v4161_v58, %v9706_v46 }
 0x743   : > { %v4160_v56 = vsel %vm730_vm2, %v3898_v21, %v9710_v47  ;;  %v4268_v60 = vmul.f32 %v4235_v12, %v4215_v4  ;;  %v4195_v47 = vsel %vm730_vm2, %v9552_v13, %v9722_v42  ;;  %v4163_v0 = vsel %vm730_vm2, %v3895_v7, %v3995_v28  ;;  %v4243_v4 = vld [vmem:[%s10193_s9 + $0xa8] sm:$0xff] }
 0x744   : > { %4506 = vmatmul.mubr.bf16.vlgmr.msra.gmra.mrb[112].mxu0 %v4288_v27  ;;  %v3896_v27 = vsel %vm3890_vm6, %v3883_v50, %v3884_v48  ;;  %v4241_v50 = vld [vmem:[%s10193_s9 + $0x98] sm:$0xff]  ;;  %v10535_v12 = vpack.c.bf16 %v9704_v18, %v9702_v49  ;;  %v4227_v21 = vld [vmem:[%s10193_s9 + $0x28] sm:$0xff]  ;;  %v4174_v18 = vsel %vm2273_vm3, %v4163_v0, %v9720_v23  ;;  %v4224_v23 = vld [vmem:[%s10193_s9 + $0x10] sm:$0xff]  ;;  %v3950_v0 = vrot.slane %v9506_v29, 2 }
 0x745   : > { %v9786_v59 = vpop.permute.xlu1 %4031  ;;  %4513 = vmatprep.mubr.bf16.mxu0 %v4292_v43  ;;  %5933 = vmatpush3.bf16.msra.mxu0 %v9603_v33  ;;  %v3949_v33 = vrot.slane %v9474_v19, 2  ;;  %v4183_v43 = vsel %vm2306_vm4, %v4172_v35, %v9718_v40  ;;  %v4237_v48 = vld [vmem:[%s10193_s9 + $0x78] sm:$0xff]  ;;  %v4162_v54 = vsel %vm730_vm2, %v3896_v27, %v3993_v31  ;;  %v4295_v58 = vpack.c.bf16 %v4271_v53, %v4268_v60 }
 0x746   : > { %v9797_v5 = vpop.permute.xlu0 %4029  ;;  %5934 = vmatprep.subr.bf16.mxu0 %v6085_v17  ;;  %v4207_v2 = vsel %vm2273_vm3, %v4196_v41, %v9786_v59  ;;  %v4171_v40 = vsel %vm2273_vm3, %v4160_v56, %v9664_v9  ;;  %v4234_v9 = vld [vmem:[%s10193_s9 + $0x60] sm:$0xff]  ;;  %v4240_v56 = vld [vmem:[%s10193_s9 + $0x90] sm:$0xff]  ;;  %v3966_v41 = vsel %vm3957_vm7, %v3947_v10, %v3948_v39  ;;  %v4270_v7 = vmul.f32 %v4237_v48, %v4183_v43 }
 0x747   : > { %v4206_v46 = vsel %vm2273_vm3, %v4195_v47, %v9797_v5  ;;  %v3965_v31 = vsel %vm3957_vm7, %v3948_v39, %v3949_v33  ;;  %v4182_v49 = vsel %vm2306_vm4, %v4171_v40, %v9716_v14  ;;  %v4173_v14 = vsel %vm2273_vm3, %v4162_v54, %v9712_v25  ;;  %v4230_v40 = vld [vmem:[%s10193_s9 + $0x40] sm:$0xff] }
 0x748   : > { %v3951_v60 = vrot.slane %v9526_v24, 2  ;;  %v3953_v39 = vrot.slane %v9559_v32, 2  ;;  %v4233_v24 = vld [vmem:[%s10193_s9 + $0x58] sm:$0xff]  ;;  %v3956_v19 = vrot.slane %v9576_v37, 2 }
 0x749   : > { %v4138_v15 = vpop.permute.xlu1 %4137  ;;  %5935 = vmatpush3.bf16.msra.mxu0 %v6085_v17 }
 0x74a   : > { %v4218_v52 = vsel %vm2306_vm4, %v4207_v2, %v4138_v15  ;;  %v4136_v42 = vpop.permute.xlu0 %4135  ;;  %v4260_v15 = vmul.f32 %v4227_v21, %v3965_v31  ;;  %v3955_v31 = vrot.slane %v9588_v51, 2  ;;  %v3886_v21 = vrot.slane %v9559_v32, 6 }
 0x74b   : > { %v4277_v11 = vmul.f32 %v4244_v20, %v4218_v52  ;;  %v4217_v17 = vsel %vm2306_vm4, %v4206_v46, %v4136_v42  ;;  %v4257_v46 = vmul.f32 %v4224_v23, %v3966_v41  ;;  %v3952_v52 = vrot.slane %v9552_v13, 2 }
 0x74c   : > { %v4274_v28 = vmul.f32 %v4241_v50, %v4217_v17  ;;  %4514 = vmatmul.mubr.bf16.gmra.mrb[116].mxu0 %v10535_v12  ;;  %v4267_v50 = vmul.f32 %v4234_v9, %v4182_v49  ;;  %v3887_v41 = vrot.slane %v9562_v8, 6  ;;  %v3946_v32 = vrot.slane %v9440_v62, 2 }
 0x74d   : > { %v4061_v53 = vpop.permute.xlu1 %4060  ;;  %4521 = vmatprep.mubr.bf16.mxu0 %v4295_v58  ;;  %v4290_v17 = vpack.c.bf16 %v4260_v15, %v4257_v46  ;;  %v3961_v29 = vsel %vm3957_vm7, %v3952_v52, %v3953_v39  ;;  %v4239_v58 = vld [vmem:[%s10193_s9 + $0x88] sm:$0xff]  ;;  %v3962_v49 = vsel %vm3957_vm7, %v3951_v60, %v3952_v52  ;;  %v3958_v13 = vsel %vm3957_vm7, %v3955_v31, %v3956_v19 }
 0x74e   : > { %v4185_v27 = vsel %vm2306_vm4, %v4174_v18, %v4061_v53  ;;  %v4059_v20 = vpop.permute.xlu0 %4058  ;;  %v4298_v35 = vpack.c.bf16 %v4277_v11, %v4274_v28  ;;  %v4294_v54 = vpack.c.bf16 %v4270_v7, %v4267_v50  ;;  %v3963_v11 = vsel %vm3957_vm7, %v3950_v0, %v3951_v60  ;;  %v4236_v18 = vld [vmem:[%s10193_s9 + $0x70] sm:$0xff]  ;;  %v4245_v60 = vld [vmem:[%s10193_s9 + $0xb8] sm:$0xff]  ;;  %v4247_v50 = vld [vmem:[%s10193_s9 + $0xc8] sm:$0xff] }
 0x74f   : > { %v4276_v47 = vmul.f32 %v4243_v4, %v4185_v27  ;;  %v4184_v2 = vsel %vm2306_vm4, %v4173_v14, %v4059_v20  ;;  %v3964_v28 = vsel %vm3957_vm7, %v3949_v33, %v3950_v0  ;;  %v4266_v4 = vmul.f32 %v4233_v24, %v3963_v11  ;;  %v4251_v0 = vld [vmem:[%s10193_s9 + $0xe8] sm:$0xff] }
 0x750   : > { %v4273_v43 = vmul.f32 %v4240_v56, %v4184_v2  ;;  %4529 = vmatprep.mubr.bf16.mxu1 %v4298_v35  ;;  %v4272_v53 = vmul.f32 %v4239_v58, %v3961_v29  ;;  %v4263_v33 = vmul.f32 %v4230_v40, %v3964_v28  ;;  %v3954_v56 = vrot.slane %v9562_v8, 2 }
 0x751   : > { %v3999_v25 = vpop.permute.xlu1 %3998  ;;  %v4269_v27 = vmul.f32 %v4236_v18, %v3962_v49  ;;  %v3894_v14 = vsel %vm3890_vm6, %v3885_v16, %v3886_v21  ;;  %v4248_v16 = vld [vmem:[%s10193_s9 + $0xd0] sm:$0xff]  ;;  %v3893_v46 = vsel %vm3890_vm6, %v3886_v21, %v3887_v41 }
 0x752   : > { %v4297_v42 = vpack.c.bf16 %v4276_v47, %v4273_v43  ;;  %v4107_v48 = vpop.permute.xlu0 %4106  ;;  %v4293_v35 = vpack.c.bf16 %v4266_v4, %v4263_v33  ;;  %v3959_v23 = vsel %vm3957_vm7, %v3954_v56, %v3955_v31  ;;  %v3968_v43 = vsel %vm3957_vm7, %v3956_v19, %v3946_v32 }
 0x753   : > { %v4296_v2 = vpack.c.bf16 %v4272_v53, %v4269_v27  ;;  %v4197_v15 = vsel %vm730_vm2, %v9562_v8, %v4107_v48  ;;  %v3960_v48 = vsel %vm3957_vm7, %v3953_v39, %v3954_v56  ;;  %v4278_v24 = vmul.f32 %v4245_v60, %v3959_v23 }
 0x754   : > { %4522 = vmatmul.mubr.bf16.gmra.mrb[120].mxu0 %v4294_v54  ;;  %4530 = vmatmul.mubr.bf16.vlgmr.msra.gmra.mrb[100].mxu1 %v4297_v42  ;;  %v4250_v42 = vld [vmem:[%s10193_s9 + $0xe0] sm:$0xff]  ;;  %v4281_v40 = vmul.f32 %v4248_v16, %v3958_v13  ;;  %v4165_v28 = vsel %vm730_vm2, %v3893_v46, %v3999_v25  ;;  %v4284_v31 = vmul.f32 %v4251_v0, %v3968_v43 }
 0x755   : > { %v4063_v12 = vpop.permute.xlu1 %4062  ;;  %5936 = vmatprep.mubr.msk.bf16.mxu0 %vm730_vm2, %v4290_v17  ;;  %v4242_v54 = vld [vmem:[%s10193_s9 + $0xa0] sm:$0xff]  ;;  %v4176_v19 = vsel %vm2273_vm3, %v4165_v28, %v9786_v59  ;;  %v3967_v27 = vsel %vm3957_vm7, %v3946_v32, %v3947_v10  ;;  %v10536_v32 = vrot.slane %v9588_v51, 6 }
 0x756   : > { %v3997_v9 = vpop.permute.xlu0 %3996 }
 0x757   : > { %v4164_v47 = vsel %vm730_vm2, %v3894_v14, %v3997_v9  ;;  %v4275_v9 = vmul.f32 %v4242_v54, %v3960_v48  ;;  %v4254_v14 = vld [vmem:[%s10193_s9 + $0x100] sm:$0xff]  ;;  %v3892_v60 = vsel %vm3890_vm6, %v3887_v41, %v10536_v32 }
 0x758   : > { %v4175_v11 = vsel %vm2273_vm3, %v4164_v47, %v9797_v5  ;;  %v4249_v5 = vld [vmem:[%s10193_s9 + $0xd8] sm:$0xff] }
 0x759   : > { %v4109_v7 = vpop.permute.xlu1 %4108  ;;  %v4186_v49 = vsel %vm2306_vm4, %v4175_v11, %v4063_v12  ;;  %v4299_v56 = vpack.c.bf16 %v4278_v24, %v4275_v9 }
 0x75a   : > { %v9912_v20 = vpop.permute.xlu0 %4033  ;;  %v4198_v62 = vsel %vm730_vm2, %v9588_v51, %v4109_v7  ;;  %v4302_v7 = vpack.c.bf16 %v4284_v31, %v4281_v40 }
 0x75b   : > { %v4208_v52 = vsel %vm2273_vm3, %v4197_v15, %v9912_v20  ;;  %v4209_v29 = vsel %vm2273_vm3, %v4198_v62, %v9725_v22  ;;  %v4246_v22 = vld [vmem:[%s10193_s9 + $0xc0] sm:$0xff] }
 0x75c   : > { %5937 = vmatmul.mubr.msk.bf16.vlgmr.msra.gmra.mrb[124].mxu0 %vm730_vm2, %v4293_v35  ;;  %v4279_v59 = vmul.f32 %v4246_v22, %v4186_v49 }
 0x75d   : > { %v4140_v8 = vpop.permute.xlu1 %4139  ;;  %5940 = vmatprep.mubr.msk.bf16.mxu0 %vm730_vm2, %v4296_v2  ;;  %v4287_v2 = vmul.f32 %v4254_v14, %v3967_v27 }
 0x75e   : > { %v4219_v17 = vsel %vm2306_vm4, %v4208_v52, %v4140_v8  ;;  %v4142_v58 = vpop.permute.xlu0 %4141 }
 0x75f   : > { %v4280_v4 = vmul.f32 %v4247_v50, %v4219_v17  ;;  %v4220_v39 = vsel %vm2306_vm4, %v4209_v29, %v4142_v58  ;;  %v4305_v51 = vpack.c.bf16 %v4287_v2, %v4287_v2 }
 0x760   : > { %v4283_v21 = vmul.f32 %v4250_v42, %v4220_v39 }
 0x761   : > { %v4111_v18 = vpop.permute.xlu1 %4110 }
 0x762   : > { %v4199_v25 = vsel %vm730_vm2, %v9576_v37, %v4111_v18  ;;  %v4065_v53 = vpop.permute.xlu0 %4064  ;;  %v4301_v33 = vpack.c.bf16 %v4283_v21, %v4280_v4  ;;  %v4253_v37 = vld [vmem:[%s10193_s9 + $0xf8] sm:$0xff] }
 0x763   : > { %v4187_v12 = vsel %vm2306_vm4, %v4176_v19, %v4065_v53  ;;  %v4210_v23 = vsel %vm2273_vm3, %v4199_v25, %v9660_v45  ;;  %v4252_v45 = vld [vmem:[%s10193_s9 + $0xf0] sm:$0xff]  ;;  %v10000_v19 = vld [vmem:[%s10191_s7 + $0x2] ss:$0 sm:$0xff] }
 0x764   : > { %v4282_v35 = vmul.f32 %v4249_v5, %v4187_v12  ;;  %4537 = vmatprep.mubr.bf16.mxu1 %v4301_v33  ;;  %5941 = vmatmul.mubr.msk.bf16.gmra.mrb[128].mxu0 %vm730_vm2, %v4299_v56 }
 0x765   : > { %v4144_v36 = vpop.permute.xlu1 %4143  ;;  %5944 = vmatprep.mubr.msk.bf16.mxu0 %vm730_vm2, %v4302_v7 }
 0x766   : > { %v4221_v10 = vsel %vm2306_vm4, %v4210_v23, %v4144_v36  ;;  %v4001_v47 = vpop.permute.xlu0 %4000  ;;  %v4300_v62 = vpack.c.bf16 %v4282_v35, %v4279_v59 }
 0x767   : > { %v4286_v13 = vmul.f32 %v4253_v37, %v4221_v10  ;;  %v4166_v16 = vsel %vm730_vm2, %v3892_v60, %v4001_v47 }
 0x768   : > { %4538 = vmatmul.mubr.bf16.gmra.mrb[104].mxu1 %v4300_v62  ;;  %v4177_v50 = vsel %vm2273_vm3, %v4166_v16, %v9912_v20 }
 0x769   : > { %v4304_v15 = vpack.c.bf16 %v4286_v13, %v4286_v13 }
 0x76a   : > { %v4067_v43 = vpop.permute.xlu0 %4066 }
 0x76b   : > { %v4188_v55 = vsel %vm2306_vm4, %v4177_v50, %v4067_v43  ;;  %4545 = vmatprep.mubr.bf16.mxu1 %v4304_v15 }
 0x76c   : > { %v4285_v41 = vmul.f32 %v4252_v45, %v4188_v55  ;;  %5945 = vmatmul.mubr.msk.bf16.gmra.mrb[132].mxu0 %vm730_vm2, %v4305_v51 }
 0x76e   : > { %v4303_v0 = vpack.c.bf16 %v4285_v41, %v4285_v41 }
 0x770   : > { %4546 = vmatmul.mubr.bf16.gmra.mrb[108].mxu1 %v4303_v0 }
 0x817   : > { %v5782_v46 = vpop.f32.mrb[112].mxu0 }
 0x818   : > { %v5783_v52 = vpop.f32.mrb[113].mxu0 }
 0x819   : > { %v5784_v8 = vadd.f32 %v5783_v52, %v5782_v46  ;;  %v5785_v42 = vpop.f32.mrb[114].mxu0 }
 0x81a   : > { %v5786_v48 = vpop.f32.mrb[115].mxu0 }
 0x81b   : > { %v5787_v54 = vadd.f32 %v5786_v48, %v5785_v42  ;;  %v4508_v56 = vadd.f32 %v5784_v8, %v10000_v19 }
 0x81d   : > { %v4511_v37 = vadd.f32 %v5787_v54, %v10000_v19 }
 0x81f   : > { %v5788_v24 = vpop.f32.mrb[116].mxu0 }
 0x820   : > { %v5789_v11 = vpop.f32.mrb[117].mxu0 }
 0x821   : > { %v5790_v17 = vadd.f32 %v5789_v11, %v5788_v24  ;;  %v5791_v20 = vpop.f32.mrb[118].mxu0 }
 0x822   : > { %v5792_v29 = vpop.f32.mrb[119].mxu0 }
 0x823   : > { %v5793_v58 = vadd.f32 %v5792_v29, %v5791_v20  ;;  %v4516_v53 = vadd.f32 %v5790_v17, %v10000_v19 }
 0x825   : > { %v4519_v27 = vadd.f32 %v5793_v58, %v10000_v19 }
 0x827   : > { %v5794_v40 = vpop.f32.mrb[120].mxu0  ;;  %v5800_v28 = vpop.f32.mrb[100].mxu1 }
 0x828   : > { %v5795_v4 = vpop.f32.mrb[121].mxu0  ;;  %v5801_v39 = vpop.f32.mrb[101].mxu1 }
 0x829   : > { %v5796_v31 = vadd.f32 %v5795_v4, %v5794_v40  ;;  %v5802_v21 = vadd.f32 %v5801_v39, %v5800_v28  ;;  %v5797_v9 = vpop.f32.mrb[122].mxu0  ;;  %v5803_v49 = vpop.f32.mrb[102].mxu1 }
 0x82a   : > { %v5798_v18 = vpop.f32.mrb[123].mxu0  ;;  %v5804_v5 = vpop.f32.mrb[103].mxu1 }
 0x82b   : > { %v5799_v22 = vadd.f32 %v5798_v18, %v5797_v9  ;;  %v5805_v25 = vadd.f32 %v5804_v5, %v5803_v49  ;;  %v4532_v62 = vadd.f32 %v5802_v21, %v10000_v19 }
 0x82d   : > { %v4535_v15 = vadd.f32 %v5805_v25, %v10000_v19 }
 0x82f   : > { %v5938_v33 = vpop.f32.mrb[124].mxu0 }
 0x830   : > { %v4596_v12 = vadd.f32 %v5938_v33, %v4516_v53  ;;  %v4587_v7 = vpop.f32.mrb[125].mxu0 }
 0x831   : > { %v4588_v14 = vadd.f32 %v4587_v7, %v4508_v56  ;;  %v5939_v35 = vpop.f32.mrb[126].mxu0 }
 0x832   : > { %v4599_v59 = vadd.f32 %v5939_v35, %v4519_v27  ;;  %v4590_v23 = vpop.f32.mrb[127].mxu0  ;;  %v10007_v36 = vmul.f32 %v9422_v38, %v4596_v12  ;;  %v4524_v38 = vadd.f32 %v5796_v31, %v10000_v19  ;;  %v6086_v31 = vld [vmem:[%s10038_s13] sm:$0xff]  }
 0x833   : > { %v4591_v10 = vadd.f32 %v4590_v23, %v4511_v37  ;;  %4749 = vrot.lane.b32.xlu1 %v4588_v14, %s6239_s28  ;;  %v4727_v32 = vmul.f32 %v9418_v44, %v4588_v14  ;;  %5960 = vmatprep.mubr.msk.bf16.mxu1 %vm4911_vm8, %v6086_v31 }
 0x834   : > { %v10012_v60 = vmul.f32 %v9424_v61, %v4599_v59  ;;  %v4527_v61 = vadd.f32 %v5799_v22, %v10000_v19 }
 0x835   : > { %4751 = vrot.lane.b32.xlu0 %v4591_v10, %s6239_s28  ;;  %v4728_v47 = vmul.f32 %v9420_v63, %v4591_v10 }
 0x837   : > { %v5942_v2 = vpop.f32.mrb[128].mxu0  ;;  %4753 = vrot.lane.b32.xlu1 %v4596_v12, %s6239_s28 }
 0x838   : > { %v4612_v13 = vadd.f32 %v5942_v2, %v4532_v62  ;;  %v4603_v16 = vpop.f32.mrb[129].mxu0 }
 0x839   : > { %v4604_v45 = vadd.f32 %v4603_v16, %v4524_v38  ;;  %v5943_v44 = vpop.f32.mrb[130].mxu0  ;;  %4755 = vrot.lane.b32.xlu0 %v4599_v59, %s6239_s28 }
 0x83a   : > { %v4615_v50 = vadd.f32 %v5943_v44, %v4535_v15  ;;  %v4606_v43 = vpop.f32.mrb[131].mxu0  ;;  %v4733_v63 = vmul.f32 %v9430_v34, %v4612_v13  ;;  %v6088_v44 = vld [vmem:[%s10038_s13 + $0x10] sm:$0xff]  }
 0x83b   : > { %v4607_v51 = vadd.f32 %v4606_v43, %v4527_v61  ;;  %4757 = vrot.lane.b32.xlu1 %v4604_v45, %s6239_s28  ;;  %v5806_v55 = vpop.f32.mrb[104].mxu1  ;;  %v4731_v41 = vmul.f32 %v9426_v26, %v4604_v45  ;;  %v6087_v45 = vld [vmem:[%s10038_s13 + $0x8] sm:$0xff]   ;;  %v6089_v61 = vld [vmem:[%s10038_s13 + $0x18] sm:$0xff]  }
 0x83c   : > { %v5807_v0 = vpop.f32.mrb[105].mxu1  ;;  %v4734_v46 = vmul.f32 %v9432_v6, %v4615_v50  ;;  %v6091_v43 = vld [vmem:[%s10038_s13 + $0x28] sm:$0xff]  }
 0x83d   : > { %v5808_v52 = vadd.f32 %v5807_v0, %v5806_v55  ;;  %4759 = vrot.lane.b32.xlu0 %v4607_v51, %s6239_s28  ;;  %v5809_v8 = vpop.f32.mrb[106].mxu1  ;;  %v4732_v42 = vmul.f32 %v9428_v30, %v4607_v51  ;;  %v6093_v51 = vld [vmem:[%s10038_s13 + $0x38] sm:$0xff]   ;;  %v6094_v55 = vld [vmem:[%s10038_s13 + $0x40] sm:$0xff]   ;;  %v6096_v0 = vld [vmem:[%s10038_s13 + $0x50] sm:$0xff]  }
 0x83e   : > { %v5810_v48 = vpop.f32.mrb[107].mxu1 }
 0x83f   : > { %v5811_v54 = vadd.f32 %v5810_v48, %v5809_v8  ;;  %v5946_v24 = vpop.f32.mrb[132].mxu0  ;;  %4761 = vrot.lane.b32.xlu1 %v4612_v13, %s6239_s28  ;;  %v4540_v34 = vadd.f32 %v5808_v52, %v10000_v19  ;;  %v6098_v52 = vld [vmem:[%s10038_s13 + $0x60] sm:$0xff]   ;;  %v6099_v8 = vld [vmem:[%s10038_s13 + $0x68] sm:$0xff]   ;;  %v6101_v48 = vld [vmem:[%s10038_s13 + $0x78] sm:$0xff]  }
 0x840   : > { %v4619_v11 = vpop.f32.mrb[133].mxu0 }
 0x841   : > { %v4620_v17 = vadd.f32 %v4619_v11, %v4540_v34  ;;  %v5947_v26 = vpop.f32.mrb[134].mxu0  ;;  %4763 = vrot.lane.b32.xlu0 %v4615_v50, %s6239_s28  ;;  %v4543_v6 = vadd.f32 %v5811_v54, %v10000_v19  ;;  %v6090_v50 = vld [vmem:[%s10038_s13 + $0x20] sm:$0xff]  }
 0x842   : > { %v4622_v20 = vpop.f32.mrb[135].mxu0 }
 0x843   : > { %v4623_v29 = vadd.f32 %v4622_v20, %v4543_v6  ;;  %4765 = vrot.lane.b32.xlu1 %v4620_v17, %s6239_s28  ;;  %v5812_v30 = vpop.f32.mrb[108].mxu1  ;;  %v4735_v58 = vmul.f32 %v9434_v57, %v4620_v17  ;;  %v6228_v17 = vld [vmem:[%s6327_s29] sm:$0xff]  ;;  %v10537_v20 = vld [vmem:[#allocation7_spill] sm:$0xff] }
 0x844   : > { %v5813_v40 = vpop.f32.mrb[109].mxu1 }
 0x845   : > { %v5814_v28 = vadd.f32 %v5813_v40, %v5812_v30  ;;  %4767 = vrot.lane.b32.xlu0 %v4623_v29, %s6239_s28  ;;  %v5815_v4 = vpop.f32.mrb[110].mxu1  ;;  %v4736_v39 = vmul.f32 %v9436_v1, %v4623_v29 }
 0x846   : > { %v5816_v21 = vpop.f32.mrb[111].mxu1  ;;  %v10539_v4 = vld [vmem:[#allocation14_spill] sm:$0xff] }
 0x847   : > { %v4548_v9 = vadd.f32 %v5814_v28, %v10000_v19  ;;  %v10540_v21 = vld [vmem:[#allocation10_spill] sm:$0xff] }
 0x849   : > { %v4628_v57 = vadd.f32 %v5946_v24, %v4548_v9  ;;  %v6227_v24 = vld [vmem:[%s6327_s29 + $0x10] sm:$0xff] }
 0x84b   : > { %4769 = vrot.lane.b32.xlu1 %v4628_v57, %s6239_s28  ;;  %v4737_v49 = vmul.f32 %v9438_v3, %v4628_v57 }
 0x8a5   : > { %v4750_v18 = vpop.permute.xlu1 %4749 }
 0x8a6   : > { %v4782_v22 = vadd.f32 %v4750_v18, %v4727_v32 }
 0x8a7   : > { %v4752_v5 = vpop.permute.xlu0 %4751 }
 0x8a8   : > { %v4783_v25 = vadd.f32 %v4752_v5, %v4728_v47 }
 0x8a9   : > { %v4754_v53 = vpop.permute.xlu1 %4753 }
 0x8aa   : > { %v4825_v33 = vpack.c.bf16 %v4783_v25, %v4782_v22  ;;  %v4784_v1 = vadd.f32 %v4754_v53, %v10007_v36  ;;  %v10542_v22 = vld [vmem:[#allocation11_spill] sm:$0xff] }
 0x8ab   : > { %v4756_v56 = vpop.permute.xlu0 %4755 }
 0x8ac   : > { %v4785_v12 = vadd.f32 %v4756_v56, %v10012_v60  ;;  %5948 = vmatprep.subr.bf16.mxu1 %v4825_v33 }
 0x8ad   : > { %v4758_v19 = vpop.permute.xlu1 %4757  ;;  %5949 = vmatpush3.bf16.msra.mxu1 %v4825_v33  ;;  %v10543_v33 = vld [vmem:[#allocation22_spill] sm:$0xff] }
 0x8ae   : > { %v4826_v7 = vpack.c.bf16 %v4785_v12, %v4784_v1  ;;  %v4786_v14 = vadd.f32 %v4758_v19, %v4731_v41  ;;  %v6095_v41 = vld [vmem:[%s10038_s13 + $0x48] sm:$0xff]   ;;  %v10544_v12 = vld [vmem:[#allocation18_spill] sm:$0xff] }
 0x8af   : > { %v4760_v27 = vpop.permute.xlu0 %4759 }
 0x8b0   : > { %v4787_v35 = vadd.f32 %v4760_v27, %v4732_v42  ;;  %5950 = vmatprep.subr.bf16.mxu1 %v4826_v7  ;;  %v6100_v42 = vld [vmem:[%s10038_s13 + $0x70] sm:$0xff]  }
 0x8b1   : > { %v4762_v3 = vpop.permute.xlu1 %4761  ;;  %5951 = vmatpush3.bf16.msra.mxu1 %v4826_v7  ;;  %v10545_v27 = vld [vmem:[#allocation24_spill] sm:$0xff] }
 0x8b2   : > { %v4827_v37 = vpack.c.bf16 %v4787_v35, %v4786_v14  ;;  %v4788_v23 = vadd.f32 %v4762_v3, %v4733_v63  ;;  %v6092_v63 = vld [vmem:[%s10038_s13 + $0x30] sm:$0xff]   ;;  %v10546_v3 = vld [vmem:[#allocation19_spill] sm:$0xff] }
 0x8b3   : > { %v4764_v59 = vpop.permute.xlu0 %4763 }
 0x8b4   : > { %v4789_v10 = vadd.f32 %v4764_v59, %v4734_v46  ;;  %5952 = vmatprep.subr.bf16.mxu1 %v4827_v37  ;;  %v6097_v46 = vld [vmem:[%s10038_s13 + $0x58] sm:$0xff]  }
 0x8b5   : > { %v4766_v32 = vpop.permute.xlu1 %4765  ;;  %5953 = vmatpush3.bf16.msra.mxu1 %v4827_v37 }
 0x8b6   : > { %v4828_v36 = vpack.c.bf16 %v4789_v10, %v4788_v23  ;;  %v4790_v47 = vadd.f32 %v4766_v32, %v4735_v58  ;;  %v10538_v58 = vld [vmem:[#allocation4_spill] sm:$0xff] }
 0x8b7   : > { %v4768_v60 = vpop.permute.xlu0 %4767  ;;  %v10547_v23 = vld [vmem:[#allocation32_spill] sm:$0xff] }
 0x8b8   : > { %v4791_v62 = vadd.f32 %v4768_v60, %v4736_v39  ;;  %5954 = vmatprep.subr.bf16.mxu1 %v4828_v36 }
 0x8b9   : > { %5955 = vmatpush3.bf16.msra.mxu1 %v4828_v36  ;;  %v10548_v36 = vld [vmem:[#allocation28_spill] sm:$0xff] }
 0x8ba   : > { %v4829_v2 = vpack.c.bf16 %v4791_v62, %v4790_v47  ;;  %v10549_v62 = vld [vmem:[#allocation34_spill] sm:$0xff] }
 0x8bc   : > { %5956 = vmatprep.subr.bf16.mxu1 %v4829_v2 }
 0x8bd   : > { %v4770_v38 = vpop.permute.xlu1 %4769  ;;  %5957 = vmatpush3.bf16.msra.mxu1 %v4829_v2 }
 0x8be   : > { %v4792_v13 = vadd.f32 %v4770_v38, %v4737_v49  ;;  %v10541_v49 = vld [vmem:[#allocation15_spill] sm:$0xff] }
 0x8c0   : > { %v4830_v16 = vpack.c.bf16 %v4792_v13, %v4792_v13  ;;  %v10550_v13 = vld [vmem:[#allocation29_spill] sm:$0xff] }
 0x8c2   : > { %v4962_v15 = vsel %vm4960_vm9, %v4830_v16, 0  ;;  %6016 = vmatprep.subr.msk.bf16.mxu1 %vm4960_vm9, %v4830_v16 }
 0x8c3   : > { %5959 = vmatpush3.bf16.msra.mxu1 %v4962_v15 }
 0x8c6   : > { %5961 = vmatmul.mubr.msk.bf16.vlgmr.msra.gmra.mrb[112].mxu1 %vm4911_vm8, %v6087_v45  ;;  %v10551_v45 = vld [vmem:[#allocation5_spill] sm:$0xff] }
 0x8c7   : > { %5964 = vmatprep.mubr.msk.bf16.mxu1 %vm4911_vm8, %v6088_v44 }
 0x8ce   : > { %5965 = vmatmul.mubr.msk.bf16.gmra.mrb[116].mxu1 %vm4911_vm8, %v6089_v61 }
 0x8cf   : > { %5968 = vmatprep.mubr.msk.bf16.mxu1 %vm4911_vm8, %v6090_v50  ;;  %v10552_v50 = vld [vmem:[#allocation2_spill] sm:$0xff] }
 0x8d6   : > { %5969 = vmatmul.mubr.msk.bf16.gmra.mrb[120].mxu1 %vm4911_vm8, %v6091_v43 }
 0x8d7   : > { %5972 = vmatprep.mubr.msk.bf16.mxu1 %vm4911_vm8, %v6092_v63 }
 0x8de   : > { %5973 = vmatmul.mubr.msk.bf16.gmra.mrb[124].mxu1 %vm4911_vm8, %v6093_v51  ;;  %v10553_v51 = vld [vmem:[#allocation6_spill] sm:$0xff] }
 0x8df   : > { %5976 = vmatprep.mubr.msk.bf16.mxu1 %vm4911_vm8, %v6094_v55 }
 0x8e6   : > { %5977 = vmatmul.mubr.msk.bf16.gmra.mrb[128].mxu1 %vm4911_vm8, %v6095_v41 }
 0x8e7   : > { %5980 = vmatprep.mubr.msk.bf16.mxu1 %vm4911_vm8, %v6096_v0  ;;  %v10554_v0 = vld [vmem:[#allocation3_spill] sm:$0xff] }
 0x8ee   : > { %5981 = vmatmul.mubr.msk.bf16.gmra.mrb[132].mxu1 %vm4911_vm8, %v6097_v46 }
 0x8ef   : > { %5984 = vmatprep.mubr.msk.bf16.mxu1 %vm4911_vm8, %v6098_v52 }
 0x8f6   : > { %5985 = vmatmul.mubr.msk.bf16.gmra.mrb[136].mxu1 %vm4911_vm8, %v6099_v8  ;;  %v10555_v8 = vld [vmem:[#allocation12_spill] sm:$0xff] }
 0x8f7   : > { %5988 = vmatprep.mubr.msk.bf16.mxu1 %vm4911_vm8, %v6100_v42 }
 0x8fe   : > { %5989 = vmatmul.mubr.msk.bf16.gmra.mrb[140].mxu1 %vm4911_vm8, %v6101_v48 }
 0x999   : > { %v5962_v54 = vpop.f32.mrb[112].mxu1 }
 0x99a   : > { %v5127_v34 = vadd.f32 %v6227_v24, %v5962_v54  ;;  %v4998_v11 = vpop.f32.mrb[113].mxu1  ;;  %v10556_v54 = vld [vmem:[#allocation8_spill] sm:$0xff] }
 0x99b   : > { %v5125_v26 = vadd.f32 %v6228_v17, %v4998_v11  ;;  %v5963_v6 = vpop.f32.mrb[114].mxu1  ;;  %v10557_v11 = vld [vmem:[#allocation13_spill] sm:$0xff] }
 0x99c   : > { %5159 = vst.msk [vmem:[%s10083_s14 + $0x10] sm:$0xff] %vm730_vm2, %v5127_v34  ;;  %v5128_v29 = vadd.f32 %v5963_v6, %v10537_v20  ;;  %v5001_v30 = vpop.f32.mrb[115].mxu1  ;;  %v10558_v6 = vld [vmem:[#allocation9_spill] sm:$0xff] }
 0x99d   : > { %5157 = vst.msk [vmem:[%s10083_s14] sm:$0xff] %vm730_vm2, %v5125_v26  ;;  %v5126_v40 = vadd.f32 %v5001_v30, %v10538_v58  ;;  %v10559_v30 = vld [vmem:[#allocation20_spill] sm:$0xff] }
 0x99e   : > { %5160 = vst.msk [vmem:[%s10083_s14 + $0x18] sm:$0xff] %vm730_vm2, %v5128_v29 }
 0x99f   : > { %5158 = vst.msk [vmem:[%s10083_s14 + $0x8] sm:$0xff] %vm730_vm2, %v5126_v40 }
 0x9a1   : > { %v5966_v28 = vpop.f32.mrb[116].mxu1 }
 0x9a2   : > { %v5131_v39 = vadd.f32 %v5966_v28, %v10539_v4  ;;  %v5014_v31 = vpop.f32.mrb[117].mxu1  ;;  %v10560_v28 = vld [vmem:[#allocation16_spill] sm:$0xff] }
 0x9a3   : > { %v5129_v9 = vadd.f32 %v5014_v31, %v10540_v21  ;;  %v5967_v57 = vpop.f32.mrb[118].mxu1  ;;  %v10561_v31 = vld [vmem:[#allocation21_spill] sm:$0xff] }
 0x9a4   : > { %5163 = vst.msk [vmem:[%s10083_s14 + $0x30] sm:$0xff] %vm730_vm2, %v5131_v39  ;;  %v5132_v18 = vadd.f32 %v5967_v57, %v10541_v49  ;;  %v5017_v5 = vpop.f32.mrb[119].mxu1  ;;  %v10562_v57 = vld [vmem:[#allocation17_spill] sm:$0xff] }
 0x9a5   : > { %5161 = vst.msk [vmem:[%s10083_s14 + $0x20] sm:$0xff] %vm730_vm2, %v5129_v9  ;;  %v5130_v25 = vadd.f32 %v5017_v5, %v10542_v22  ;;  %v10563_v5 = vld [vmem:[#allocation30_spill] sm:$0xff] }
 0x9a6   : > { %5164 = vst.msk [vmem:[%s10083_s14 + $0x38] sm:$0xff] %vm730_vm2, %v5132_v18 }
 0x9a7   : > { %5162 = vst.msk [vmem:[%s10083_s14 + $0x28] sm:$0xff] %vm730_vm2, %v5130_v25 }
 0x9a9   : > { %v5970_v53 = vpop.f32.mrb[120].mxu1 }
 0x9aa   : > { %v5135_v56 = vadd.f32 %v5970_v53, %v10543_v33  ;;  %v5030_v1 = vpop.f32.mrb[121].mxu1  ;;  %v10564_v53 = vld [vmem:[#allocation25_spill] sm:$0xff] }
 0x9ab   : > { %v5133_v19 = vadd.f32 %v5030_v1, %v10544_v12  ;;  %v5971_v7 = vpop.f32.mrb[122].mxu1  ;;  %v10565_v1 = vld [vmem:[#allocation31_spill] sm:$0xff] }
 0x9ac   : > { %5167 = vst.msk [vmem:[%s10083_s14 + $0x50] sm:$0xff] %vm730_vm2, %v5135_v56  ;;  %v5136_v14 = vadd.f32 %v5971_v7, %v10545_v27  ;;  %v5033_v35 = vpop.f32.mrb[123].mxu1  ;;  %v10566_v7 = vld [vmem:[#allocation26_spill] sm:$0xff] }
 0x9ad   : > { %5165 = vst.msk [vmem:[%s10083_s14 + $0x40] sm:$0xff] %vm730_vm2, %v5133_v19  ;;  %v5134_v37 = vadd.f32 %v5033_v35, %v10546_v3 }
 0x9ae   : > { %5168 = vst.msk [vmem:[%s10083_s14 + $0x58] sm:$0xff] %vm730_vm2, %v5136_v14 }
 0x9af   : > { %5166 = vst.msk [vmem:[%s10083_s14 + $0x48] sm:$0xff] %vm730_vm2, %v5134_v37 }
 0x9b1   : > { %v5974_v59 = vpop.f32.mrb[124].mxu1 }
 0x9b2   : > { %v5139_v10 = vadd.f32 %v5974_v59, %v10547_v23  ;;  %v5046_v32 = vpop.f32.mrb[125].mxu1 }
 0x9b3   : > { %v5137_v60 = vadd.f32 %v5046_v32, %v10548_v36  ;;  %v5975_v47 = vpop.f32.mrb[126].mxu1 }
 0x9b4   : > { %5171 = vst.msk [vmem:[%s10083_s14 + $0x70] sm:$0xff] %vm730_vm2, %v5139_v10  ;;  %v5140_v2 = vadd.f32 %v5975_v47, %v10549_v62  ;;  %v5049_v38 = vpop.f32.mrb[127].mxu1 }
 0x9b5   : > { %5169 = vst.msk [vmem:[%s10083_s14 + $0x60] sm:$0xff] %vm730_vm2, %v5137_v60  ;;  %v5138_v16 = vadd.f32 %v5049_v38, %v10550_v13 }
 0x9b6   : > { %5172 = vst.msk [vmem:[%s10083_s14 + $0x78] sm:$0xff] %vm730_vm2, %v5140_v2 }
 0x9b7   : > { %5170 = vst.msk [vmem:[%s10083_s14 + $0x68] sm:$0xff] %vm730_vm2, %v5138_v16 }
 0x9b9   : > { %v5978_v15 = vpop.f32.mrb[128].mxu1 }
 0x9ba   : > { %v5143_v44 = vadd.f32 %v5978_v15, %v10551_v45  ;;  %v5062_v61 = vpop.f32.mrb[129].mxu1 }
 0x9bb   : > { %v5141_v43 = vadd.f32 %v5062_v61, %v10552_v50  ;;  %v5979_v63 = vpop.f32.mrb[130].mxu1 }
 0x9bc   : > { %5175 = vst.msk [vmem:[%s10083_s14 + $0x90] sm:$0xff] %vm730_vm2, %v5143_v44  ;;  %v5144_v55 = vadd.f32 %v5979_v63, %v10553_v51  ;;  %v5065_v41 = vpop.f32.mrb[131].mxu1 }
 0x9bd   : > { %5173 = vst.msk [vmem:[%s10083_s14 + $0x80] sm:$0xff] %vm730_vm2, %v5141_v43  ;;  %v5142_v46 = vadd.f32 %v5065_v41, %v10554_v0 }
 0x9be   : > { %5176 = vst.msk [vmem:[%s10083_s14 + $0x98] sm:$0xff] %vm730_vm2, %v5144_v55 }
 0x9bf   : > { %5174 = vst.msk [vmem:[%s10083_s14 + $0x88] sm:$0xff] %vm730_vm2, %v5142_v46 }
 0x9c1   : > { %v5982_v52 = vpop.f32.mrb[132].mxu1 }
 0x9c2   : > { %v5147_v42 = vadd.f32 %v5982_v52, %v10555_v8  ;;  %v5078_v48 = vpop.f32.mrb[133].mxu1 }
 0x9c3   : > { %v5145_v24 = vadd.f32 %v5078_v48, %v10556_v54  ;;  %v5983_v34 = vpop.f32.mrb[134].mxu1 }
 0x9c4   : > { %5179 = vst.msk [vmem:[%s10083_s14 + $0xb0] sm:$0xff] %vm730_vm2, %v5147_v42  ;;  %v5148_v17 = vadd.f32 %v5983_v34, %v10557_v11  ;;  %v5081_v26 = vpop.f32.mrb[135].mxu1 }
 0x9c5   : > { %5177 = vst.msk [vmem:[%s10083_s14 + $0xa0] sm:$0xff] %vm730_vm2, %v5145_v24  ;;  %v5146_v20 = vadd.f32 %v5081_v26, %v10558_v6 }
 0x9c6   : > { %5180 = vst.msk [vmem:[%s10083_s14 + $0xb8] sm:$0xff] %vm730_vm2, %v5148_v17 }
 0x9c7   : > { %5178 = vst.msk [vmem:[%s10083_s14 + $0xa8] sm:$0xff] %vm730_vm2, %v5146_v20 }
 0x9c9   : > { %v5986_v29 = vpop.f32.mrb[136].mxu1 }
 0x9ca   : > { %v5151_v58 = vadd.f32 %v5986_v29, %v10559_v30  ;;  %v5094_v40 = vpop.f32.mrb[137].mxu1 }
 0x9cb   : > { %v5149_v4 = vadd.f32 %v5094_v40, %v10560_v28  ;;  %v5987_v39 = vpop.f32.mrb[138].mxu1 }
 0x9cc   : > { %5183 = vst.msk [vmem:[%s10083_s14 + $0xd0] sm:$0xff] %vm730_vm2, %v5151_v58  ;;  %v5152_v21 = vadd.f32 %v5987_v39, %v10561_v31  ;;  %v5097_v9 = vpop.f32.mrb[139].mxu1 }
 0x9cd   : > { %5181 = vst.msk [vmem:[%s10083_s14 + $0xc0] sm:$0xff] %vm730_vm2, %v5149_v4  ;;  %v5150_v49 = vadd.f32 %v5097_v9, %v10562_v57 }
 0x9ce   : > { %5184 = vst.msk [vmem:[%s10083_s14 + $0xd8] sm:$0xff] %vm730_vm2, %v5152_v21 }
 0x9cf   : > { %5182 = vst.msk [vmem:[%s10083_s14 + $0xc8] sm:$0xff] %vm730_vm2, %v5150_v49 }
 0x9d1   : > { %v5990_v18 = vpop.f32.mrb[140].mxu1 }
 0x9d2   : > { %v5155_v22 = vadd.f32 %v5990_v18, %v10563_v5  ;;  %v5110_v25 = vpop.f32.mrb[141].mxu1 }
 0x9d3   : > { %v5153_v33 = vadd.f32 %v5110_v25, %v10564_v53  ;;  %v5991_v56 = vpop.f32.mrb[142].mxu1 }
 0x9d4   : > { %5187 = vst.msk [vmem:[%s10083_s14 + $0xf0] sm:$0xff] %vm730_vm2, %v5155_v22  ;;  %v5156_v12 = vadd.f32 %v5991_v56, %v10565_v1  ;;  %v5113_v19 = vpop.f32.mrb[143].mxu1 }
 0x9d5   : > { %5185 = vst.msk [vmem:[%s10083_s14 + $0xe0] sm:$0xff] %vm730_vm2, %v5153_v33  ;;  %v5154_v27 = vadd.f32 %v5113_v19, %v10566_v7 }
 0x9d6   : > { %5188 = vst.msk [vmem:[%s10083_s14 + $0xf8] sm:$0xff] %vm730_vm2, %v5156_v12 }
 0x9d7   : > { %5186 = vst.msk [vmem:[%s10083_s14 + $0xe8] sm:$0xff] %vm730_vm2, %v5154_v27 }
 0x9d8 PF: > { %s23_s21 = sadd.s32 1, %s6235_s21  }
 0x9d9   : > { %p20_p4 = scmp.ge.s32.totalorder %s23_s21, 4  }
 0x9db   :  { %22 = sbr.rel (!%p20_p4) target bundleno = 1 (0x1), region = 118 }

</bundles_post_ra>
